<compile_context>
chip_gen: v7x
topology: tpu7x:2x2x1
jax: 0.10.0
libtpu: 0.0.40
codegen_flags: <defaults>
</compile_context>

<pallas_src>
import functools
import jax
import jax.numpy as jnp
from jax import lax
from jax.experimental import pallas as pl
from jax.experimental.pallas import tpu as pltpu


def _round_up(x, m):
    return ((x + m - 1) // m) * m


_PARALLEL_M = pltpu.CompilerParams(dimension_semantics=("parallel",))


# ----------------------------- Pallas kernels ------------------------------

def _mm_bn_kernel(a_ref, b_ref, scale_ref, bias_ref, o_ref, *, apply_relu):
    acc = jnp.dot(a_ref[...], b_ref[...], preferred_element_type=jnp.float32)
    out = acc * scale_ref[...] + bias_ref[...]
    if apply_relu:
        out = jnp.maximum(out, 0.0)
    o_ref[...] = out.astype(o_ref.dtype)


def _mm_bn_res_kernel(a_ref, b_ref, scale_ref, bias_ref, res_ref, o_ref, *, apply_relu):
    acc = jnp.dot(a_ref[...], b_ref[...], preferred_element_type=jnp.float32)
    out = acc * scale_ref[...] + bias_ref[...] + res_ref[...].astype(jnp.float32)
    if apply_relu:
        out = jnp.maximum(out, 0.0)
    o_ref[...] = out.astype(o_ref.dtype)


def _mm2_bn_kernel(a1_ref, b1_ref, s1_ref, t1_ref,
                   a2_ref, b2_ref, s2_ref, t2_ref, o_ref):
    """relu((A1@B1)*s1+t1 + (A2@B2)*s2+t2): conv2 + 1x1-shortcut fused."""
    m1 = jnp.dot(a1_ref[...], b1_ref[...], preferred_element_type=jnp.float32)
    m2 = jnp.dot(a2_ref[...], b2_ref[...], preferred_element_type=jnp.float32)
    out = m1 * s1_ref[...] + t1_ref[...] + m2 * s2_ref[...] + t2_ref[...]
    o_ref[...] = jnp.maximum(out, 0.0).astype(o_ref.dtype)


# ----------------------------- kernel wrappers ------------------------------

def fused_matmul(a, b, scale, bias, residual=None, apply_relu=True,
                 out_dtype=jnp.bfloat16, tile_m=256):
    """maybe_relu((a @ b) * scale + bias [+ residual]), tiled over rows of a."""
    m, k = a.shape
    n = b.shape[1]
    tm = min(tile_m, _round_up(m, 8))
    a = a.astype(jnp.bfloat16)
    b = b.astype(jnp.bfloat16)
    scale2 = scale.reshape(1, n).astype(jnp.float32)
    bias2 = bias.reshape(1, n).astype(jnp.float32)

    row_a = pl.BlockSpec((tm, k), lambda i: (i, 0))
    full = lambda s: pl.BlockSpec(s, lambda i: (0, 0))   # weights / scale stay resident

    if residual is None:
        kernel = functools.partial(_mm_bn_kernel, apply_relu=apply_relu)
        inputs = (a, b, scale2, bias2)
        in_specs = [row_a, full((k, n)), full((1, n)), full((1, n))]
    else:
        kernel = functools.partial(_mm_bn_res_kernel, apply_relu=apply_relu)
        inputs = (a, b, scale2, bias2, residual.astype(jnp.bfloat16))
        in_specs = [row_a, full((k, n)), full((1, n)), full((1, n)),
                    pl.BlockSpec((tm, n), lambda i: (i, 0))]

    return pl.pallas_call(
        kernel,
        out_shape=jax.ShapeDtypeStruct((m, n), out_dtype),
        grid=(pl.cdiv(m, tm),),
        in_specs=in_specs,
        out_specs=pl.BlockSpec((tm, n), lambda i: (i, 0)),
        compiler_params=_PARALLEL_M,
    )(*inputs)


def fused_dual_matmul(a1, b1, s1, t1, a2, b2, s2, t2,
                      out_dtype=jnp.bfloat16, tile_m=256):
    """relu((a1@b1)*s1+t1 + (a2@b2)*s2+t2): whole BasicBlock tail in one call."""
    m, k1 = a1.shape
    k2 = a2.shape[1]
    n = b1.shape[1]
    tm = min(tile_m, _round_up(m, 8))
    a1 = a1.astype(jnp.bfloat16)
    b1 = b1.astype(jnp.bfloat16)
    a2 = a2.astype(jnp.bfloat16)
    b2 = b2.astype(jnp.bfloat16)
    s1 = s1.reshape(1, n).astype(jnp.float32)
    t1 = t1.reshape(1, n).astype(jnp.float32)
    s2 = s2.reshape(1, n).astype(jnp.float32)
    t2 = t2.reshape(1, n).astype(jnp.float32)

    full = lambda s: pl.BlockSpec(s, lambda i: (0, 0))
    return pl.pallas_call(
        _mm2_bn_kernel,
        out_shape=jax.ShapeDtypeStruct((m, n), out_dtype),
        grid=(pl.cdiv(m, tm),),
        in_specs=[pl.BlockSpec((tm, k1), lambda i: (i, 0)), full((k1, n)),
                  full((1, n)), full((1, n)),
                  pl.BlockSpec((tm, k2), lambda i: (i, 0)), full((k2, n)),
                  full((1, n)), full((1, n))],
        out_specs=pl.BlockSpec((tm, n), lambda i: (i, 0)),
        compiler_params=_PARALLEL_M,
    )(a1, b1, s1, t1, a2, b2, s2, t2)


# ------------------------------ conv lowering -------------------------------

def im2col(x, k, stride, padding):
    """x: (N,H,W,C) bf16 -> (N*Ho*Wo, k*k*C) patches, (kh, kw, cin) column order."""
    n, h, w, c = x.shape
    ho = (h + 2 * padding - k) // stride + 1
    wo = (w + 2 * padding - k) // stride + 1
    xp = jnp.pad(x, ((0, 0), (padding, padding), (padding, padding), (0, 0)))
    cols = [xp[:, i:i + stride * ho:stride, j:j + stride * wo:stride, :]
            for i in range(k) for j in range(k)]
    patches = jnp.concatenate(cols, axis=-1)
    return patches.reshape(n * ho * wo, k * k * c), (n, ho, wo)


def conv_bn(x, w, scale, bias, stride, padding, residual=None, apply_relu=True):
    kh, kw, cin, cout = w.shape
    a, (n, ho, wo) = im2col(x, kh, stride, padding)
    res2 = None if residual is None else residual.reshape(n * ho * wo, cout)
    out = fused_matmul(a, w.reshape(kh * kw * cin, cout), scale, bias,
                       residual=res2, apply_relu=apply_relu)
    return out.reshape(n, ho, wo, cout)


# ------------------------------- parameters ---------------------------------

def conv_weight(key, cin, cout, k):
    std = (2.0 / (cin * k * k)) ** 0.5
    return std * jax.random.normal(key, (k, k, cin, cout), jnp.float32)


def bn_params(key, c, eps=1e-5):
    k1, k2 = jax.random.split(key)
    gamma = 1.0 + 0.1 * jax.random.normal(k1, (c,), jnp.float32)
    beta = 0.1 * jax.random.normal(k2, (c,), jnp.float32)
    running_mean = jnp.zeros((c,), jnp.float32)
    running_var = jnp.ones((c,), jnp.float32)
    scale = gamma / jnp.sqrt(running_var + eps)
    bias = beta - running_mean * scale
    return scale, bias


def make_basic_block(key, in_planes, planes, stride):
    ks = jax.random.split(key, 6)
    blk = {
        "w1": conv_weight(ks[0], in_planes, planes, 3),
        "bn1": bn_params(ks[1], planes),
        "w2": conv_weight(ks[2], planes, planes, 3),
        "bn2": bn_params(ks[3], planes),
        "stride": stride,
        "shortcut": None,
    }
    if stride != 1 or in_planes != planes:      # BasicBlock.expansion == 1
        blk["shortcut"] = (conv_weight(ks[4], in_planes, planes, 1),
                           bn_params(ks[5], planes))
    return blk


def make_resnet_cifar(key, layers=(1, 1, 1), num_classes=10):
    keys = jax.random.split(key, 7)
    params = {"conv1_w": conv_weight(keys[0], 3, 16, 3),
              "bn1": bn_params(keys[1], 16),
              "stages": []}
    in_planes = 16
    for s_idx, (planes, stride) in enumerate(((16, 1), (32, 2), (64, 2))):
        strides = [stride] + [1] * (layers[s_idx] - 1)
        stage = []
        for b_idx, st in enumerate(strides):
            bkey = jax.random.fold_in(keys[2 + s_idx], b_idx)
            stage.append(make_basic_block(bkey, in_planes, planes, st))
            in_planes = planes
        params["stages"].append(stage)
    fc_w = 0.05 * jax.random.normal(keys[5], (64, num_classes), jnp.float32)
    fc_b = 0.05 * jax.random.normal(keys[6], (num_classes,), jnp.float32)
    params["fc"] = (fc_w, fc_b)
    return params


# --------------------------------- forward ----------------------------------

def basic_block_forward(blk, x):
    s1, b1 = blk["bn1"]
    s2, b2 = blk["bn2"]
    h1 = conv_bn(x, blk["w1"], s1, b1, blk["stride"], 1, apply_relu=True)
    if blk["shortcut"] is None:
        # identity shortcut: residual add + ReLU fused into conv2's matmul
        return conv_bn(h1, blk["w2"], s2, b2, 1, 1, residual=x, apply_relu=True)
    # projection shortcut: conv2 + 1x1 shortcut conv + both BNs + add + ReLU fused
    wsc, (ssc, bsc) = blk["shortcut"]
    _, _, cin2, cout = blk["w2"].shape
    a1, (n, ho, wo) = im2col(h1, 3, 1, 1)
    st = blk["stride"]
    a2 = x[:, ::st, ::st, :].reshape(n * ho * wo, x.shape[-1])
    out = fused_dual_matmul(a1, blk["w2"].reshape(9 * cin2, cout), s2, b2,
                            a2, wsc.reshape(wsc.shape[2], cout), ssc, bsc)
    return out.reshape(n, ho, wo, cout)


def resnet_forward(params, x_nchw, num_classes=10):
    # NCHW -> NHWC; bf16 activations between layers, f32 accumulation in kernels.
    x = jnp.transpose(x_nchw, (0, 2, 3, 1)).astype(jnp.bfloat16)
    # pad input channels 3 -> 4 so conv1's contraction is K=36 (not 27)
    x = jnp.pad(x, ((0, 0), (0, 0), (0, 0), (0, 1)))
    w1 = jnp.pad(params["conv1_w"], ((0, 0), (0, 0), (0, 1), (0, 0)))
    s1, b1 = params["bn1"]
    x = conv_bn(x, w1, s1, b1, 1, 1, apply_relu=True)
    for stage in params["stages"]:
        for blk in stage:
            x = basic_block_forward(blk, x)
    # AdaptiveAvgPool2d((1,1)) + flatten (tiny reduction, kept as XLA glue)
    feat = jnp.mean(x.astype(jnp.float32), axis=(1, 2)).astype(jnp.bfloat16)  # (N, 64)
    fc_w, fc_b = params["fc"]
    # lane-dense FC: compute a 128-wide output slab, slice to num_classes after.
    n_pad = _round_up(num_classes, 128)
    w_pad = jnp.pad(fc_w, ((0, 0), (0, n_pad - num_classes)))
    b_pad = jnp.pad(fc_b, (0, n_pad - num_classes))
    logits = fused_matmul(feat, w_pad, jnp.ones((n_pad,), jnp.float32), b_pad,
                          apply_relu=False, out_dtype=jnp.float32)
    return logits[:, :num_classes]


# ------------------------- independent JAX reference -------------------------

def _ref_conv(x, w, stride, padding):
    return lax.conv_general_dilated(
        x.astype(jnp.bfloat16), w.astype(jnp.bfloat16),
        window_strides=(stride, stride),
        padding=[(padding, padding), (padding, padding)],
        dimension_numbers=("NHWC", "HWIO", "NHWC"),
        preferred_element_type=jnp.float32)


def resnet_reference(params, x_nchw, num_classes=10):
    """Pure-JAX reference using lax.conv (independent of the im2col lowering)."""
    x = jnp.transpose(x_nchw, (0, 2, 3, 1)).astype(jnp.bfloat16)
    s1, b1 = params["bn1"]
    h = jnp.maximum(_ref_conv(x, params["conv1_w"], 1, 1) * s1 + b1,
                    0.0).astype(jnp.bfloat16)
    for stage in params["stages"]:
        for blk in stage:
            sb1, bb1 = blk["bn1"]
            sb2, bb2 = blk["bn2"]
            h1 = jnp.maximum(_ref_conv(h, blk["w1"], blk["stride"], 1) * sb1 + bb1,
                             0.0).astype(jnp.bfloat16)
            main = _ref_conv(h1, blk["w2"], 1, 1) * sb2 + bb2
            if blk["shortcut"] is None:
                sc = h.astype(jnp.float32)
            else:
                wsc, (ssc, bsc) = blk["shortcut"]
                sc = _ref_conv(h, wsc, blk["stride"], 0) * ssc + bsc
            h = jnp.maximum(main + sc, 0.0).astype(jnp.bfloat16)
    feat = jnp.mean(h.astype(jnp.float32), axis=(1, 2)).astype(jnp.bfloat16)
    fc_w, fc_b = params["fc"]
    return jnp.dot(feat, fc_w.astype(jnp.bfloat16),
                   preferred_element_type=jnp.float32) + fc_b


# ----------------------------------- main ------------------------------------

if __name__ == "__main__":
    key = jax.random.PRNGKey(0)
    pkey, xkey = jax.random.split(key)

    params = make_resnet_cifar(pkey, layers=(1, 1, 1), num_classes=10)
    x = jax.random.normal(xkey, (2, 3, 32, 32), jnp.float32)   # NCHW, CIFAR-sized

    fwd = jax.jit(lambda xx: resnet_forward(params, xx, num_classes=10))
    out = jax.block_until_ready(fwd(x))
    assert out.shape == (2, 10), out.shape
    assert bool(jnp.all(jnp.isfinite(out)))

    ref_fn = jax.jit(lambda xx: resnet_reference(params, xx, num_classes=10))
    ref = jax.block_until_ready(ref_fn(x))
    assert jnp.allclose(out, ref, rtol=2e-2, atol=2e-2), (out, ref)

    print("KERNEL_OK")
</pallas_src>

<mosaic_0001>
module attributes {stable_mosaic.version = 11 : i64} {
  func.func @_mm_bn_kernel(%arg0: i32, %arg1: memref<256x36xbf16, #tpu.memory_space<vmem>>, %arg2: memref<36x16xbf16, #tpu.memory_space<vmem>>, %arg3: memref<1x16xf32, #tpu.memory_space<vmem>>, %arg4: memref<1x16xf32, #tpu.memory_space<vmem>>, %arg5: memref<256x16xbf16, #tpu.memory_space<vmem>>) attributes {dimension_semantics = [#tpu.dimension_semantics<parallel>], iteration_bounds = array<i64: 8>, scalar_prefetch = 0 : i64, scratch_operands = 0 : i64, tpu.core_type = #tpu.core_type<tc>, window_params = [{transform_indices = @transform_0, window_bounds = array<i64: 256, 36>}, {pipeline_mode = #tpu.pipeline_mode<synchronous>, transform_indices = @transform_1, window_bounds = array<i64: 36, 16>}, {pipeline_mode = #tpu.pipeline_mode<synchronous>, transform_indices = @transform_2, window_bounds = array<i64: 1, 16>}, {pipeline_mode = #tpu.pipeline_mode<synchronous>, transform_indices = @transform_3, window_bounds = array<i64: 1, 16>}, {transform_indices = @transform_4, window_bounds = array<i64: 256, 16>}]} {
    %c0 = arith.constant 0 : index
    %c0_0 = arith.constant 0 : index
    %0 = vector.load %arg1[%c0, %c0_0] : memref<256x36xbf16, #tpu.memory_space<vmem>>, vector<256x36xbf16>
    %c0_1 = arith.constant 0 : index
    %c0_2 = arith.constant 0 : index
    %1 = vector.load %arg2[%c0_1, %c0_2] : memref<36x16xbf16, #tpu.memory_space<vmem>>, vector<36x16xbf16>
    %cst = arith.constant dense<0.000000e+00> : vector<256x16xf32>
    %2 = tpu.matmul %0, %1, %cst {dimension_numbers = #tpu.dot_dimension_numbers<[1], [0], [0], [1], [0, 0, 1, 1], [], []>} : vector<256x36xbf16>, vector<36x16xbf16>, vector<256x16xf32> -> vector<256x16xf32>
    %c0_3 = arith.constant 0 : index
    %c0_4 = arith.constant 0 : index
    %3 = vector.load %arg3[%c0_3, %c0_4] : memref<1x16xf32, #tpu.memory_space<vmem>>, vector<1x16xf32>
    %4 = vector.broadcast %3 : vector<1x16xf32> to vector<256x16xf32>
    %5 = arith.mulf %2, %4 : vector<256x16xf32>
    %c0_5 = arith.constant 0 : index
    %c0_6 = arith.constant 0 : index
    %6 = vector.load %arg4[%c0_5, %c0_6] : memref<1x16xf32, #tpu.memory_space<vmem>>, vector<1x16xf32>
    %7 = vector.broadcast %6 : vector<1x16xf32> to vector<256x16xf32>
    %8 = arith.addf %5, %7 : vector<256x16xf32>
    %cst_7 = arith.constant 0.000000e+00 : f32
    %9 = vector.broadcast %cst_7 : f32 to vector<256x16xf32>
    %10 = arith.maximumf %8, %9 : vector<256x16xf32>
    %11 = arith.truncf %10 : vector<256x16xf32> to vector<256x16xbf16>
    %c0_8 = arith.constant 0 : index
    %c0_9 = arith.constant 0 : index
    %12 = vector.load %arg5[%c0_8, %c0_9] : memref<256x16xbf16, #tpu.memory_space<vmem>>, vector<256x16xbf16>
    tpu.vector_store %arg5[%c0_8, %c0_9], %11 {strides = array<i32>} : memref<256x16xbf16, #tpu.memory_space<vmem>>, vector<256x16xbf16>,
    return
  }
  func.func @transform_0(%arg0: i32) -> (i32, i32) {
    %c0_i32 = arith.constant 0 : i32
    %c0_i32_0 = arith.constant 0 : i32
    return %arg0, %c0_i32 : i32, i32
  }
  func.func @transform_1(%arg0: i32) -> (i32, i32) {
    %c0_i32 = arith.constant 0 : i32
    %c0_i32_0 = arith.constant 0 : i32
    %c0_i32_1 = arith.constant 0 : i32
    return %c0_i32, %c0_i32_0 : i32, i32
  }
  func.func @transform_2(%arg0: i32) -> (i32, i32) {
    %c0_i32 = arith.constant 0 : i32
    %c0_i32_0 = arith.constant 0 : i32
    %c0_i32_1 = arith.constant 0 : i32
    return %c0_i32, %c0_i32_0 : i32, i32
  }
  func.func @transform_3(%arg0: i32) -> (i32, i32) {
    %c0_i32 = arith.constant 0 : i32
    %c0_i32_0 = arith.constant 0 : i32
    %c0_i32_1 = arith.constant 0 : i32
    return %c0_i32, %c0_i32_0 : i32, i32
  }
  func.func @transform_4(%arg0: i32) -> (i32, i32) {
    %c0_i32 = arith.constant 0 : i32
    %c0_i32_0 = arith.constant 0 : i32
    return %arg0, %c0_i32 : i32, i32
  }
}

module attributes {stable_mosaic.version = 11 : i64} {
  func.func @_mm_bn_kernel(%arg0: i32, %arg1: memref<256x144xbf16, #tpu.memory_space<vmem>>, %arg2: memref<144x16xbf16, #tpu.memory_space<vmem>>, %arg3: memref<1x16xf32, #tpu.memory_space<vmem>>, %arg4: memref<1x16xf32, #tpu.memory_space<vmem>>, %arg5: memref<256x16xbf16, #tpu.memory_space<vmem>>) attributes {dimension_semantics = [#tpu.dimension_semantics<parallel>], iteration_bounds = array<i64: 8>, scalar_prefetch = 0 : i64, scratch_operands = 0 : i64, tpu.core_type = #tpu.core_type<tc>, window_params = [{transform_indices = @transform_0, window_bounds = array<i64: 256, 144>}, {pipeline_mode = #tpu.pipeline_mode<synchronous>, transform_indices = @transform_1, window_bounds = array<i64: 144, 16>}, {pipeline_mode = #tpu.pipeline_mode<synchronous>, transform_indices = @transform_2, window_bounds = array<i64: 1, 16>}, {pipeline_mode = #tpu.pipeline_mode<synchronous>, transform_indices = @transform_3, window_bounds = array<i64: 1, 16>}, {transform_indices = @transform_4, window_bounds = array<i64: 256, 16>}]} {
    %c0 = arith.constant 0 : index
    %c0_0 = arith.constant 0 : index
    %0 = vector.load %arg1[%c0, %c0_0] : memref<256x144xbf16, #tpu.memory_space<vmem>>, vector<256x144xbf16>
    %c0_1 = arith.constant 0 : index
    %c0_2 = arith.constant 0 : index
    %1 = vector.load %arg2[%c0_1, %c0_2] : memref<144x16xbf16, #tpu.memory_space<vmem>>, vector<144x16xbf16>
    %cst = arith.constant dense<0.000000e+00> : vector<256x16xf32>
    %2 = tpu.matmul %0, %1, %cst {dimension_numbers = #tpu.dot_dimension_numbers<[1], [0], [0], [1], [0, 0, 1, 1], [], []>} : vector<256x144xbf16>, vector<144x16xbf16>, vector<256x16xf32> -> vector<256x16xf32>
    %c0_3 = arith.constant 0 : index
    %c0_4 = arith.constant 0 : index
    %3 = vector.load %arg3[%c0_3, %c0_4] : memref<1x16xf32, #tpu.memory_space<vmem>>, vector<1x16xf32>
    %4 = vector.broadcast %3 : vector<1x16xf32> to vector<256x16xf32>
    %5 = arith.mulf %2, %4 : vector<256x16xf32>
    %c0_5 = arith.constant 0 : index
    %c0_6 = arith.constant 0 : index
    %6 = vector.load %arg4[%c0_5, %c0_6] : memref<1x16xf32, #tpu.memory_space<vmem>>, vector<1x16xf32>
    %7 = vector.broadcast %6 : vector<1x16xf32> to vector<256x16xf32>
    %8 = arith.addf %5, %7 : vector<256x16xf32>
    %cst_7 = arith.constant 0.000000e+00 : f32
    %9 = vector.broadcast %cst_7 : f32 to vector<256x16xf32>
    %10 = arith.maximumf %8, %9 : vector<256x16xf32>
    %11 = arith.truncf %10 : vector<256x16xf32> to vector<256x16xbf16>
    %c0_8 = arith.constant 0 : index
    %c0_9 = arith.constant 0 : index
    %12 = vector.load %arg5[%c0_8, %c0_9] : memref<256x16xbf16, #tpu.memory_space<vmem>>, vector<256x16xbf16>
    tpu.vector_store %arg5[%c0_8, %c0_9], %11 {strides = array<i32>} : memref<256x16xbf16, #tpu.memory_space<vmem>>, vector<256x16xbf16>,
    return
  }
  func.func @transform_0(%arg0: i32) -> (i32, i32) {
    %c0_i32 = arith.constant 0 : i32
    %c0_i32_0 = arith.constant 0 : i32
    return %arg0, %c0_i32 : i32, i32
  }
  func.func @transform_1(%arg0: i32) -> (i32, i32) {
    %c0_i32 = arith.constant 0 : i32
    %c0_i32_0 = arith.constant 0 : i32
    %c0_i32_1 = arith.constant 0 : i32
    return %c0_i32, %c0_i32_0 : i32, i32
  }
  func.func @transform_2(%arg0: i32) -> (i32, i32) {
    %c0_i32 = arith.constant 0 : i32
    %c0_i32_0 = arith.constant 0 : i32
    %c0_i32_1 = arith.constant 0 : i32
    return %c0_i32, %c0_i32_0 : i32, i32
  }
  func.func @transform_3(%arg0: i32) -> (i32, i32) {
    %c0_i32 = arith.constant 0 : i32
    %c0_i32_0 = arith.constant 0 : i32
    %c0_i32_1 = arith.constant 0 : i32
    return %c0_i32, %c0_i32_0 : i32, i32
  }
  func.func @transform_4(%arg0: i32) -> (i32, i32) {
    %c0_i32 = arith.constant 0 : i32
    %c0_i32_0 = arith.constant 0 : i32
    return %arg0, %c0_i32 : i32, i32
  }
}

module attributes {stable_mosaic.version = 11 : i64} {
  func.func @_mm_bn_res_kernel(%arg0: i32, %arg1: memref<256x144xbf16, #tpu.memory_space<vmem>>, %arg2: memref<144x16xbf16, #tpu.memory_space<vmem>>, %arg3: memref<1x16xf32, #tpu.memory_space<vmem>>, %arg4: memref<1x16xf32, #tpu.memory_space<vmem>>, %arg5: memref<256x16xbf16, #tpu.memory_space<vmem>>, %arg6: memref<256x16xbf16, #tpu.memory_space<vmem>>) attributes {dimension_semantics = [#tpu.dimension_semantics<parallel>], iteration_bounds = array<i64: 8>, scalar_prefetch = 0 : i64, scratch_operands = 0 : i64, tpu.core_type = #tpu.core_type<tc>, window_params = [{transform_indices = @transform_0, window_bounds = array<i64: 256, 144>}, {pipeline_mode = #tpu.pipeline_mode<synchronous>, transform_indices = @transform_1, window_bounds = array<i64: 144, 16>}, {pipeline_mode = #tpu.pipeline_mode<synchronous>, transform_indices = @transform_2, window_bounds = array<i64: 1, 16>}, {pipeline_mode = #tpu.pipeline_mode<synchronous>, transform_indices = @transform_3, window_bounds = array<i64: 1, 16>}, {transform_indices = @transform_4, window_bounds = array<i64: 256, 16>}, {transform_indices = @transform_5, window_bounds = array<i64: 256, 16>}]} {
    %c0 = arith.constant 0 : index
    %c0_0 = arith.constant 0 : index
    %0 = vector.load %arg1[%c0, %c0_0] : memref<256x144xbf16, #tpu.memory_space<vmem>>, vector<256x144xbf16>
    %c0_1 = arith.constant 0 : index
    %c0_2 = arith.constant 0 : index
    %1 = vector.load %arg2[%c0_1, %c0_2] : memref<144x16xbf16, #tpu.memory_space<vmem>>, vector<144x16xbf16>
    %cst = arith.constant dense<0.000000e+00> : vector<256x16xf32>
    %2 = tpu.matmul %0, %1, %cst {dimension_numbers = #tpu.dot_dimension_numbers<[1], [0], [0], [1], [0, 0, 1, 1], [], []>} : vector<256x144xbf16>, vector<144x16xbf16>, vector<256x16xf32> -> vector<256x16xf32>
    %c0_3 = arith.constant 0 : index
    %c0_4 = arith.constant 0 : index
    %3 = vector.load %arg3[%c0_3, %c0_4] : memref<1x16xf32, #tpu.memory_space<vmem>>, vector<1x16xf32>
    %4 = vector.broadcast %3 : vector<1x16xf32> to vector<256x16xf32>
    %5 = arith.mulf %2, %4 : vector<256x16xf32>
    %c0_5 = arith.constant 0 : index
    %c0_6 = arith.constant 0 : index
    %6 = vector.load %arg4[%c0_5, %c0_6] : memref<1x16xf32, #tpu.memory_space<vmem>>, vector<1x16xf32>
    %7 = vector.broadcast %6 : vector<1x16xf32> to vector<256x16xf32>
    %8 = arith.addf %5, %7 : vector<256x16xf32>
    %c0_7 = arith.constant 0 : index
    %c0_8 = arith.constant 0 : index
    %9 = vector.load %arg5[%c0_7, %c0_8] : memref<256x16xbf16, #tpu.memory_space<vmem>>, vector<256x16xbf16>
    %10 = arith.extf %9 : vector<256x16xbf16> to vector<256x16xf32>
    %11 = arith.addf %8, %10 : vector<256x16xf32>
    %cst_9 = arith.constant 0.000000e+00 : f32
    %12 = vector.broadcast %cst_9 : f32 to vector<256x16xf32>
    %13 = arith.maximumf %11, %12 : vector<256x16xf32>
    %14 = arith.truncf %13 : vector<256x16xf32> to vector<256x16xbf16>
    %c0_10 = arith.constant 0 : index
    %c0_11 = arith.constant 0 : index
    %15 = vector.load %arg6[%c0_10, %c0_11] : memref<256x16xbf16, #tpu.memory_space<vmem>>, vector<256x16xbf16>
    tpu.vector_store %arg6[%c0_10, %c0_11], %14 {strides = array<i32>} : memref<256x16xbf16, #tpu.memory_space<vmem>>, vector<256x16xbf16>,
    return
  }
  func.func @transform_0(%arg0: i32) -> (i32, i32) {
    %c0_i32 = arith.constant 0 : i32
    %c0_i32_0 = arith.constant 0 : i32
    return %arg0, %c0_i32 : i32, i32
  }
  func.func @transform_1(%arg0: i32) -> (i32, i32) {
    %c0_i32 = arith.constant 0 : i32
    %c0_i32_0 = arith.constant 0 : i32
    %c0_i32_1 = arith.constant 0 : i32
    return %c0_i32, %c0_i32_0 : i32, i32
  }
  func.func @transform_2(%arg0: i32) -> (i32, i32) {
    %c0_i32 = arith.constant 0 : i32
    %c0_i32_0 = arith.constant 0 : i32
    %c0_i32_1 = arith.constant 0 : i32
    return %c0_i32, %c0_i32_0 : i32, i32
  }
  func.func @transform_3(%arg0: i32) -> (i32, i32) {
    %c0_i32 = arith.constant 0 : i32
    %c0_i32_0 = arith.constant 0 : i32
    %c0_i32_1 = arith.constant 0 : i32
    return %c0_i32, %c0_i32_0 : i32, i32
  }
  func.func @transform_4(%arg0: i32) -> (i32, i32) {
    %c0_i32 = arith.constant 0 : i32
    %c0_i32_0 = arith.constant 0 : i32
    return %arg0, %c0_i32 : i32, i32
  }
  func.func @transform_5(%arg0: i32) -> (i32, i32) {
    %c0_i32 = arith.constant 0 : i32
    %c0_i32_0 = arith.constant 0 : i32
    return %arg0, %c0_i32 : i32, i32
  }
}

module attributes {stable_mosaic.version = 11 : i64} {
  func.func @_mm_bn_kernel(%arg0: i32, %arg1: memref<256x144xbf16, #tpu.memory_space<vmem>>, %arg2: memref<144x32xbf16, #tpu.memory_space<vmem>>, %arg3: memref<1x32xf32, #tpu.memory_space<vmem>>, %arg4: memref<1x32xf32, #tpu.memory_space<vmem>>, %arg5: memref<256x32xbf16, #tpu.memory_space<vmem>>) attributes {dimension_semantics = [#tpu.dimension_semantics<parallel>], iteration_bounds = array<i64: 2>, scalar_prefetch = 0 : i64, scratch_operands = 0 : i64, tpu.core_type = #tpu.core_type<tc>, window_params = [{transform_indices = @transform_0, window_bounds = array<i64: 256, 144>}, {pipeline_mode = #tpu.pipeline_mode<synchronous>, transform_indices = @transform_1, window_bounds = array<i64: 144, 32>}, {pipeline_mode = #tpu.pipeline_mode<synchronous>, transform_indices = @transform_2, window_bounds = array<i64: 1, 32>}, {pipeline_mode = #tpu.pipeline_mode<synchronous>, transform_indices = @transform_3, window_bounds = array<i64: 1, 32>}, {transform_indices = @transform_4, window_bounds = array<i64: 256, 32>}]} {
    %c0 = arith.constant 0 : index
    %c0_0 = arith.constant 0 : index
    %0 = vector.load %arg1[%c0, %c0_0] : memref<256x144xbf16, #tpu.memory_space<vmem>>, vector<256x144xbf16>
    %c0_1 = arith.constant 0 : index
    %c0_2 = arith.constant 0 : index
    %1 = vector.load %arg2[%c0_1, %c0_2] : memref<144x32xbf16, #tpu.memory_space<vmem>>, vector<144x32xbf16>
    %cst = arith.constant dense<0.000000e+00> : vector<256x32xf32>
    %2 = tpu.matmul %0, %1, %cst {dimension_numbers = #tpu.dot_dimension_numbers<[1], [0], [0], [1], [0, 0, 1, 1], [], []>} : vector<256x144xbf16>, vector<144x32xbf16>, vector<256x32xf32> -> vector<256x32xf32>
    %c0_3 = arith.constant 0 : index
    %c0_4 = arith.constant 0 : index
    %3 = vector.load %arg3[%c0_3, %c0_4] : memref<1x32xf32, #tpu.memory_space<vmem>>, vector<1x32xf32>
    %4 = vector.broadcast %3 : vector<1x32xf32> to vector<256x32xf32>
    %5 = arith.mulf %2, %4 : vector<256x32xf32>
    %c0_5 = arith.constant 0 : index
    %c0_6 = arith.constant 0 : index
    %6 = vector.load %arg4[%c0_5, %c0_6] : memref<1x32xf32, #tpu.memory_space<vmem>>, vector<1x32xf32>
    %7 = vector.broadcast %6 : vector<1x32xf32> to vector<256x32xf32>
    %8 = arith.addf %5, %7 : vector<256x32xf32>
    %cst_7 = arith.constant 0.000000e+00 : f32
    %9 = vector.broadcast %cst_7 : f32 to vector<256x32xf32>
    %10 = arith.maximumf %8, %9 : vector<256x32xf32>
    %11 = arith.truncf %10 : vector<256x32xf32> to vector<256x32xbf16>
    %c0_8 = arith.constant 0 : index
    %c0_9 = arith.constant 0 : index
    %12 = vector.load %arg5[%c0_8, %c0_9] : memref<256x32xbf16, #tpu.memory_space<vmem>>, vector<256x32xbf16>
    tpu.vector_store %arg5[%c0_8, %c0_9], %11 {strides = array<i32>} : memref<256x32xbf16, #tpu.memory_space<vmem>>, vector<256x32xbf16>,
    return
  }
  func.func @transform_0(%arg0: i32) -> (i32, i32) {
    %c0_i32 = arith.constant 0 : i32
    %c0_i32_0 = arith.constant 0 : i32
    return %arg0, %c0_i32 : i32, i32
  }
  func.func @transform_1(%arg0: i32) -> (i32, i32) {
    %c0_i32 = arith.constant 0 : i32
    %c0_i32_0 = arith.constant 0 : i32
    %c0_i32_1 = arith.constant 0 : i32
    return %c0_i32, %c0_i32_0 : i32, i32
  }
  func.func @transform_2(%arg0: i32) -> (i32, i32) {
    %c0_i32 = arith.constant 0 : i32
    %c0_i32_0 = arith.constant 0 : i32
    %c0_i32_1 = arith.constant 0 : i32
    return %c0_i32, %c0_i32_0 : i32, i32
  }
  func.func @transform_3(%arg0: i32) -> (i32, i32) {
    %c0_i32 = arith.constant 0 : i32
    %c0_i32_0 = arith.constant 0 : i32
    %c0_i32_1 = arith.constant 0 : i32
    return %c0_i32, %c0_i32_0 : i32, i32
  }
  func.func @transform_4(%arg0: i32) -> (i32, i32) {
    %c0_i32 = arith.constant 0 : i32
    %c0_i32_0 = arith.constant 0 : i32
    return %arg0, %c0_i32 : i32, i32
  }
}

module attributes {stable_mosaic.version = 11 : i64} {
  func.func @_mm2_bn_kernel(%arg0: i32, %arg1: memref<256x288xbf16, #tpu.memory_space<vmem>>, %arg2: memref<288x32xbf16, #tpu.memory_space<vmem>>, %arg3: memref<1x32xf32, #tpu.memory_space<vmem>>, %arg4: memref<1x32xf32, #tpu.memory_space<vmem>>, %arg5: memref<256x16xbf16, #tpu.memory_space<vmem>>, %arg6: memref<16x32xbf16, #tpu.memory_space<vmem>>, %arg7: memref<1x32xf32, #tpu.memory_space<vmem>>, %arg8: memref<1x32xf32, #tpu.memory_space<vmem>>, %arg9: memref<256x32xbf16, #tpu.memory_space<vmem>>) attributes {dimension_semantics = [#tpu.dimension_semantics<parallel>], iteration_bounds = array<i64: 2>, scalar_prefetch = 0 : i64, scratch_operands = 0 : i64, tpu.core_type = #tpu.core_type<tc>, window_params = [{transform_indices = @transform_0, window_bounds = array<i64: 256, 288>}, {pipeline_mode = #tpu.pipeline_mode<synchronous>, transform_indices = @transform_1, window_bounds = array<i64: 288, 32>}, {pipeline_mode = #tpu.pipeline_mode<synchronous>, transform_indices = @transform_2, window_bounds = array<i64: 1, 32>}, {pipeline_mode = #tpu.pipeline_mode<synchronous>, transform_indices = @transform_3, window_bounds = array<i64: 1, 32>}, {transform_indices = @transform_4, window_bounds = array<i64: 256, 16>}, {pipeline_mode = #tpu.pipeline_mode<synchronous>, transform_indices = @transform_5, window_bounds = array<i64: 16, 32>}, {pipeline_mode = #tpu.pipeline_mode<synchronous>, transform_indices = @transform_6, window_bounds = array<i64: 1, 32>}, {pipeline_mode = #tpu.pipeline_mode<synchronous>, transform_indices = @transform_7, window_bounds = array<i64: 1, 32>}, {transform_indices = @transform_8, window_bounds = array<i64: 256, 32>}]} {
    %c0 = arith.constant 0 : index
    %c0_0 = arith.constant 0 : index
    %0 = vector.load %arg1[%c0, %c0_0] : memref<256x288xbf16, #tpu.memory_space<vmem>>, vector<256x288xbf16>
    %c0_1 = arith.constant 0 : index
    %c0_2 = arith.constant 0 : index
    %1 = vector.load %arg2[%c0_1, %c0_2] : memref<288x32xbf16, #tpu.memory_space<vmem>>, vector<288x32xbf16>
    %cst = arith.constant dense<0.000000e+00> : vector<256x32xf32>
    %2 = tpu.matmul %0, %1, %cst {dimension_numbers = #tpu.dot_dimension_numbers<[1], [0], [0], [1], [0, 0, 1, 1], [], []>} : vector<256x288xbf16>, vector<288x32xbf16>, vector<256x32xf32> -> vector<256x32xf32>
    %c0_3 = arith.constant 0 : index
    %c0_4 = arith.constant 0 : index
    %3 = vector.load %arg5[%c0_3, %c0_4] : memref<256x16xbf16, #tpu.memory_space<vmem>>, vector<256x16xbf16>
    %c0_5 = arith.constant 0 : index
    %c0_6 = arith.constant 0 : index
    %4 = vector.load %arg6[%c0_5, %c0_6] : memref<16x32xbf16, #tpu.memory_space<vmem>>, vector<16x32xbf16>
    %cst_7 = arith.constant dense<0.000000e+00> : vector<256x32xf32>
    %5 = tpu.matmul %3, %4, %cst_7 {dimension_numbers = #tpu.dot_dimension_numbers<[1], [0], [0], [1], [0, 0, 1, 1], [], []>} : vector<256x16xbf16>, vector<16x32xbf16>, vector<256x32xf32> -> vector<256x32xf32>
    %c0_8 = arith.constant 0 : index
    %c0_9 = arith.constant 0 : index
    %6 = vector.load %arg3[%c0_8, %c0_9] : memref<1x32xf32, #tpu.memory_space<vmem>>, vector<1x32xf32>
    %7 = vector.broadcast %6 : vector<1x32xf32> to vector<256x32xf32>
    %8 = arith.mulf %2, %7 : vector<256x32xf32>
    %c0_10 = arith.constant 0 : index
    %c0_11 = arith.constant 0 : index
    %9 = vector.load %arg4[%c0_10, %c0_11] : memref<1x32xf32, #tpu.memory_space<vmem>>, vector<1x32xf32>
    %10 = vector.broadcast %9 : vector<1x32xf32> to vector<256x32xf32>
    %11 = arith.addf %8, %10 : vector<256x32xf32>
    %c0_12 = arith.constant 0 : index
    %c0_13 = arith.constant 0 : index
    %12 = vector.load %arg7[%c0_12, %c0_13] : memref<1x32xf32, #tpu.memory_space<vmem>>, vector<1x32xf32>
    %13 = vector.broadcast %12 : vector<1x32xf32> to vector<256x32xf32>
    %14 = arith.mulf %5, %13 : vector<256x32xf32>
    %15 = arith.addf %11, %14 : vector<256x32xf32>
    %c0_14 = arith.constant 0 : index
    %c0_15 = arith.constant 0 : index
    %16 = vector.load %arg8[%c0_14, %c0_15] : memref<1x32xf32, #tpu.memory_space<vmem>>, vector<1x32xf32>
    %17 = vector.broadcast %16 : vector<1x32xf32> to vector<256x32xf32>
    %18 = arith.addf %15, %17 : vector<256x32xf32>
    %cst_16 = arith.constant 0.000000e+00 : f32
    %19 = vector.broadcast %cst_16 : f32 to vector<256x32xf32>
    %20 = arith.maximumf %18, %19 : vector<256x32xf32>
    %21 = arith.truncf %20 : vector<256x32xf32> to vector<256x32xbf16>
    %c0_17 = arith.constant 0 : index
    %c0_18 = arith.constant 0 : index
    %22 = vector.load %arg9[%c0_17, %c0_18] : memref<256x32xbf16, #tpu.memory_space<vmem>>, vector<256x32xbf16>
    tpu.vector_store %arg9[%c0_17, %c0_18], %21 {strides = array<i32>} : memref<256x32xbf16, #tpu.memory_space<vmem>>, vector<256x32xbf16>,
    return
  }
  func.func @transform_0(%arg0: i32) -> (i32, i32) {
    %c0_i32 = arith.constant 0 : i32
    %c0_i32_0 = arith.constant 0 : i32
    return %arg0, %c0_i32 : i32, i32
  }
  func.func @transform_1(%arg0: i32) -> (i32, i32) {
    %c0_i32 = arith.constant 0 : i32
    %c0_i32_0 = arith.constant 0 : i32
    %c0_i32_1 = arith.constant 0 : i32
    return %c0_i32, %c0_i32_0 : i32, i32
  }
  func.func @transform_2(%arg0: i32) -> (i32, i32) {
    %c0_i32 = arith.constant 0 : i32
    %c0_i32_0 = arith.constant 0 : i32
    %c0_i32_1 = arith.constant 0 : i32
    return %c0_i32, %c0_i32_0 : i32, i32
  }
  func.func @transform_3(%arg0: i32) -> (i32, i32) {
    %c0_i32 = arith.constant 0 : i32
    %c0_i32_0 = arith.constant 0 : i32
    %c0_i32_1 = arith.constant 0 : i32
    return %c0_i32, %c0_i32_0 : i32, i32
  }
  func.func @transform_4(%arg0: i32) -> (i32, i32) {
    %c0_i32 = arith.constant 0 : i32
    %c0_i32_0 = arith.constant 0 : i32
    return %arg0, %c0_i32 : i32, i32
  }
  func.func @transform_5(%arg0: i32) -> (i32, i32) {
    %c0_i32 = arith.constant 0 : i32
    %c0_i32_0 = arith.constant 0 : i32
    %c0_i32_1 = arith.constant 0 : i32
    return %c0_i32, %c0_i32_0 : i32, i32
  }
  func.func @transform_6(%arg0: i32) -> (i32, i32) {
    %c0_i32 = arith.constant 0 : i32
    %c0_i32_0 = arith.constant 0 : i32
    %c0_i32_1 = arith.constant 0 : i32
    return %c0_i32, %c0_i32_0 : i32, i32
  }
  func.func @transform_7(%arg0: i32) -> (i32, i32) {
    %c0_i32 = arith.constant 0 : i32
    %c0_i32_0 = arith.constant 0 : i32
    %c0_i32_1 = arith.constant 0 : i32
    return %c0_i32, %c0_i32_0 : i32, i32
  }
  func.func @transform_8(%arg0: i32) -> (i32, i32) {
    %c0_i32 = arith.constant 0 : i32
    %c0_i32_0 = arith.constant 0 : i32
    return %arg0, %c0_i32 : i32, i32
  }
}

module attributes {stable_mosaic.version = 11 : i64} {
  func.func @_mm_bn_kernel(%arg0: i32, %arg1: memref<128x288xbf16, #tpu.memory_space<vmem>>, %arg2: memref<288x64xbf16, #tpu.memory_space<vmem>>, %arg3: memref<1x64xf32, #tpu.memory_space<vmem>>, %arg4: memref<1x64xf32, #tpu.memory_space<vmem>>, %arg5: memref<128x64xbf16, #tpu.memory_space<vmem>>) attributes {dimension_semantics = [#tpu.dimension_semantics<parallel>], iteration_bounds = array<i64: 1>, scalar_prefetch = 0 : i64, scratch_operands = 0 : i64, tpu.core_type = #tpu.core_type<tc>, window_params = [{transform_indices = @transform_0, window_bounds = array<i64: 128, 288>}, {pipeline_mode = #tpu.pipeline_mode<synchronous>, transform_indices = @transform_1, window_bounds = array<i64: 288, 64>}, {pipeline_mode = #tpu.pipeline_mode<synchronous>, transform_indices = @transform_2, window_bounds = array<i64: 1, 64>}, {pipeline_mode = #tpu.pipeline_mode<synchronous>, transform_indices = @transform_3, window_bounds = array<i64: 1, 64>}, {transform_indices = @transform_4, window_bounds = array<i64: 128, 64>}]} {
    %c0 = arith.constant 0 : index
    %c0_0 = arith.constant 0 : index
    %0 = vector.load %arg1[%c0, %c0_0] : memref<128x288xbf16, #tpu.memory_space<vmem>>, vector<128x288xbf16>
    %c0_1 = arith.constant 0 : index
    %c0_2 = arith.constant 0 : index
    %1 = vector.load %arg2[%c0_1, %c0_2] : memref<288x64xbf16, #tpu.memory_space<vmem>>, vector<288x64xbf16>
    %cst = arith.constant dense<0.000000e+00> : vector<128x64xf32>
    %2 = tpu.matmul %0, %1, %cst {dimension_numbers = #tpu.dot_dimension_numbers<[1], [0], [0], [1], [0, 0, 1, 1], [], []>} : vector<128x288xbf16>, vector<288x64xbf16>, vector<128x64xf32> -> vector<128x64xf32>
    %c0_3 = arith.constant 0 : index
    %c0_4 = arith.constant 0 : index
    %3 = vector.load %arg3[%c0_3, %c0_4] : memref<1x64xf32, #tpu.memory_space<vmem>>, vector<1x64xf32>
    %4 = vector.broadcast %3 : vector<1x64xf32> to vector<128x64xf32>
    %5 = arith.mulf %2, %4 : vector<128x64xf32>
    %c0_5 = arith.constant 0 : index
    %c0_6 = arith.constant 0 : index
    %6 = vector.load %arg4[%c0_5, %c0_6] : memref<1x64xf32, #tpu.memory_space<vmem>>, vector<1x64xf32>
    %7 = vector.broadcast %6 : vector<1x64xf32> to vector<128x64xf32>
    %8 = arith.addf %5, %7 : vector<128x64xf32>
    %cst_7 = arith.constant 0.000000e+00 : f32
    %9 = vector.broadcast %cst_7 : f32 to vector<128x64xf32>
    %10 = arith.maximumf %8, %9 : vector<128x64xf32>
    %11 = arith.truncf %10 : vector<128x64xf32> to vector<128x64xbf16>
    %c0_8 = arith.constant 0 : index
    %c0_9 = arith.constant 0 : index
    %12 = vector.load %arg5[%c0_8, %c0_9] : memref<128x64xbf16, #tpu.memory_space<vmem>>, vector<128x64xbf16>
    tpu.vector_store %arg5[%c0_8, %c0_9], %11 {strides = array<i32>} : memref<128x64xbf16, #tpu.memory_space<vmem>>, vector<128x64xbf16>,
    return
  }
  func.func @transform_0(%arg0: i32) -> (i32, i32) {
    %c0_i32 = arith.constant 0 : i32
    %c0_i32_0 = arith.constant 0 : i32
    return %arg0, %c0_i32 : i32, i32
  }
  func.func @transform_1(%arg0: i32) -> (i32, i32) {
    %c0_i32 = arith.constant 0 : i32
    %c0_i32_0 = arith.constant 0 : i32
    %c0_i32_1 = arith.constant 0 : i32
    return %c0_i32, %c0_i32_0 : i32, i32
  }
  func.func @transform_2(%arg0: i32) -> (i32, i32) {
    %c0_i32 = arith.constant 0 : i32
    %c0_i32_0 = arith.constant 0 : i32
    %c0_i32_1 = arith.constant 0 : i32
    return %c0_i32, %c0_i32_0 : i32, i32
  }
  func.func @transform_3(%arg0: i32) -> (i32, i32) {
    %c0_i32 = arith.constant 0 : i32
    %c0_i32_0 = arith.constant 0 : i32
    %c0_i32_1 = arith.constant 0 : i32
    return %c0_i32, %c0_i32_0 : i32, i32
  }
  func.func @transform_4(%arg0: i32) -> (i32, i32) {
    %c0_i32 = arith.constant 0 : i32
    %c0_i32_0 = arith.constant 0 : i32
    return %arg0, %c0_i32 : i32, i32
  }
}

module attributes {stable_mosaic.version = 11 : i64} {
  func.func @_mm2_bn_kernel(%arg0: i32, %arg1: memref<128x576xbf16, #tpu.memory_space<vmem>>, %arg2: memref<576x64xbf16, #tpu.memory_space<vmem>>, %arg3: memref<1x64xf32, #tpu.memory_space<vmem>>, %arg4: memref<1x64xf32, #tpu.memory_space<vmem>>, %arg5: memref<128x32xbf16, #tpu.memory_space<vmem>>, %arg6: memref<32x64xbf16, #tpu.memory_space<vmem>>, %arg7: memref<1x64xf32, #tpu.memory_space<vmem>>, %arg8: memref<1x64xf32, #tpu.memory_space<vmem>>, %arg9: memref<128x64xbf16, #tpu.memory_space<vmem>>) attributes {dimension_semantics = [#tpu.dimension_semantics<parallel>], iteration_bounds = array<i64: 1>, scalar_prefetch = 0 : i64, scratch_operands = 0 : i64, tpu.core_type = #tpu.core_type<tc>, window_params = [{transform_indices = @transform_0, window_bounds = array<i64: 128, 576>}, {pipeline_mode = #tpu.pipeline_mode<synchronous>, transform_indices = @transform_1, window_bounds = array<i64: 576, 64>}, {pipeline_mode = #tpu.pipeline_mode<synchronous>, transform_indices = @transform_2, window_bounds = array<i64: 1, 64>}, {pipeline_mode = #tpu.pipeline_mode<synchronous>, transform_indices = @transform_3, window_bounds = array<i64: 1, 64>}, {transform_indices = @transform_4, window_bounds = array<i64: 128, 32>}, {pipeline_mode = #tpu.pipeline_mode<synchronous>, transform_indices = @transform_5, window_bounds = array<i64: 32, 64>}, {pipeline_mode = #tpu.pipeline_mode<synchronous>, transform_indices = @transform_6, window_bounds = array<i64: 1, 64>}, {pipeline_mode = #tpu.pipeline_mode<synchronous>, transform_indices = @transform_7, window_bounds = array<i64: 1, 64>}, {transform_indices = @transform_8, window_bounds = array<i64: 128, 64>}]} {
    %c0 = arith.constant 0 : index
    %c0_0 = arith.constant 0 : index
    %0 = vector.load %arg1[%c0, %c0_0] : memref<128x576xbf16, #tpu.memory_space<vmem>>, vector<128x576xbf16>
    %c0_1 = arith.constant 0 : index
    %c0_2 = arith.constant 0 : index
    %1 = vector.load %arg2[%c0_1, %c0_2] : memref<576x64xbf16, #tpu.memory_space<vmem>>, vector<576x64xbf16>
    %cst = arith.constant dense<0.000000e+00> : vector<128x64xf32>
    %2 = tpu.matmul %0, %1, %cst {dimension_numbers = #tpu.dot_dimension_numbers<[1], [0], [0], [1], [0, 0, 1, 1], [], []>} : vector<128x576xbf16>, vector<576x64xbf16>, vector<128x64xf32> -> vector<128x64xf32>
    %c0_3 = arith.constant 0 : index
    %c0_4 = arith.constant 0 : index
    %3 = vector.load %arg5[%c0_3, %c0_4] : memref<128x32xbf16, #tpu.memory_space<vmem>>, vector<128x32xbf16>
    %c0_5 = arith.constant 0 : index
    %c0_6 = arith.constant 0 : index
    %4 = vector.load %arg6[%c0_5, %c0_6] : memref<32x64xbf16, #tpu.memory_space<vmem>>, vector<32x64xbf16>
    %cst_7 = arith.constant dense<0.000000e+00> : vector<128x64xf32>
    %5 = tpu.matmul %3, %4, %cst_7 {dimension_numbers = #tpu.dot_dimension_numbers<[1], [0], [0], [1], [0, 0, 1, 1], [], []>} : vector<128x32xbf16>, vector<32x64xbf16>, vector<128x64xf32> -> vector<128x64xf32>
    %c0_8 = arith.constant 0 : index
    %c0_9 = arith.constant 0 : index
    %6 = vector.load %arg3[%c0_8, %c0_9] : memref<1x64xf32, #tpu.memory_space<vmem>>, vector<1x64xf32>
    %7 = vector.broadcast %6 : vector<1x64xf32> to vector<128x64xf32>
    %8 = arith.mulf %2, %7 : vector<128x64xf32>
    %c0_10 = arith.constant 0 : index
    %c0_11 = arith.constant 0 : index
    %9 = vector.load %arg4[%c0_10, %c0_11] : memref<1x64xf32, #tpu.memory_space<vmem>>, vector<1x64xf32>
    %10 = vector.broadcast %9 : vector<1x64xf32> to vector<128x64xf32>
    %11 = arith.addf %8, %10 : vector<128x64xf32>
    %c0_12 = arith.constant 0 : index
    %c0_13 = arith.constant 0 : index
    %12 = vector.load %arg7[%c0_12, %c0_13] : memref<1x64xf32, #tpu.memory_space<vmem>>, vector<1x64xf32>
    %13 = vector.broadcast %12 : vector<1x64xf32> to vector<128x64xf32>
    %14 = arith.mulf %5, %13 : vector<128x64xf32>
    %15 = arith.addf %11, %14 : vector<128x64xf32>
    %c0_14 = arith.constant 0 : index
    %c0_15 = arith.constant 0 : index
    %16 = vector.load %arg8[%c0_14, %c0_15] : memref<1x64xf32, #tpu.memory_space<vmem>>, vector<1x64xf32>
    %17 = vector.broadcast %16 : vector<1x64xf32> to vector<128x64xf32>
    %18 = arith.addf %15, %17 : vector<128x64xf32>
    %cst_16 = arith.constant 0.000000e+00 : f32
    %19 = vector.broadcast %cst_16 : f32 to vector<128x64xf32>
    %20 = arith.maximumf %18, %19 : vector<128x64xf32>
    %21 = arith.truncf %20 : vector<128x64xf32> to vector<128x64xbf16>
    %c0_17 = arith.constant 0 : index
    %c0_18 = arith.constant 0 : index
    %22 = vector.load %arg9[%c0_17, %c0_18] : memref<128x64xbf16, #tpu.memory_space<vmem>>, vector<128x64xbf16>
    tpu.vector_store %arg9[%c0_17, %c0_18], %21 {strides = array<i32>} : memref<128x64xbf16, #tpu.memory_space<vmem>>, vector<128x64xbf16>,
    return
  }
  func.func @transform_0(%arg0: i32) -> (i32, i32) {
    %c0_i32 = arith.constant 0 : i32
    %c0_i32_0 = arith.constant 0 : i32
    return %arg0, %c0_i32 : i32, i32
  }
  func.func @transform_1(%arg0: i32) -> (i32, i32) {
    %c0_i32 = arith.constant 0 : i32
    %c0_i32_0 = arith.constant 0 : i32
    %c0_i32_1 = arith.constant 0 : i32
    return %c0_i32, %c0_i32_0 : i32, i32
  }
  func.func @transform_2(%arg0: i32) -> (i32, i32) {
    %c0_i32 = arith.constant 0 : i32
    %c0_i32_0 = arith.constant 0 : i32
    %c0_i32_1 = arith.constant 0 : i32
    return %c0_i32, %c0_i32_0 : i32, i32
  }
  func.func @transform_3(%arg0: i32) -> (i32, i32) {
    %c0_i32 = arith.constant 0 : i32
    %c0_i32_0 = arith.constant 0 : i32
    %c0_i32_1 = arith.constant 0 : i32
    return %c0_i32, %c0_i32_0 : i32, i32
  }
  func.func @transform_4(%arg0: i32) -> (i32, i32) {
    %c0_i32 = arith.constant 0 : i32
    %c0_i32_0 = arith.constant 0 : i32
    return %arg0, %c0_i32 : i32, i32
  }
  func.func @transform_5(%arg0: i32) -> (i32, i32) {
    %c0_i32 = arith.constant 0 : i32
    %c0_i32_0 = arith.constant 0 : i32
    %c0_i32_1 = arith.constant 0 : i32
    return %c0_i32, %c0_i32_0 : i32, i32
  }
  func.func @transform_6(%arg0: i32) -> (i32, i32) {
    %c0_i32 = arith.constant 0 : i32
    %c0_i32_0 = arith.constant 0 : i32
    %c0_i32_1 = arith.constant 0 : i32
    return %c0_i32, %c0_i32_0 : i32, i32
  }
  func.func @transform_7(%arg0: i32) -> (i32, i32) {
    %c0_i32 = arith.constant 0 : i32
    %c0_i32_0 = arith.constant 0 : i32
    %c0_i32_1 = arith.constant 0 : i32
    return %c0_i32, %c0_i32_0 : i32, i32
  }
  func.func @transform_8(%arg0: i32) -> (i32, i32) {
    %c0_i32 = arith.constant 0 : i32
    %c0_i32_0 = arith.constant 0 : i32
    return %arg0, %c0_i32 : i32, i32
  }
}

module attributes {stable_mosaic.version = 11 : i64} {
  func.func @_mm_bn_kernel(%arg0: i32, %arg1: memref<8x64xbf16, #tpu.memory_space<vmem>>, %arg2: memref<64x128xbf16, #tpu.memory_space<vmem>>, %arg3: memref<1x128xf32, #tpu.memory_space<vmem>>, %arg4: memref<1x128xf32, #tpu.memory_space<vmem>>, %arg5: memref<8x128xf32, #tpu.memory_space<vmem>>) attributes {dimension_semantics = [#tpu.dimension_semantics<parallel>], iteration_bounds = array<i64: 1>, scalar_prefetch = 0 : i64, scratch_operands = 0 : i64, tpu.core_type = #tpu.core_type<tc>, window_params = [{transform_indices = @transform_0, window_bounds = array<i64: 8, 64>}, {pipeline_mode = #tpu.pipeline_mode<synchronous>, transform_indices = @transform_1, window_bounds = array<i64: 64, 128>}, {pipeline_mode = #tpu.pipeline_mode<synchronous>, transform_indices = @transform_2, window_bounds = array<i64: 1, 128>}, {pipeline_mode = #tpu.pipeline_mode<synchronous>, transform_indices = @transform_3, window_bounds = array<i64: 1, 128>}, {transform_indices = @transform_4, window_bounds = array<i64: 8, 128>}]} {
    %c0 = arith.constant 0 : index
    %c0_0 = arith.constant 0 : index
    %0 = vector.load %arg1[%c0, %c0_0] : memref<8x64xbf16, #tpu.memory_space<vmem>>, vector<8x64xbf16>
    %c0_1 = arith.constant 0 : index
    %c0_2 = arith.constant 0 : index
    %1 = vector.load %arg2[%c0_1, %c0_2] : memref<64x128xbf16, #tpu.memory_space<vmem>>, vector<64x128xbf16>
    %cst = arith.constant dense<0.000000e+00> : vector<8x128xf32>
    %2 = tpu.matmul %0, %1, %cst {dimension_numbers = #tpu.dot_dimension_numbers<[1], [0], [0], [1], [0, 0, 1, 1], [], []>} : vector<8x64xbf16>, vector<64x128xbf16>, vector<8x128xf32> -> vector<8x128xf32>
    %c0_3 = arith.constant 0 : index
    %c0_4 = arith.constant 0 : index
    %3 = vector.load %arg3[%c0_3, %c0_4] : memref<1x128xf32, #tpu.memory_space<vmem>>, vector<1x128xf32>
    %4 = vector.broadcast %3 : vector<1x128xf32> to vector<8x128xf32>
    %5 = arith.mulf %2, %4 : vector<8x128xf32>
    %c0_5 = arith.constant 0 : index
    %c0_6 = arith.constant 0 : index
    %6 = vector.load %arg4[%c0_5, %c0_6] : memref<1x128xf32, #tpu.memory_space<vmem>>, vector<1x128xf32>
    %7 = vector.broadcast %6 : vector<1x128xf32> to vector<8x128xf32>
    %8 = arith.addf %5, %7 : vector<8x128xf32>
    %c0_7 = arith.constant 0 : index
    %c0_8 = arith.constant 0 : index
    %9 = vector.load %arg5[%c0_7, %c0_8] : memref<8x128xf32, #tpu.memory_space<vmem>>, vector<8x128xf32>
    tpu.vector_store %arg5[%c0_7, %c0_8], %8 {strides = array<i32>} : memref<8x128xf32, #tpu.memory_space<vmem>>, vector<8x128xf32>,
    return
  }
  func.func @transform_0(%arg0: i32) -> (i32, i32) {
    %c0_i32 = arith.constant 0 : i32
    %c0_i32_0 = arith.constant 0 : i32
    return %arg0, %c0_i32 : i32, i32
  }
  func.func @transform_1(%arg0: i32) -> (i32, i32) {
    %c0_i32 = arith.constant 0 : i32
    %c0_i32_0 = arith.constant 0 : i32
    %c0_i32_1 = arith.constant 0 : i32
    return %c0_i32, %c0_i32_0 : i32, i32
  }
  func.func @transform_2(%arg0: i32) -> (i32, i32) {
    %c0_i32 = arith.constant 0 : i32
    %c0_i32_0 = arith.constant 0 : i32
    %c0_i32_1 = arith.constant 0 : i32
    return %c0_i32, %c0_i32_0 : i32, i32
  }
  func.func @transform_3(%arg0: i32) -> (i32, i32) {
    %c0_i32 = arith.constant 0 : i32
    %c0_i32_0 = arith.constant 0 : i32
    %c0_i32_1 = arith.constant 0 : i32
    return %c0_i32, %c0_i32_0 : i32, i32
  }
  func.func @transform_4(%arg0: i32) -> (i32, i32) {
    %c0_i32 = arith.constant 0 : i32
    %c0_i32_0 = arith.constant 0 : i32
    return %arg0, %c0_i32 : i32, i32
  }
}

</mosaic_0001>

<bundles_post_ra>
// kernel: _lambda_.8
= control target key start
LH: loop header
LB: loop body
LE: loop exit
PB: predicated region body
PF: predicated region fallthrough
CT: control target
= control target key end

     0   :  { %s1112_s15 = smov 0   ;;  %s1319_s0 = inlined_call_operand.vmem [shape: bf16[2048,36], index: 0, kind: input, shape index: {}]   ;;  %s1320_s1 = inlined_call_operand.vmem [shape: bf16[36,16], index: 1, kind: input, shape index: {}]   ;;  %s1321_s2 = inlined_call_operand.vmem [shape: f32[1,16], index: 2, kind: input, shape index: {}]   ;;  %s1322_s3 = inlined_call_operand.vmem [shape: f32[1,16], index: 3, kind: input, shape index: {}]   ;;  %s1323_s4 = inlined_call_operand.vmem [shape: bf16[2048,16], index: 4, kind: output, shape index: {}]  }
   0x1 LB: > { %s875_s16 = sadd.s32 4294967295, %s1085_s15   ;;  %p879_p0 = scmp.ge.s32.totalorder %s1085_s15, 1  ;;  %s1085_s15 = sphi %s1112_s15, %s14_s15  }
   0x2   : > { %p163_p1 = scmp.lt.s32.totalorder %s1085_s15, 9 }
   0x4   : > { %p164_p2 = pnand %p879_p0, %p163_p1 }
   0x5   : > { %v1060_v0 = vld [vmem:[%s1320_s1] sm:$0xff] (!%p164_p2)   ;;  %v1061_v1 = vld [vmem:[%s1320_s1 + $0x8] sm:$0xff] (!%p164_p2)   ;;  %s880_s21 = sshll.u32 (!%p164_p2), %s875_s16, 5  ;;  %v1062_v2 = vld [vmem:[%s1320_s1 + $0x10] ss:$0 sps:$4 sm:$0x33] (!%p164_p2)  }
   0x6   : > { %167 = sbr.rel (%p164_p2) target bundleno = 269 (0x10d), region = 36  ;;  %1006 = vmatprep.subr.bf16.mxu0 (!%p164_p2), %v1060_v0  ;;  %1044 = vmatprep.subr.bf16.mxu1 (!%p164_p2), %v1060_v0  ;;  %p190_p3 = scmp.lt.s32.totalorder (!%p164_p2), %s880_s21, 255  ;;  %vm383_vm0 = vcmask (!%p164_p2), 1041408   ;;  %vm334_vm1 = vcmask (!%p164_p2), 293888   ;;  %v1174_v20 = vld [vmem:[%s1321_s2] ss:$0 sm:$0xff] (!%p164_p2) }
   0x7   : > { %1007 = vmatpush3.bf16.msra.mxu0 (!%p164_p2), %v1060_v0  ;;  %1047 = vmatpush3.bf16.msra.mxu1 (!%p164_p2), %v1060_v0  ;;  %v385_v3 = vsel (!%p164_p2), %vm383_vm0, %v1062_v2, 0  ;;  %v1179_v22 = vld [vmem:[%s1322_s3] ss:$0 sm:$0xff] (!%p164_p2)  ;;  %vm786_vm2 = vcmask (!%p164_p2), 125952  }
   0x8   : > { %1008 = vmatprep.subr.bf16.mxu0 (!%p164_p2), %v1061_v1  ;;  %1045 = vmatprep.subr.bf16.mxu1 (!%p164_p2), %v1061_v1 }
   0xb   : > { %1009 = vmatpush3.bf16.msra.mxu0 (!%p164_p2), %v1061_v1  ;;  %1048 = vmatpush3.bf16.msra.mxu1 (!%p164_p2), %v1061_v1 }
   0xc   : > { %1050 = vmatprep.subr.msk.bf16.mxu0 (!%p164_p2), %vm383_vm0, %v1062_v2  ;;  %1051 = vmatprep.subr.msk.bf16.mxu1 (!%p164_p2), %vm383_vm0, %v1062_v2 }
   0xd   : > { %s1325_s21 = smov (!%p190_p3, %s880_s21), 255 }
   0xe   : > { %s881_s24 = sshll.u32 %s1325_s21, 2 }
   0xf   : > { %s1137_s27 = scalar_lea.vmem %s1319_s0, %s881_s24  ;;  %1011 = vmatpush3.bf16.msra.mxu0 %v385_v3  ;;  %1049 = vmatpush3.bf16.msra.mxu1 %v385_v3  ;;  %s1200_s8 = scalar_lea.vmem %s1323_s4, %s881_s24 }
  0x10   : > { %v1063_v4 = vld [vmem:[%s1137_s27] sm:$0xff]   ;;  %v1065_v6 = vld [vmem:[%s1137_s27 + $0x8] sm:$0xff]   ;;  %v1067_v8 = vld [vmem:[%s1137_s27 + $0x10] sm:$0xff]  }
  0x11   : > { %v1064_v5 = vld [vmem:[%s1137_s27 + $0x40] sm:$0xff]   ;;  %1012 = vmatprep.mubr.msk.bf16.mxu0 %vm334_vm1, %v1063_v4  ;;  %v1066_v7 = vld [vmem:[%s1137_s27 + $0x48] sm:$0xff]   ;;  %v1068_v9 = vld [vmem:[%s1137_s27 + $0x50] sm:$0xff]  }
  0x12   : > { %1028 = vmatprep.mubr.msk.bf16.mxu1 %vm334_vm1, %v1064_v5  ;;  %1013 = vmatmul.mubr.msk.bf16.vlgmr.msra.gmra.mrb[0].mxu0 %vm334_vm1, %v1065_v6  ;;  %v1069_v10 = vld [vmem:[%s1137_s27 + $0x18] sm:$0xff]   ;;  %v1071_v12 = vld [vmem:[%s1137_s27 + $0x20] sm:$0xff]   ;;  %v1073_v14 = vld [vmem:[%s1137_s27 + $0x28] sm:$0xff]  }
  0x13   : > { %1029 = vmatmul.mubr.msk.bf16.vlgmr.msra.gmra.mrb[0].mxu1 %vm334_vm1, %v1066_v7  ;;  %1016 = vmatprep.mubr.msk.bf16.mxu0 %vm334_vm1, %v1067_v8  ;;  %v1070_v11 = vld [vmem:[%s1137_s27 + $0x58] sm:$0xff]   ;;  %v1072_v13 = vld [vmem:[%s1137_s27 + $0x60] sm:$0xff]   ;;  %v1074_v15 = vld [vmem:[%s1137_s27 + $0x68] sm:$0xff]  }
  0x14   : > { %1032 = vmatprep.mubr.msk.bf16.mxu1 %vm334_vm1, %v1068_v9  ;;  %v1075_v16 = vld [vmem:[%s1137_s27 + $0x30] sm:$0xff]   ;;  %v1077_v18 = vld [vmem:[%s1137_s27 + $0x38] sm:$0xff]  }
  0x15   : > { %v1076_v17 = vld [vmem:[%s1137_s27 + $0x70] sm:$0xff]   ;;  %v1078_v19 = vld [vmem:[%s1137_s27 + $0x78] sm:$0xff]  }
  0x1a   : > { %1017 = vmatmul.mubr.msk.bf16.gmra.mrb[4].mxu0 %vm334_vm1, %v1069_v10 }
  0x1b   : > { %1033 = vmatmul.mubr.msk.bf16.gmra.mrb[4].mxu1 %vm334_vm1, %v1070_v11  ;;  %1020 = vmatprep.mubr.msk.bf16.mxu0 %vm334_vm1, %v1071_v12 }
  0x1c   : > { %1036 = vmatprep.mubr.msk.bf16.mxu1 %vm334_vm1, %v1072_v13 }
  0x22   : > { %1021 = vmatmul.mubr.msk.bf16.gmra.mrb[8].mxu0 %vm334_vm1, %v1073_v14 }
  0x23   : > { %1037 = vmatmul.mubr.msk.bf16.gmra.mrb[8].mxu1 %vm334_vm1, %v1074_v15  ;;  %1024 = vmatprep.mubr.msk.bf16.mxu0 %vm334_vm1, %v1075_v16 }
  0x24   : > { %1040 = vmatprep.mubr.msk.bf16.mxu1 %vm334_vm1, %v1076_v17 }
  0x2a   : > { %1025 = vmatmul.mubr.msk.bf16.gmra.mrb[12].mxu0 %vm334_vm1, %v1077_v18 }
  0x2b   : > { %1041 = vmatmul.mubr.msk.bf16.gmra.mrb[12].mxu1 %vm334_vm1, %v1078_v19 }
  0xe5   : > { %v1014_v21 = vpop.f32.mrb[0].mxu0 }
  0xe6   : > { %v1030_v23 = vpop.f32.mrb[0].mxu1  ;;  %v557_v24 = vmul.f32 %v1014_v21, %v1174_v20  ;;  %v421_v26 = vpop.f32.mrb[1].mxu0 }
  0xe7   : > { %v573_v25 = vmul.f32 %v1030_v23, %v1174_v20  ;;  %v485_v27 = vpop.f32.mrb[1].mxu1  ;;  %v555_v28 = vmul.f32 %v1174_v20, %v421_v26  ;;  %v1015_v30 = vpop.f32.mrb[2].mxu0 }
  0xe8   : > { %v571_v29 = vmul.f32 %v1174_v20, %v485_v27  ;;  %v1031_v31 = vpop.f32.mrb[2].mxu1  ;;  %v596_v32 = vadd.f32 %v1179_v22, %v557_v24  ;;  %v558_v34 = vmul.f32 %v1015_v30, %v1174_v20  ;;  %v424_v36 = vpop.f32.mrb[3].mxu0 }
  0xe9   : > { %v612_v33 = vadd.f32 %v1179_v22, %v573_v25  ;;  %v574_v35 = vmul.f32 %v1031_v31, %v1174_v20  ;;  %v488_v37 = vpop.f32.mrb[3].mxu1  ;;  %v594_v38 = vadd.f32 %v1179_v22, %v555_v28  ;;  %v556_v40 = vmul.f32 %v1174_v20, %v424_v36 }
  0xea   : > { %v610_v39 = vadd.f32 %v1179_v22, %v571_v29  ;;  %v572_v41 = vmul.f32 %v1174_v20, %v488_v37  ;;  %v628_v42 = vmax.f32 %v596_v32, 0.0  ;;  %v597_v44 = vadd.f32 %v1179_v22, %v558_v34 }
  0xeb   : > { %v644_v43 = vmax.f32 %v612_v33, 0.0  ;;  %v613_v45 = vadd.f32 %v1179_v22, %v574_v35  ;;  %v626_v46 = vmax.f32 %v594_v38, 0.0  ;;  %v595_v48 = vadd.f32 %v1179_v22, %v556_v40 }
  0xec   : > { %v642_v47 = vmax.f32 %v610_v39, 0.0  ;;  %v611_v49 = vadd.f32 %v1179_v22, %v572_v41  ;;  %v957_v50 = vpack.c.bf16 %v628_v42, %v628_v42  ;;  %v629_v52 = vmax.f32 %v597_v44, 0.0 }
  0xed   : > { %v973_v51 = vpack.c.bf16 %v644_v43, %v644_v43  ;;  %v645_v53 = vmax.f32 %v613_v45, 0.0  ;;  %v955_v54 = vpack.c.bf16 %v626_v46, %v626_v46  ;;  %v627_v56 = vmax.f32 %v595_v48, 0.0  ;;  %v1018_v58 = vpop.f32.mrb[4].mxu0 }
  0xee   : > { %v971_v55 = vpack.c.bf16 %v642_v47, %v642_v47  ;;  %v643_v57 = vmax.f32 %v611_v49, 0.0  ;;  %v1034_v59 = vpop.f32.mrb[4].mxu1  ;;  %789 = vst.msk [vmem:[%s1200_s8 + $0x8] sm:$0xf] %vm786_vm2, %v957_v50  ;;  %v958_v60 = vpack.c.bf16 %v629_v52, %v629_v52  ;;  %v561_v62 = vmul.f32 %v1018_v58, %v1174_v20  ;;  %v437_v0 = vpop.f32.mrb[5].mxu0 }
  0xef   : > { %805 = vst.msk [vmem:[%s1200_s8 + $0x48] sm:$0xf] %vm786_vm2, %v973_v51  ;;  %v974_v61 = vpack.c.bf16 %v645_v53, %v645_v53  ;;  %v577_v63 = vmul.f32 %v1034_v59, %v1174_v20  ;;  %v501_v1 = vpop.f32.mrb[5].mxu1  ;;  %787 = vst.msk [vmem:[%s1200_s8] sm:$0xf] %vm786_vm2, %v955_v54  ;;  %v956_v2 = vpack.c.bf16 %v627_v56, %v627_v56  ;;  %v1019_v6 = vpop.f32.mrb[6].mxu0 }
  0xf0   : > { %803 = vst.msk [vmem:[%s1200_s8 + $0x40] sm:$0xf] %vm786_vm2, %v971_v55  ;;  %v972_v3 = vpack.c.bf16 %v643_v57, %v643_v57  ;;  %v559_v4 = vmul.f32 %v1174_v20, %v437_v0  ;;  %v575_v5 = vmul.f32 %v1174_v20, %v501_v1  ;;  %v1035_v7 = vpop.f32.mrb[6].mxu1  ;;  %790 = vst.msk [vmem:[%s1200_s8 + $0xc] sm:$0xf] %vm786_vm2, %v958_v60  ;;  %v440_v12 = vpop.f32.mrb[7].mxu0 }
  0xf1   : > { %806 = vst.msk [vmem:[%s1200_s8 + $0x4c] sm:$0xf] %vm786_vm2, %v974_v61  ;;  %v600_v8 = vadd.f32 %v1179_v22, %v561_v62  ;;  %v616_v9 = vadd.f32 %v1179_v22, %v577_v63  ;;  %v562_v10 = vmul.f32 %v1019_v6, %v1174_v20  ;;  %v578_v11 = vmul.f32 %v1035_v7, %v1174_v20  ;;  %v504_v13 = vpop.f32.mrb[7].mxu1 }
  0xf2   : > { %788 = vst.msk [vmem:[%s1200_s8 + $0x4] sm:$0xf] %vm786_vm2, %v956_v2  ;;  %804 = vst.msk [vmem:[%s1200_s8 + $0x44] sm:$0xf] %vm786_vm2, %v972_v3  ;;  %v598_v14 = vadd.f32 %v1179_v22, %v559_v4  ;;  %v614_v15 = vadd.f32 %v1179_v22, %v575_v5  ;;  %v560_v16 = vmul.f32 %v1174_v20, %v440_v12 }
  0xf3   : > { %v576_v17 = vmul.f32 %v1174_v20, %v504_v13  ;;  %v632_v18 = vmax.f32 %v600_v8, 0.0  ;;  %v648_v19 = vmax.f32 %v616_v9, 0.0  ;;  %v601_v21 = vadd.f32 %v1179_v22, %v562_v10 }
  0xf4   : > { %v617_v23 = vadd.f32 %v1179_v22, %v578_v11  ;;  %v630_v24 = vmax.f32 %v598_v14, 0.0  ;;  %v646_v25 = vmax.f32 %v614_v15, 0.0  ;;  %v599_v26 = vadd.f32 %v1179_v22, %v560_v16 }
  0xf5   : > { %v615_v27 = vadd.f32 %v1179_v22, %v576_v17  ;;  %v961_v28 = vpack.c.bf16 %v632_v18, %v632_v18  ;;  %v977_v29 = vpack.c.bf16 %v648_v19, %v648_v19  ;;  %v633_v30 = vmax.f32 %v601_v21, 0.0  ;;  %v1022_v36 = vpop.f32.mrb[8].mxu0 }
  0xf6   : > { %v649_v31 = vmax.f32 %v617_v23, 0.0  ;;  %v959_v32 = vpack.c.bf16 %v630_v24, %v630_v24  ;;  %v975_v33 = vpack.c.bf16 %v646_v25, %v646_v25  ;;  %v631_v34 = vmax.f32 %v599_v26, 0.0  ;;  %v1038_v37 = vpop.f32.mrb[8].mxu1  ;;  %v453_v42 = vpop.f32.mrb[9].mxu0 }
  0xf7   : > { %v647_v35 = vmax.f32 %v615_v27, 0.0  ;;  %793 = vst.msk [vmem:[%s1200_s8 + $0x18] sm:$0xf] %vm786_vm2, %v961_v28  ;;  %809 = vst.msk [vmem:[%s1200_s8 + $0x58] sm:$0xf] %vm786_vm2, %v977_v29  ;;  %v962_v38 = vpack.c.bf16 %v633_v30, %v633_v30  ;;  %v565_v40 = vmul.f32 %v1022_v36, %v1174_v20  ;;  %v581_v41 = vmul.f32 %v1038_v37, %v1174_v20  ;;  %v517_v43 = vpop.f32.mrb[9].mxu1 }
  0xf8   : > { %v978_v39 = vpack.c.bf16 %v649_v31, %v649_v31  ;;  %791 = vst.msk [vmem:[%s1200_s8 + $0x10] sm:$0xf] %vm786_vm2, %v959_v32  ;;  %807 = vst.msk [vmem:[%s1200_s8 + $0x50] sm:$0xf] %vm786_vm2, %v975_v33  ;;  %v960_v44 = vpack.c.bf16 %v631_v34, %v631_v34  ;;  %v563_v46 = vmul.f32 %v1174_v20, %v453_v42  ;;  %v1023_v48 = vpop.f32.mrb[10].mxu0  ;;  %v1039_v49 = vpop.f32.mrb[10].mxu1 }
  0xf9   : > { %v976_v45 = vpack.c.bf16 %v647_v35, %v647_v35  ;;  %v579_v47 = vmul.f32 %v1174_v20, %v517_v43  ;;  %794 = vst.msk [vmem:[%s1200_s8 + $0x1c] sm:$0xf] %vm786_vm2, %v962_v38  ;;  %v604_v50 = vadd.f32 %v1179_v22, %v565_v40  ;;  %v620_v51 = vadd.f32 %v1179_v22, %v581_v41  ;;  %v456_v54 = vpop.f32.mrb[11].mxu0  ;;  %v520_v55 = vpop.f32.mrb[11].mxu1 }
  0xfa   : > { %810 = vst.msk [vmem:[%s1200_s8 + $0x5c] sm:$0xf] %vm786_vm2, %v978_v39  ;;  %v566_v52 = vmul.f32 %v1023_v48, %v1174_v20  ;;  %v582_v53 = vmul.f32 %v1039_v49, %v1174_v20  ;;  %792 = vst.msk [vmem:[%s1200_s8 + $0x14] sm:$0xf] %vm786_vm2, %v960_v44  ;;  %v602_v56 = vadd.f32 %v1179_v22, %v563_v46 }
  0xfb   : > { %808 = vst.msk [vmem:[%s1200_s8 + $0x54] sm:$0xf] %vm786_vm2, %v976_v45  ;;  %v618_v57 = vadd.f32 %v1179_v22, %v579_v47  ;;  %v564_v58 = vmul.f32 %v1174_v20, %v456_v54  ;;  %v580_v59 = vmul.f32 %v1174_v20, %v520_v55  ;;  %v636_v60 = vmax.f32 %v604_v50, 0.0 }
  0xfc   : > { %v652_v61 = vmax.f32 %v620_v51, 0.0  ;;  %v605_v62 = vadd.f32 %v1179_v22, %v566_v52  ;;  %v621_v63 = vadd.f32 %v1179_v22, %v582_v53  ;;  %v634_v0 = vmax.f32 %v602_v56, 0.0 }
  0xfd   : > { %v650_v1 = vmax.f32 %v618_v57, 0.0  ;;  %v603_v2 = vadd.f32 %v1179_v22, %v564_v58  ;;  %v619_v3 = vadd.f32 %v1179_v22, %v580_v59  ;;  %v965_v4 = vpack.c.bf16 %v636_v60, %v636_v60  ;;  %v1026_v12 = vpop.f32.mrb[12].mxu0 }
  0xfe   : > { %v981_v5 = vpack.c.bf16 %v652_v61, %v652_v61  ;;  %v637_v6 = vmax.f32 %v605_v62, 0.0  ;;  %v653_v7 = vmax.f32 %v621_v63, 0.0  ;;  %v963_v8 = vpack.c.bf16 %v634_v0, %v634_v0  ;;  %v1042_v13 = vpop.f32.mrb[12].mxu1  ;;  %v469_v18 = vpop.f32.mrb[13].mxu0 }
  0xff   : > { %v979_v9 = vpack.c.bf16 %v650_v1, %v650_v1  ;;  %v635_v10 = vmax.f32 %v603_v2, 0.0  ;;  %v651_v11 = vmax.f32 %v619_v3, 0.0  ;;  %797 = vst.msk [vmem:[%s1200_s8 + $0x28] sm:$0xf] %vm786_vm2, %v965_v4  ;;  %v569_v16 = vmul.f32 %v1026_v12, %v1174_v20  ;;  %v533_v19 = vpop.f32.mrb[13].mxu1  ;;  %v1027_v26 = vpop.f32.mrb[14].mxu0 }
 0x100   : > { %813 = vst.msk [vmem:[%s1200_s8 + $0x68] sm:$0xf] %vm786_vm2, %v981_v5  ;;  %v966_v14 = vpack.c.bf16 %v637_v6, %v637_v6  ;;  %v982_v15 = vpack.c.bf16 %v653_v7, %v653_v7  ;;  %v585_v17 = vmul.f32 %v1042_v13, %v1174_v20  ;;  %795 = vst.msk [vmem:[%s1200_s8 + $0x20] sm:$0xf] %vm786_vm2, %v963_v8  ;;  %v1043_v27 = vpop.f32.mrb[14].mxu1  ;;  %v472_v32 = vpop.f32.mrb[15].mxu0 }
 0x101   : > { %811 = vst.msk [vmem:[%s1200_s8 + $0x60] sm:$0xf] %vm786_vm2, %v979_v9  ;;  %v964_v21 = vpack.c.bf16 %v635_v10, %v635_v10  ;;  %v980_v23 = vpack.c.bf16 %v651_v11, %v651_v11  ;;  %v567_v24 = vmul.f32 %v1174_v20, %v469_v18  ;;  %v583_v25 = vmul.f32 %v1174_v20, %v533_v19  ;;  %v536_v33 = vpop.f32.mrb[15].mxu1 }
 0x102   : > { %798 = vst.msk [vmem:[%s1200_s8 + $0x2c] sm:$0xf] %vm786_vm2, %v966_v14  ;;  %814 = vst.msk [vmem:[%s1200_s8 + $0x6c] sm:$0xf] %vm786_vm2, %v982_v15  ;;  %v608_v28 = vadd.f32 %v1179_v22, %v569_v16  ;;  %v624_v29 = vadd.f32 %v1179_v22, %v585_v17  ;;  %v570_v30 = vmul.f32 %v1027_v26, %v1174_v20 }
 0x103   : > { %v586_v31 = vmul.f32 %v1043_v27, %v1174_v20  ;;  %796 = vst.msk [vmem:[%s1200_s8 + $0x24] sm:$0xf] %vm786_vm2, %v964_v21  ;;  %812 = vst.msk [vmem:[%s1200_s8 + $0x64] sm:$0xf] %vm786_vm2, %v980_v23  ;;  %v606_v34 = vadd.f32 %v1179_v22, %v567_v24  ;;  %v622_v35 = vadd.f32 %v1179_v22, %v583_v25 }
 0x104   : > { %v568_v36 = vmul.f32 %v1174_v20, %v472_v32  ;;  %v584_v37 = vmul.f32 %v1174_v20, %v536_v33  ;;  %v640_v38 = vmax.f32 %v608_v28, 0.0  ;;  %v656_v39 = vmax.f32 %v624_v29, 0.0 }
 0x105   : > { %v609_v40 = vadd.f32 %v1179_v22, %v570_v30  ;;  %v625_v41 = vadd.f32 %v1179_v22, %v586_v31  ;;  %v638_v42 = vmax.f32 %v606_v34, 0.0  ;;  %v654_v43 = vmax.f32 %v622_v35, 0.0 }
 0x106   : > { %v607_v44 = vadd.f32 %v1179_v22, %v568_v36  ;;  %v623_v45 = vadd.f32 %v1179_v22, %v584_v37  ;;  %v969_v46 = vpack.c.bf16 %v640_v38, %v640_v38  ;;  %v985_v47 = vpack.c.bf16 %v656_v39, %v656_v39 }
 0x107   : > { %v641_v20 = vmax.f32 %v609_v40, 0.0  ;;  %v657_v48 = vmax.f32 %v625_v41, 0.0  ;;  %v967_v49 = vpack.c.bf16 %v638_v42, %v638_v42  ;;  %v983_v50 = vpack.c.bf16 %v654_v43, %v654_v43 }
 0x108   : > { %v639_v51 = vmax.f32 %v607_v44, 0.0  ;;  %v655_v52 = vmax.f32 %v623_v45, 0.0  ;;  %801 = vst.msk [vmem:[%s1200_s8 + $0x38] sm:$0xf] %vm786_vm2, %v969_v46  ;;  %817 = vst.msk [vmem:[%s1200_s8 + $0x78] sm:$0xf] %vm786_vm2, %v985_v47 }
 0x109   : > { %v970_v53 = vpack.c.bf16 %v641_v20, %v641_v20  ;;  %v986_v54 = vpack.c.bf16 %v657_v48, %v657_v48  ;;  %799 = vst.msk [vmem:[%s1200_s8 + $0x30] sm:$0xf] %vm786_vm2, %v967_v49  ;;  %815 = vst.msk [vmem:[%s1200_s8 + $0x70] sm:$0xf] %vm786_vm2, %v983_v50 }
 0x10a   : > { %v968_v22 = vpack.c.bf16 %v639_v51, %v639_v51  ;;  %v984_v55 = vpack.c.bf16 %v655_v52, %v655_v52 }
 0x10b   : > { %802 = vst.msk [vmem:[%s1200_s8 + $0x3c] sm:$0xf] %vm786_vm2, %v970_v53  ;;  %818 = vst.msk [vmem:[%s1200_s8 + $0x7c] sm:$0xf] %vm786_vm2, %v986_v54 }
 0x10c   : > { %800 = vst.msk [vmem:[%s1200_s8 + $0x34] sm:$0xf] %vm786_vm2, %v968_v22  ;;  %816 = vst.msk [vmem:[%s1200_s8 + $0x74] sm:$0xf] %vm786_vm2, %v984_v55 }
 0x10d PF: > { %s14_s15 = sadd.s32 1, %s1085_s15  }
 0x10e   : > { %p11_p4 = scmp.ge.s32.totalorder %s14_s15, 10  }
 0x110   :  { %13 = sbr.rel (!%p11_p4) target bundleno = 1 (0x1), region = 66 }

// kernel: _lambda_.9
= control target key start
LH: loop header
LB: loop body
LE: loop exit
PB: predicated region body
PF: predicated region fallthrough
CT: control target
= control target key end

     0   :  { %s1244_s15 = smov 0   ;;  %s1482_s0 = inlined_call_operand.vmem [shape: bf16[2048,144], index: 0, kind: input, shape index: {}]   ;;  %s1483_s1 = inlined_call_operand.vmem [shape: bf16[144,16], index: 1, kind: input, shape index: {}]   ;;  %s1484_s2 = inlined_call_operand.vmem [shape: f32[1,16], index: 2, kind: input, shape index: {}]   ;;  %s1485_s3 = inlined_call_operand.vmem [shape: f32[1,16], index: 3, kind: input, shape index: {}]   ;;  %s1486_s4 = inlined_call_operand.vmem [shape: bf16[2048,16], index: 4, kind: output, shape index: {}]  }
   0x1 LB: > { %s990_s16 = sadd.s32 4294967295, %s1216_s15   ;;  %p994_p0 = scmp.ge.s32.totalorder %s1216_s15, 1  ;;  %s1216_s15 = sphi %s1244_s15, %s14_s15  }
   0x2   : > { %p164_p1 = scmp.lt.s32.totalorder %s1216_s15, 9 }
   0x4   : > { %p165_p2 = pnand %p994_p0, %p164_p1 }
   0x5   : > { %v1153_v0 = vld [vmem:[%s1483_s1] sm:$0xff] (!%p165_p2)   ;;  %v1218_v1 = vmov (!%p165_p2), 0   ;;  %s995_s19 = sshll.u32 (!%p165_p2), %s990_s16, 5  ;;  %v1154_v2 = vld [vmem:[%s1483_s1 + $0x8] sm:$0xff] (!%p165_p2)   ;;  %v1155_v3 = vld [vmem:[%s1483_s1 + $0x10] sm:$0xff] (!%p165_p2)   ;;  %vm453_vm0 = vcmask (!%p165_p2), 130048  }
   0x6   : > { %168 = sbr.rel (%p165_p2) target bundleno = 321 (0x141), region = 36  ;;  %502 = vmatprep.subr.bf16.mxu0 (!%p165_p2), %v1218_v1  ;;  %1126 = vmatprep.subr.bf16.mxu1 (!%p165_p2), %v1218_v1  ;;  %p192_p3 = scmp.lt.s32.totalorder (!%p165_p2), %s995_s19, 255  ;;  %v1156_v4 = vld [vmem:[%s1483_s1 + $0x18] sm:$0xff] (!%p165_p2)   ;;  %v1157_v7 = vld [vmem:[%s1483_s1 + $0x20] sm:$0xff] (!%p165_p2)   ;;  %v1158_v8 = vld [vmem:[%s1483_s1 + $0x28] sm:$0xff] (!%p165_p2)   ;;  %vm901_vm1 = vcmask (!%p165_p2), 125952  }
   0x7   : > { %503 = vmatpush1.bf16.msra.mxu0 (!%p165_p2), %v1153_v0  ;;  %1135 = vmatpush1.bf16.msra.mxu1 (!%p165_p2), %v1153_v0  ;;  %v1159_v9 = vld [vmem:[%s1483_s1 + $0x30] sm:$0xff] (!%p165_p2)   ;;  %v1160_v10 = vld [vmem:[%s1483_s1 + $0x38] sm:$0xff] (!%p165_p2)   ;;  %v1161_v11 = vld [vmem:[%s1483_s1 + $0x40] sm:$0xff] (!%p165_p2)  }
   0x8   : > { %504 = vmatprep.subr.bf16.mxu0 (!%p165_p2), %v1218_v1  ;;  %1127 = vmatprep.subr.bf16.mxu1 (!%p165_p2), %v1218_v1  ;;  %v1338_v42 = vld [vmem:[%s1484_s2] ss:$0 sm:$0xff] (!%p165_p2) }
   0x9   : > { %v1343_v44 = vld [vmem:[%s1485_s3] ss:$0 sm:$0xff] (!%p165_p2) }
   0xb   : > { %505 = vmatpush1.bf16.msra.mxu0 (!%p165_p2), %v1154_v2  ;;  %1136 = vmatpush1.bf16.msra.mxu1 (!%p165_p2), %v1154_v2 }
   0xc   : > { %506 = vmatprep.subr.bf16.mxu0 (!%p165_p2), %v1218_v1  ;;  %1128 = vmatprep.subr.bf16.mxu1 (!%p165_p2), %v1218_v1 }
   0xd   : > { %s1488_s19 = smov (!%p192_p3, %s995_s19), 255 }
   0xe   : > { %s1093_s24 = sshll.u32 %s1488_s19, 3  ;;  %s999_s20 = sshll.u32 %s1488_s19, 2 }
   0xf   : > { %s1267_s27 = scalar_lea.vmem %s1482_s0, %s1093_s24  ;;  %507 = vmatpush1.bf16.msra.mxu0 %v1155_v3  ;;  %1137 = vmatpush1.bf16.msra.mxu1 %v1155_v3  ;;  %s1357_s19 = scalar_lea.vmem %s1486_s4, %s999_s20 }
  0x10   : > { %v1164_v5 = vld [vmem:[%s1267_s27 + $0x4] ss:$8 sps:$4 sm:$0xff]   ;;  %508 = vmatprep.subr.bf16.mxu0 %v1218_v1  ;;  %1129 = vmatprep.subr.bf16.mxu1 %v1218_v1  ;;  %v1162_v12 = vld [vmem:[%s1267_s27] ss:$8 sps:$4 sm:$0xff]   ;;  %v1168_v14 = vld [vmem:[%s1267_s27 + $0x14] ss:$8 sps:$4 sm:$0xff]  }
  0x11   : > { %v1167_v6 = vld [vmem:[%s1267_s27 + $0x84] ss:$8 sps:$4 sm:$0xff]   ;;  %1041 = vmatprep.mubr.msk.bf16.mxu0 %vm453_vm0, %v1164_v5  ;;  %v1165_v13 = vld [vmem:[%s1267_s27 + $0x80] ss:$8 sps:$4 sm:$0xff]   ;;  %v1170_v15 = vld [vmem:[%s1267_s27 + $0x94] ss:$8 sps:$4 sm:$0xff]  }
  0x12   : > { %1049 = vmatprep.mubr.msk.bf16.mxu1 %vm453_vm0, %v1167_v6  ;;  %v1172_v16 = vld [vmem:[%s1267_s27 + $0x10] ss:$8 sps:$4 sm:$0xff]   ;;  %v1174_v18 = vld [vmem:[%s1267_s27 + $0x24] ss:$8 sps:$4 sm:$0xff]   ;;  %v1178_v20 = vld [vmem:[%s1267_s27 + $0x20] ss:$8 sps:$4 sm:$0xff]  }
  0x13   : > { %509 = vmatpush1.bf16.msra.mxu0 %v1156_v4  ;;  %1138 = vmatpush1.bf16.msra.mxu1 %v1156_v4  ;;  %v1173_v17 = vld [vmem:[%s1267_s27 + $0x90] ss:$8 sps:$4 sm:$0xff]   ;;  %v1176_v19 = vld [vmem:[%s1267_s27 + $0xa4] ss:$8 sps:$4 sm:$0xff]   ;;  %v1179_v21 = vld [vmem:[%s1267_s27 + $0xa0] ss:$8 sps:$4 sm:$0xff]  }
  0x14   : > { %510 = vmatprep.subr.bf16.mxu0 %v1218_v1  ;;  %1130 = vmatprep.subr.bf16.mxu1 %v1218_v1  ;;  %v1180_v22 = vld [vmem:[%s1267_s27 + $0x34] ss:$8 sps:$4 sm:$0xff]   ;;  %v1184_v24 = vld [vmem:[%s1267_s27 + $0x30] ss:$8 sps:$4 sm:$0xff]   ;;  %v1186_v26 = vld [vmem:[%s1267_s27 + $0x44] ss:$8 sps:$4 sm:$0xff]  }
  0x15   : > { %v1182_v23 = vld [vmem:[%s1267_s27 + $0xb4] ss:$8 sps:$4 sm:$0xff]   ;;  %v1185_v25 = vld [vmem:[%s1267_s27 + $0xb0] ss:$8 sps:$4 sm:$0xff]   ;;  %v1188_v27 = vld [vmem:[%s1267_s27 + $0xc4] ss:$8 sps:$4 sm:$0xff]  }
  0x16   : > { %v1190_v28 = vld [vmem:[%s1267_s27 + $0x40] ss:$8 sps:$4 sm:$0xff]   ;;  %v1192_v30 = vld [vmem:[%s1267_s27 + $0x54] ss:$8 sps:$4 sm:$0xff]   ;;  %v1196_v32 = vld [vmem:[%s1267_s27 + $0x50] ss:$8 sps:$4 sm:$0xff]  }
  0x17   : > { %511 = vmatpush1.bf16.msra.mxu0 %v1157_v7  ;;  %1139 = vmatpush1.bf16.msra.mxu1 %v1157_v7  ;;  %v1191_v29 = vld [vmem:[%s1267_s27 + $0xc0] ss:$8 sps:$4 sm:$0xff]   ;;  %v1194_v31 = vld [vmem:[%s1267_s27 + $0xd4] ss:$8 sps:$4 sm:$0xff]   ;;  %v1197_v33 = vld [vmem:[%s1267_s27 + $0xd0] ss:$8 sps:$4 sm:$0xff]  }
  0x18   : > { %512 = vmatprep.subr.bf16.mxu0 %v1218_v1  ;;  %1131 = vmatprep.subr.bf16.mxu1 %v1218_v1  ;;  %v1198_v34 = vld [vmem:[%s1267_s27 + $0x64] ss:$8 sps:$4 sm:$0xff]   ;;  %v1202_v36 = vld [vmem:[%s1267_s27 + $0x60] ss:$8 sps:$4 sm:$0xff]   ;;  %v1204_v38 = vld [vmem:[%s1267_s27 + $0x74] ss:$8 sps:$4 sm:$0xff]  }
  0x19   : > { %v1200_v35 = vld [vmem:[%s1267_s27 + $0xe4] ss:$8 sps:$4 sm:$0xff]   ;;  %v1203_v37 = vld [vmem:[%s1267_s27 + $0xe0] ss:$8 sps:$4 sm:$0xff]   ;;  %v1206_v39 = vld [vmem:[%s1267_s27 + $0xf4] ss:$8 sps:$4 sm:$0xff]  }
  0x1a   : > { %v1208_v40 = vld [vmem:[%s1267_s27 + $0x70] ss:$8 sps:$4 sm:$0xff]  }
  0x1b   : > { %513 = vmatpush1.bf16.msra.mxu0 %v1158_v8  ;;  %1140 = vmatpush1.bf16.msra.mxu1 %v1158_v8  ;;  %v1209_v41 = vld [vmem:[%s1267_s27 + $0xf0] ss:$8 sps:$4 sm:$0xff]  }
  0x1c   : > { %514 = vmatprep.subr.bf16.mxu0 %v1218_v1  ;;  %1132 = vmatprep.subr.bf16.mxu1 %v1218_v1 }
  0x1f   : > { %515 = vmatpush1.bf16.msra.mxu0 %v1159_v9  ;;  %1141 = vmatpush1.bf16.msra.mxu1 %v1159_v9 }
  0x20   : > { %516 = vmatprep.subr.bf16.mxu0 %v1218_v1  ;;  %1133 = vmatprep.subr.bf16.mxu1 %v1218_v1 }
  0x23   : > { %517 = vmatpush1.bf16.msra.mxu0 %v1160_v10  ;;  %1142 = vmatpush1.bf16.msra.mxu1 %v1160_v10 }
  0x24   : > { %518 = vmatprep.subr.bf16.mxu0 %v1218_v1  ;;  %1134 = vmatprep.subr.bf16.mxu1 %v1218_v1 }
  0x27   : > { %519 = vmatpush1.bf16.msra.mxu0 %v1161_v11  ;;  %1143 = vmatpush1.bf16.msra.mxu1 %v1161_v11 }
  0x2a   : > { %535 = vmatmul.mubr.bf16.vlgmr.msra.gmra.mrb[0].mxu0 %v1162_v12  ;;  %599 = vmatmul.mubr.bf16.vlgmr.msra.gmra.mrb[0].mxu1 %v1165_v13 }
  0x2b   : > { %1042 = vmatprep.mubr.msk.bf16.mxu0 %vm453_vm0, %v1168_v14  ;;  %1050 = vmatprep.mubr.msk.bf16.mxu1 %vm453_vm0, %v1170_v15 }
  0x32   : > { %543 = vmatmul.mubr.bf16.gmra.mrb[4].mxu0 %v1172_v16  ;;  %607 = vmatmul.mubr.bf16.gmra.mrb[4].mxu1 %v1173_v17 }
  0x33   : > { %1043 = vmatprep.mubr.msk.bf16.mxu0 %vm453_vm0, %v1174_v18  ;;  %1051 = vmatprep.mubr.msk.bf16.mxu1 %vm453_vm0, %v1176_v19 }
  0x3a   : > { %551 = vmatmul.mubr.bf16.gmra.mrb[8].mxu0 %v1178_v20  ;;  %615 = vmatmul.mubr.bf16.gmra.mrb[8].mxu1 %v1179_v21 }
  0x3b   : > { %1044 = vmatprep.mubr.msk.bf16.mxu0 %vm453_vm0, %v1180_v22  ;;  %1052 = vmatprep.mubr.msk.bf16.mxu1 %vm453_vm0, %v1182_v23 }
  0x42   : > { %559 = vmatmul.mubr.bf16.gmra.mrb[12].mxu0 %v1184_v24  ;;  %623 = vmatmul.mubr.bf16.gmra.mrb[12].mxu1 %v1185_v25 }
  0x43   : > { %1045 = vmatprep.mubr.msk.bf16.mxu0 %vm453_vm0, %v1186_v26  ;;  %1053 = vmatprep.mubr.msk.bf16.mxu1 %vm453_vm0, %v1188_v27 }
  0x4a   : > { %567 = vmatmul.mubr.bf16.gmra.mrb[16].mxu0 %v1190_v28  ;;  %631 = vmatmul.mubr.bf16.gmra.mrb[16].mxu1 %v1191_v29 }
  0x4b   : > { %1046 = vmatprep.mubr.msk.bf16.mxu0 %vm453_vm0, %v1192_v30  ;;  %1054 = vmatprep.mubr.msk.bf16.mxu1 %vm453_vm0, %v1194_v31 }
  0x52   : > { %575 = vmatmul.mubr.bf16.gmra.mrb[20].mxu0 %v1196_v32  ;;  %639 = vmatmul.mubr.bf16.gmra.mrb[20].mxu1 %v1197_v33 }
  0x53   : > { %1047 = vmatprep.mubr.msk.bf16.mxu0 %vm453_vm0, %v1198_v34  ;;  %1055 = vmatprep.mubr.msk.bf16.mxu1 %vm453_vm0, %v1200_v35 }
  0x5a   : > { %583 = vmatmul.mubr.bf16.gmra.mrb[24].mxu0 %v1202_v36  ;;  %647 = vmatmul.mubr.bf16.gmra.mrb[24].mxu1 %v1203_v37 }
  0x5b   : > { %1048 = vmatprep.mubr.msk.bf16.mxu0 %vm453_vm0, %v1204_v38  ;;  %1056 = vmatprep.mubr.msk.bf16.mxu1 %vm453_vm0, %v1206_v39 }
  0x62   : > { %591 = vmatmul.mubr.bf16.gmra.mrb[28].mxu0 %v1208_v40  ;;  %655 = vmatmul.mubr.bf16.gmra.mrb[28].mxu1 %v1209_v41 }
  0xfd   : > { %v536_v43 = vpop.f32.mrb[0].mxu0  ;;  %v600_v45 = vpop.f32.mrb[0].mxu1 }
  0xfe   : > { %v670_v46 = vmul.f32 %v1338_v42, %v536_v43  ;;  %v686_v47 = vmul.f32 %v1338_v42, %v600_v45  ;;  %v538_v48 = vpop.f32.mrb[1].mxu0  ;;  %v602_v49 = vpop.f32.mrb[1].mxu1 }
  0xff   : > { %v539_v50 = vpop.f32.mrb[2].mxu0  ;;  %v603_v51 = vpop.f32.mrb[2].mxu1 }
 0x100   : > { %v709_v52 = vadd.f32 %v1343_v44, %v670_v46  ;;  %v725_v53 = vadd.f32 %v1343_v44, %v686_v47  ;;  %v671_v54 = vmul.f32 %v1338_v42, %v539_v50  ;;  %v687_v55 = vmul.f32 %v1338_v42, %v603_v51  ;;  %v541_v56 = vpop.f32.mrb[3].mxu0  ;;  %v605_v57 = vpop.f32.mrb[3].mxu1 }
 0x102   : > { %v741_v58 = vmax.f32 %v709_v52, 0.0  ;;  %v757_v59 = vmax.f32 %v725_v53, 0.0  ;;  %v710_v60 = vadd.f32 %v1343_v44, %v671_v54  ;;  %v726_v61 = vadd.f32 %v1343_v44, %v687_v55 }
 0x104   : > { %v1094_v62 = vpack.c.bf16 %v741_v58, %v741_v58  ;;  %v1110_v63 = vpack.c.bf16 %v757_v59, %v757_v59  ;;  %v742_v0 = vmax.f32 %v710_v60, 0.0  ;;  %v758_v1 = vmax.f32 %v726_v61, 0.0 }
 0x105   : > { %v544_v2 = vpop.f32.mrb[4].mxu0  ;;  %v608_v3 = vpop.f32.mrb[4].mxu1 }
 0x106   : > { %902 = vst.msk [vmem:[%s1357_s19] sm:$0xf] %vm901_vm1, %v1094_v62  ;;  %918 = vst.msk [vmem:[%s1357_s19 + $0x40] sm:$0xf] %vm901_vm1, %v1110_v63  ;;  %v1095_v4 = vpack.c.bf16 %v742_v0, %v742_v0  ;;  %v1111_v5 = vpack.c.bf16 %v758_v1, %v758_v1  ;;  %v672_v6 = vmul.f32 %v1338_v42, %v544_v2  ;;  %v546_v8 = vpop.f32.mrb[5].mxu0  ;;  %v610_v9 = vpop.f32.mrb[5].mxu1 }
 0x107   : > { %v688_v7 = vmul.f32 %v1338_v42, %v608_v3  ;;  %v547_v10 = vpop.f32.mrb[6].mxu0  ;;  %v611_v11 = vpop.f32.mrb[6].mxu1 }
 0x108   : > { %903 = vst.msk [vmem:[%s1357_s19 + $0x4] sm:$0xf] %vm901_vm1, %v1095_v4  ;;  %919 = vst.msk [vmem:[%s1357_s19 + $0x44] sm:$0xf] %vm901_vm1, %v1111_v5  ;;  %v711_v12 = vadd.f32 %v1343_v44, %v672_v6  ;;  %v673_v14 = vmul.f32 %v1338_v42, %v547_v10  ;;  %v689_v15 = vmul.f32 %v1338_v42, %v611_v11  ;;  %v549_v16 = vpop.f32.mrb[7].mxu0  ;;  %v613_v17 = vpop.f32.mrb[7].mxu1 }
 0x109   : > { %v727_v13 = vadd.f32 %v1343_v44, %v688_v7 }
 0x10a   : > { %v743_v18 = vmax.f32 %v711_v12, 0.0  ;;  %v712_v20 = vadd.f32 %v1343_v44, %v673_v14  ;;  %v728_v21 = vadd.f32 %v1343_v44, %v689_v15 }
 0x10b   : > { %v759_v19 = vmax.f32 %v727_v13, 0.0 }
 0x10c   : > { %v1096_v22 = vpack.c.bf16 %v743_v18, %v743_v18  ;;  %v744_v24 = vmax.f32 %v712_v20, 0.0  ;;  %v760_v25 = vmax.f32 %v728_v21, 0.0 }
 0x10d   : > { %v1112_v23 = vpack.c.bf16 %v759_v19, %v759_v19  ;;  %v552_v26 = vpop.f32.mrb[8].mxu0  ;;  %v616_v27 = vpop.f32.mrb[8].mxu1 }
 0x10e   : > { %904 = vst.msk [vmem:[%s1357_s19 + $0x8] sm:$0xf] %vm901_vm1, %v1096_v22  ;;  %v1097_v28 = vpack.c.bf16 %v744_v24, %v744_v24  ;;  %v1113_v29 = vpack.c.bf16 %v760_v25, %v760_v25  ;;  %v674_v30 = vmul.f32 %v1338_v42, %v552_v26  ;;  %v690_v31 = vmul.f32 %v1338_v42, %v616_v27  ;;  %v554_v32 = vpop.f32.mrb[9].mxu0  ;;  %v618_v33 = vpop.f32.mrb[9].mxu1 }
 0x10f   : > { %920 = vst.msk [vmem:[%s1357_s19 + $0x48] sm:$0xf] %vm901_vm1, %v1112_v23  ;;  %v555_v34 = vpop.f32.mrb[10].mxu0  ;;  %v619_v35 = vpop.f32.mrb[10].mxu1 }
 0x110   : > { %905 = vst.msk [vmem:[%s1357_s19 + $0xc] sm:$0xf] %vm901_vm1, %v1097_v28  ;;  %921 = vst.msk [vmem:[%s1357_s19 + $0x4c] sm:$0xf] %vm901_vm1, %v1113_v29  ;;  %v713_v36 = vadd.f32 %v1343_v44, %v674_v30  ;;  %v729_v37 = vadd.f32 %v1343_v44, %v690_v31  ;;  %v675_v38 = vmul.f32 %v1338_v42, %v555_v34  ;;  %v557_v40 = vpop.f32.mrb[11].mxu0  ;;  %v621_v41 = vpop.f32.mrb[11].mxu1 }
 0x111   : > { %v691_v39 = vmul.f32 %v1338_v42, %v619_v35 }
 0x112   : > { %v745_v43 = vmax.f32 %v713_v36, 0.0  ;;  %v761_v45 = vmax.f32 %v729_v37, 0.0  ;;  %v714_v46 = vadd.f32 %v1343_v44, %v675_v38 }
 0x113   : > { %v730_v47 = vadd.f32 %v1343_v44, %v691_v39 }
 0x114   : > { %v1098_v48 = vpack.c.bf16 %v745_v43, %v745_v43  ;;  %v1114_v49 = vpack.c.bf16 %v761_v45, %v761_v45  ;;  %v746_v50 = vmax.f32 %v714_v46, 0.0 }
 0x115   : > { %v762_v51 = vmax.f32 %v730_v47, 0.0  ;;  %v560_v52 = vpop.f32.mrb[12].mxu0  ;;  %v624_v53 = vpop.f32.mrb[12].mxu1 }
 0x116   : > { %906 = vst.msk [vmem:[%s1357_s19 + $0x10] sm:$0xf] %vm901_vm1, %v1098_v48  ;;  %922 = vst.msk [vmem:[%s1357_s19 + $0x50] sm:$0xf] %vm901_vm1, %v1114_v49  ;;  %v1099_v54 = vpack.c.bf16 %v746_v50, %v746_v50  ;;  %v676_v56 = vmul.f32 %v1338_v42, %v560_v52  ;;  %v692_v57 = vmul.f32 %v1338_v42, %v624_v53  ;;  %v562_v58 = vpop.f32.mrb[13].mxu0  ;;  %v626_v59 = vpop.f32.mrb[13].mxu1 }
 0x117   : > { %v1115_v55 = vpack.c.bf16 %v762_v51, %v762_v51  ;;  %v563_v60 = vpop.f32.mrb[14].mxu0  ;;  %v627_v61 = vpop.f32.mrb[14].mxu1 }
 0x118   : > { %907 = vst.msk [vmem:[%s1357_s19 + $0x14] sm:$0xf] %vm901_vm1, %v1099_v54  ;;  %v715_v62 = vadd.f32 %v1343_v44, %v676_v56  ;;  %v731_v63 = vadd.f32 %v1343_v44, %v692_v57  ;;  %v677_v0 = vmul.f32 %v1338_v42, %v563_v60  ;;  %v693_v1 = vmul.f32 %v1338_v42, %v627_v61  ;;  %v565_v2 = vpop.f32.mrb[15].mxu0  ;;  %v629_v3 = vpop.f32.mrb[15].mxu1 }
 0x119   : > { %923 = vst.msk [vmem:[%s1357_s19 + $0x54] sm:$0xf] %vm901_vm1, %v1115_v55 }
 0x11a   : > { %v747_v4 = vmax.f32 %v715_v62, 0.0  ;;  %v763_v5 = vmax.f32 %v731_v63, 0.0  ;;  %v716_v6 = vadd.f32 %v1343_v44, %v677_v0  ;;  %v732_v7 = vadd.f32 %v1343_v44, %v693_v1 }
 0x11c   : > { %v1100_v8 = vpack.c.bf16 %v747_v4, %v747_v4  ;;  %v1116_v9 = vpack.c.bf16 %v763_v5, %v763_v5  ;;  %v748_v10 = vmax.f32 %v716_v6, 0.0  ;;  %v764_v11 = vmax.f32 %v732_v7, 0.0 }
 0x11d   : > { %v568_v12 = vpop.f32.mrb[16].mxu0  ;;  %v632_v13 = vpop.f32.mrb[16].mxu1 }
 0x11e   : > { %908 = vst.msk [vmem:[%s1357_s19 + $0x18] sm:$0xf] %vm901_vm1, %v1100_v8  ;;  %924 = vst.msk [vmem:[%s1357_s19 + $0x58] sm:$0xf] %vm901_vm1, %v1116_v9  ;;  %v1101_v14 = vpack.c.bf16 %v748_v10, %v748_v10  ;;  %v1117_v15 = vpack.c.bf16 %v764_v11, %v764_v11  ;;  %v678_v16 = vmul.f32 %v1338_v42, %v568_v12  ;;  %v570_v18 = vpop.f32.mrb[17].mxu0  ;;  %v634_v19 = vpop.f32.mrb[17].mxu1 }
 0x11f   : > { %v694_v17 = vmul.f32 %v1338_v42, %v632_v13  ;;  %v571_v20 = vpop.f32.mrb[18].mxu0  ;;  %v635_v21 = vpop.f32.mrb[18].mxu1 }
 0x120   : > { %909 = vst.msk [vmem:[%s1357_s19 + $0x1c] sm:$0xf] %vm901_vm1, %v1101_v14  ;;  %925 = vst.msk [vmem:[%s1357_s19 + $0x5c] sm:$0xf] %vm901_vm1, %v1117_v15  ;;  %v717_v22 = vadd.f32 %v1343_v44, %v678_v16  ;;  %v679_v24 = vmul.f32 %v1338_v42, %v571_v20  ;;  %v695_v25 = vmul.f32 %v1338_v42, %v635_v21  ;;  %v573_v26 = vpop.f32.mrb[19].mxu0  ;;  %v637_v27 = vpop.f32.mrb[19].mxu1 }
 0x121   : > { %v733_v23 = vadd.f32 %v1343_v44, %v694_v17 }
 0x122   : > { %v749_v28 = vmax.f32 %v717_v22, 0.0  ;;  %v718_v30 = vadd.f32 %v1343_v44, %v679_v24  ;;  %v734_v31 = vadd.f32 %v1343_v44, %v695_v25 }
 0x123   : > { %v765_v29 = vmax.f32 %v733_v23, 0.0 }
 0x124   : > { %v1102_v32 = vpack.c.bf16 %v749_v28, %v749_v28  ;;  %v750_v34 = vmax.f32 %v718_v30, 0.0  ;;  %v766_v35 = vmax.f32 %v734_v31, 0.0 }
 0x125   : > { %v1118_v33 = vpack.c.bf16 %v765_v29, %v765_v29  ;;  %v576_v36 = vpop.f32.mrb[20].mxu0  ;;  %v640_v37 = vpop.f32.mrb[20].mxu1 }
 0x126   : > { %910 = vst.msk [vmem:[%s1357_s19 + $0x20] sm:$0xf] %vm901_vm1, %v1102_v32  ;;  %v1103_v38 = vpack.c.bf16 %v750_v34, %v750_v34  ;;  %v1119_v39 = vpack.c.bf16 %v766_v35, %v766_v35  ;;  %v680_v40 = vmul.f32 %v1338_v42, %v576_v36  ;;  %v696_v41 = vmul.f32 %v1338_v42, %v640_v37  ;;  %v578_v43 = vpop.f32.mrb[21].mxu0  ;;  %v642_v45 = vpop.f32.mrb[21].mxu1 }
 0x127   : > { %926 = vst.msk [vmem:[%s1357_s19 + $0x60] sm:$0xf] %vm901_vm1, %v1118_v33  ;;  %v579_v46 = vpop.f32.mrb[22].mxu0  ;;  %v643_v47 = vpop.f32.mrb[22].mxu1 }
 0x128   : > { %911 = vst.msk [vmem:[%s1357_s19 + $0x24] sm:$0xf] %vm901_vm1, %v1103_v38  ;;  %927 = vst.msk [vmem:[%s1357_s19 + $0x64] sm:$0xf] %vm901_vm1, %v1119_v39  ;;  %v719_v48 = vadd.f32 %v1343_v44, %v680_v40  ;;  %v735_v49 = vadd.f32 %v1343_v44, %v696_v41  ;;  %v681_v50 = vmul.f32 %v1338_v42, %v579_v46  ;;  %v581_v52 = vpop.f32.mrb[23].mxu0  ;;  %v645_v53 = vpop.f32.mrb[23].mxu1 }
 0x129   : > { %v697_v51 = vmul.f32 %v1338_v42, %v643_v47 }
 0x12a   : > { %v751_v54 = vmax.f32 %v719_v48, 0.0  ;;  %v767_v55 = vmax.f32 %v735_v49, 0.0  ;;  %v720_v56 = vadd.f32 %v1343_v44, %v681_v50 }
 0x12b   : > { %v736_v57 = vadd.f32 %v1343_v44, %v697_v51 }
 0x12c   : > { %v1104_v58 = vpack.c.bf16 %v751_v54, %v751_v54  ;;  %v1120_v59 = vpack.c.bf16 %v767_v55, %v767_v55  ;;  %v752_v60 = vmax.f32 %v720_v56, 0.0 }
 0x12d   : > { %v768_v61 = vmax.f32 %v736_v57, 0.0  ;;  %v584_v62 = vpop.f32.mrb[24].mxu0  ;;  %v648_v63 = vpop.f32.mrb[24].mxu1 }
 0x12e   : > { %912 = vst.msk [vmem:[%s1357_s19 + $0x28] sm:$0xf] %vm901_vm1, %v1104_v58  ;;  %928 = vst.msk [vmem:[%s1357_s19 + $0x68] sm:$0xf] %vm901_vm1, %v1120_v59  ;;  %v1105_v0 = vpack.c.bf16 %v752_v60, %v752_v60  ;;  %v682_v2 = vmul.f32 %v1338_v42, %v584_v62  ;;  %v698_v3 = vmul.f32 %v1338_v42, %v648_v63  ;;  %v586_v4 = vpop.f32.mrb[25].mxu0  ;;  %v650_v5 = vpop.f32.mrb[25].mxu1 }
 0x12f   : > { %v1121_v1 = vpack.c.bf16 %v768_v61, %v768_v61  ;;  %v587_v6 = vpop.f32.mrb[26].mxu0  ;;  %v651_v7 = vpop.f32.mrb[26].mxu1 }
 0x130   : > { %913 = vst.msk [vmem:[%s1357_s19 + $0x2c] sm:$0xf] %vm901_vm1, %v1105_v0  ;;  %v721_v8 = vadd.f32 %v1343_v44, %v682_v2  ;;  %v737_v9 = vadd.f32 %v1343_v44, %v698_v3  ;;  %v683_v10 = vmul.f32 %v1338_v42, %v587_v6  ;;  %v699_v11 = vmul.f32 %v1338_v42, %v651_v7  ;;  %v589_v12 = vpop.f32.mrb[27].mxu0  ;;  %v653_v13 = vpop.f32.mrb[27].mxu1 }
 0x131   : > { %929 = vst.msk [vmem:[%s1357_s19 + $0x6c] sm:$0xf] %vm901_vm1, %v1121_v1 }
 0x132   : > { %v753_v14 = vmax.f32 %v721_v8, 0.0  ;;  %v769_v15 = vmax.f32 %v737_v9, 0.0  ;;  %v722_v16 = vadd.f32 %v1343_v44, %v683_v10  ;;  %v738_v17 = vadd.f32 %v1343_v44, %v699_v11 }
 0x134   : > { %v1106_v18 = vpack.c.bf16 %v753_v14, %v753_v14  ;;  %v1122_v19 = vpack.c.bf16 %v769_v15, %v769_v15  ;;  %v754_v20 = vmax.f32 %v722_v16, 0.0  ;;  %v770_v21 = vmax.f32 %v738_v17, 0.0 }
 0x135   : > { %v592_v22 = vpop.f32.mrb[28].mxu0  ;;  %v656_v23 = vpop.f32.mrb[28].mxu1 }
 0x136   : > { %914 = vst.msk [vmem:[%s1357_s19 + $0x30] sm:$0xf] %vm901_vm1, %v1106_v18  ;;  %930 = vst.msk [vmem:[%s1357_s19 + $0x70] sm:$0xf] %vm901_vm1, %v1122_v19  ;;  %v1107_v24 = vpack.c.bf16 %v754_v20, %v754_v20  ;;  %v1123_v25 = vpack.c.bf16 %v770_v21, %v770_v21  ;;  %v684_v26 = vmul.f32 %v1338_v42, %v592_v22  ;;  %v594_v28 = vpop.f32.mrb[29].mxu0  ;;  %v658_v29 = vpop.f32.mrb[29].mxu1 }
 0x137   : > { %v700_v27 = vmul.f32 %v1338_v42, %v656_v23  ;;  %v595_v30 = vpop.f32.mrb[30].mxu0  ;;  %v659_v31 = vpop.f32.mrb[30].mxu1 }
 0x138   : > { %915 = vst.msk [vmem:[%s1357_s19 + $0x34] sm:$0xf] %vm901_vm1, %v1107_v24  ;;  %931 = vst.msk [vmem:[%s1357_s19 + $0x74] sm:$0xf] %vm901_vm1, %v1123_v25  ;;  %v723_v32 = vadd.f32 %v1343_v44, %v684_v26  ;;  %v685_v34 = vmul.f32 %v1338_v42, %v595_v30  ;;  %v701_v35 = vmul.f32 %v1338_v42, %v659_v31  ;;  %v597_v36 = vpop.f32.mrb[31].mxu0  ;;  %v661_v37 = vpop.f32.mrb[31].mxu1 }
 0x139   : > { %v739_v33 = vadd.f32 %v1343_v44, %v700_v27 }
 0x13a   : > { %v755_v38 = vmax.f32 %v723_v32, 0.0  ;;  %v724_v40 = vadd.f32 %v1343_v44, %v685_v34  ;;  %v740_v41 = vadd.f32 %v1343_v44, %v701_v35 }
 0x13b   : > { %v771_v39 = vmax.f32 %v739_v33, 0.0 }
 0x13c   : > { %v1108_v43 = vpack.c.bf16 %v755_v38, %v755_v38  ;;  %v756_v46 = vmax.f32 %v724_v40, 0.0  ;;  %v772_v47 = vmax.f32 %v740_v41, 0.0 }
 0x13d   : > { %v1124_v45 = vpack.c.bf16 %v771_v39, %v771_v39 }
 0x13e   : > { %916 = vst.msk [vmem:[%s1357_s19 + $0x38] sm:$0xf] %vm901_vm1, %v1108_v43  ;;  %v1109_v48 = vpack.c.bf16 %v756_v46, %v756_v46  ;;  %v1125_v49 = vpack.c.bf16 %v772_v47, %v772_v47 }
 0x13f   : > { %932 = vst.msk [vmem:[%s1357_s19 + $0x78] sm:$0xf] %vm901_vm1, %v1124_v45 }
 0x140   : > { %917 = vst.msk [vmem:[%s1357_s19 + $0x3c] sm:$0xf] %vm901_vm1, %v1109_v48  ;;  %933 = vst.msk [vmem:[%s1357_s19 + $0x7c] sm:$0xf] %vm901_vm1, %v1125_v49 }
 0x141 PF: > { %s14_s15 = sadd.s32 1, %s1216_s15  }
 0x142   : > { %p11_p4 = scmp.ge.s32.totalorder %s14_s15, 10  }
 0x144   :  { %13 = sbr.rel (!%p11_p4) target bundleno = 1 (0x1), region = 66 }

// kernel: _lambda_.10
= control target key start
LH: loop header
LB: loop body
LE: loop exit
PB: predicated region body
PF: predicated region fallthrough
CT: control target
= control target key end

     0   :  { %s1487_s18 = smov 0   ;;  %s1750_s0 = inlined_call_operand.vmem [shape: bf16[2048,144], index: 0, kind: input, shape index: {}]   ;;  %s1751_s1 = inlined_call_operand.vmem [shape: bf16[144,16], index: 1, kind: input, shape index: {}]   ;;  %s1752_s2 = inlined_call_operand.vmem [shape: f32[1,16], index: 2, kind: input, shape index: {}]   ;;  %s1753_s3 = inlined_call_operand.vmem [shape: f32[1,16], index: 3, kind: input, shape index: {}]   ;;  %s1754_s4 = inlined_call_operand.vmem [shape: bf16[2048,16], index: 4, kind: input, shape index: {}]   ;;  %s1755_s5 = inlined_call_operand.vmem [shape: bf16[2048,16], index: 5, kind: output, shape index: {}]  }
   0x1 LB: > { %s1147_s19 = sadd.s32 4294967295, %s1454_s18   ;;  %p1151_p0 = scmp.ge.s32.totalorder %s1454_s18, 1  ;;  %s1454_s18 = sphi %s1487_s18, %s15_s18  }
   0x2   : > { %p200_p1 = scmp.lt.s32.totalorder %s1454_s18, 9 }
   0x4   : > { %p201_p2 = pnand %p1151_p0, %p200_p1 }
   0x5   : > { %v1391_v0 = vld [vmem:[%s1751_s1] sm:$0xff] (!%p201_p2)   ;;  %v1456_v1 = vmov (!%p201_p2), 0   ;;  %s1152_s22 = sshll.u32 (!%p201_p2), %s1147_s19, 5  ;;  %v1392_v2 = vld [vmem:[%s1751_s1 + $0x8] sm:$0xff] (!%p201_p2)   ;;  %v1393_v3 = vld [vmem:[%s1751_s1 + $0x10] sm:$0xff] (!%p201_p2)   ;;  %vm502_vm0 = vcmask (!%p201_p2), 130048  }
   0x6   : > { %204 = sbr.rel (%p201_p2) target bundleno = 323 (0x143), region = 40  ;;  %551 = vmatprep.subr.bf16.mxu0 (!%p201_p2), %v1456_v1  ;;  %1364 = vmatprep.subr.bf16.mxu1 (!%p201_p2), %v1456_v1  ;;  %p235_p3 = scmp.lt.s32.totalorder (!%p201_p2), %s1152_s22, 255  ;;  %v1394_v4 = vld [vmem:[%s1751_s1 + $0x18] sm:$0xff] (!%p201_p2)   ;;  %v1395_v7 = vld [vmem:[%s1751_s1 + $0x20] sm:$0xff] (!%p201_p2)   ;;  %v1396_v8 = vld [vmem:[%s1751_s1 + $0x28] sm:$0xff] (!%p201_p2)   ;;  %vm1046_vm1 = vcmask (!%p201_p2), 125952  }
   0x7   : > { %552 = vmatpush1.bf16.msra.mxu0 (!%p201_p2), %v1391_v0  ;;  %1373 = vmatpush1.bf16.msra.mxu1 (!%p201_p2), %v1391_v0  ;;  %v1397_v9 = vld [vmem:[%s1751_s1 + $0x30] sm:$0xff] (!%p201_p2)   ;;  %v1398_v10 = vld [vmem:[%s1751_s1 + $0x38] sm:$0xff] (!%p201_p2)   ;;  %v1399_v11 = vld [vmem:[%s1751_s1 + $0x40] sm:$0xff] (!%p201_p2)  }
   0x8   : > { %553 = vmatprep.subr.bf16.mxu0 (!%p201_p2), %v1456_v1  ;;  %1365 = vmatprep.subr.bf16.mxu1 (!%p201_p2), %v1456_v1  ;;  %v1589_v42 = vld [vmem:[%s1752_s2] ss:$0 sm:$0xff] (!%p201_p2) }
   0x9   : > { %v1596_v46 = vld [vmem:[%s1753_s3] ss:$0 sm:$0xff] (!%p201_p2) }
   0xb   : > { %554 = vmatpush1.bf16.msra.mxu0 (!%p201_p2), %v1392_v2  ;;  %1374 = vmatpush1.bf16.msra.mxu1 (!%p201_p2), %v1392_v2 }
   0xc   : > { %555 = vmatprep.subr.bf16.mxu0 (!%p201_p2), %v1456_v1  ;;  %1366 = vmatprep.subr.bf16.mxu1 (!%p201_p2), %v1456_v1 }
   0xd   : > { %s1757_s22 = smov (!%p235_p3, %s1152_s22), 255 }
   0xe   : > { %s1252_s27 = sshll.u32 %s1757_s22, 3  ;;  %s1156_s19 = sshll.u32 %s1757_s22, 2 }
   0xf   : > { %s1510_s30 = scalar_lea.vmem %s1750_s0, %s1252_s27  ;;  %556 = vmatpush1.bf16.msra.mxu0 %v1393_v3  ;;  %1375 = vmatpush1.bf16.msra.mxu1 %v1393_v3  ;;  %s1584_s23 = scalar_lea.vmem %s1754_s4, %s1156_s19 }
  0x10   : > { %v1402_v5 = vld [vmem:[%s1510_s30 + $0x4] ss:$8 sps:$4 sm:$0xff]   ;;  %557 = vmatprep.subr.bf16.mxu0 %v1456_v1  ;;  %1367 = vmatprep.subr.bf16.mxu1 %v1456_v1  ;;  %v1400_v12 = vld [vmem:[%s1510_s30] ss:$8 sps:$4 sm:$0xff]   ;;  %v1406_v14 = vld [vmem:[%s1510_s30 + $0x14] ss:$8 sps:$4 sm:$0xff]  }
  0x11   : > { %v1405_v6 = vld [vmem:[%s1510_s30 + $0x84] ss:$8 sps:$4 sm:$0xff]   ;;  %1200 = vmatprep.mubr.msk.bf16.mxu0 %vm502_vm0, %v1402_v5  ;;  %v1403_v13 = vld [vmem:[%s1510_s30 + $0x80] ss:$8 sps:$4 sm:$0xff]   ;;  %v1408_v15 = vld [vmem:[%s1510_s30 + $0x94] ss:$8 sps:$4 sm:$0xff]  }
  0x12   : > { %1208 = vmatprep.mubr.msk.bf16.mxu1 %vm502_vm0, %v1405_v6  ;;  %v1410_v16 = vld [vmem:[%s1510_s30 + $0x10] ss:$8 sps:$4 sm:$0xff]   ;;  %v1412_v18 = vld [vmem:[%s1510_s30 + $0x24] ss:$8 sps:$4 sm:$0xff]   ;;  %v1416_v20 = vld [vmem:[%s1510_s30 + $0x20] ss:$8 sps:$4 sm:$0xff]  }
  0x13   : > { %558 = vmatpush1.bf16.msra.mxu0 %v1394_v4  ;;  %1376 = vmatpush1.bf16.msra.mxu1 %v1394_v4  ;;  %v1411_v17 = vld [vmem:[%s1510_s30 + $0x90] ss:$8 sps:$4 sm:$0xff]   ;;  %v1414_v19 = vld [vmem:[%s1510_s30 + $0xa4] ss:$8 sps:$4 sm:$0xff]   ;;  %v1417_v21 = vld [vmem:[%s1510_s30 + $0xa0] ss:$8 sps:$4 sm:$0xff]  }
  0x14   : > { %559 = vmatprep.subr.bf16.mxu0 %v1456_v1  ;;  %1368 = vmatprep.subr.bf16.mxu1 %v1456_v1  ;;  %v1418_v22 = vld [vmem:[%s1510_s30 + $0x34] ss:$8 sps:$4 sm:$0xff]   ;;  %v1422_v24 = vld [vmem:[%s1510_s30 + $0x30] ss:$8 sps:$4 sm:$0xff]   ;;  %v1424_v26 = vld [vmem:[%s1510_s30 + $0x44] ss:$8 sps:$4 sm:$0xff]  }
  0x15   : > { %v1420_v23 = vld [vmem:[%s1510_s30 + $0xb4] ss:$8 sps:$4 sm:$0xff]   ;;  %v1423_v25 = vld [vmem:[%s1510_s30 + $0xb0] ss:$8 sps:$4 sm:$0xff]   ;;  %v1426_v27 = vld [vmem:[%s1510_s30 + $0xc4] ss:$8 sps:$4 sm:$0xff]  }
  0x16   : > { %v1428_v28 = vld [vmem:[%s1510_s30 + $0x40] ss:$8 sps:$4 sm:$0xff]   ;;  %v1430_v30 = vld [vmem:[%s1510_s30 + $0x54] ss:$8 sps:$4 sm:$0xff]   ;;  %v1434_v32 = vld [vmem:[%s1510_s30 + $0x50] ss:$8 sps:$4 sm:$0xff]  }
  0x17   : > { %560 = vmatpush1.bf16.msra.mxu0 %v1395_v7  ;;  %1377 = vmatpush1.bf16.msra.mxu1 %v1395_v7  ;;  %v1429_v29 = vld [vmem:[%s1510_s30 + $0xc0] ss:$8 sps:$4 sm:$0xff]   ;;  %v1432_v31 = vld [vmem:[%s1510_s30 + $0xd4] ss:$8 sps:$4 sm:$0xff]   ;;  %v1435_v33 = vld [vmem:[%s1510_s30 + $0xd0] ss:$8 sps:$4 sm:$0xff]  }
  0x18   : > { %561 = vmatprep.subr.bf16.mxu0 %v1456_v1  ;;  %1369 = vmatprep.subr.bf16.mxu1 %v1456_v1  ;;  %v1436_v34 = vld [vmem:[%s1510_s30 + $0x64] ss:$8 sps:$4 sm:$0xff]   ;;  %v1440_v36 = vld [vmem:[%s1510_s30 + $0x60] ss:$8 sps:$4 sm:$0xff]   ;;  %v1442_v38 = vld [vmem:[%s1510_s30 + $0x74] ss:$8 sps:$4 sm:$0xff]  }
  0x19   : > { %v1438_v35 = vld [vmem:[%s1510_s30 + $0xe4] ss:$8 sps:$4 sm:$0xff]   ;;  %v1441_v37 = vld [vmem:[%s1510_s30 + $0xe0] ss:$8 sps:$4 sm:$0xff]   ;;  %v1444_v39 = vld [vmem:[%s1510_s30 + $0xf4] ss:$8 sps:$4 sm:$0xff]  }
  0x1a   : > { %v1446_v40 = vld [vmem:[%s1510_s30 + $0x70] ss:$8 sps:$4 sm:$0xff]   ;;  %v1286_v43 = vld [vmem:[%s1584_s23] sm:$0xff]   ;;  %v1349_v4 = vld [vmem:[%s1584_s23 + $0x8] sm:$0xff]  }
  0x1b   : > { %562 = vmatpush1.bf16.msra.mxu0 %v1396_v8  ;;  %1378 = vmatpush1.bf16.msra.mxu1 %v1396_v8  ;;  %v1447_v41 = vld [vmem:[%s1510_s30 + $0xf0] ss:$8 sps:$4 sm:$0xff]   ;;  %v1356_v44 = vld [vmem:[%s1584_s23 + $0x40] sm:$0xff]   ;;  %v1287_v49 = vunpack.c.l.bf16 %v1286_v43  ;;  %v1288_v55 = vunpack.c.h.bf16 %v1286_v43  ;;  %v1357_v5 = vld [vmem:[%s1584_s23 + $0x48] sm:$0xff]   ;;  %s1613_s30 = scalar_lea.vmem %s1755_s5, %s1156_s19 }
  0x1c   : > { %563 = vmatprep.subr.bf16.mxu0 %v1456_v1  ;;  %1370 = vmatprep.subr.bf16.mxu1 %v1456_v1  ;;  %v1319_v51 = vunpack.c.l.bf16 %v1356_v44  ;;  %v1320_v57 = vunpack.c.h.bf16 %v1356_v44 }
  0x1f   : > { %564 = vmatpush1.bf16.msra.mxu0 %v1397_v9  ;;  %1379 = vmatpush1.bf16.msra.mxu1 %v1397_v9 }
  0x20   : > { %565 = vmatprep.subr.bf16.mxu0 %v1456_v1  ;;  %1371 = vmatprep.subr.bf16.mxu1 %v1456_v1 }
  0x23   : > { %566 = vmatpush1.bf16.msra.mxu0 %v1398_v10  ;;  %1380 = vmatpush1.bf16.msra.mxu1 %v1398_v10 }
  0x24   : > { %567 = vmatprep.subr.bf16.mxu0 %v1456_v1  ;;  %1372 = vmatprep.subr.bf16.mxu1 %v1456_v1 }
  0x27   : > { %568 = vmatpush1.bf16.msra.mxu0 %v1399_v11  ;;  %1381 = vmatpush1.bf16.msra.mxu1 %v1399_v11  ;;  %v1291_v11 = vunpack.c.l.bf16 %v1349_v4 }
  0x2a   : > { %584 = vmatmul.mubr.bf16.vlgmr.msra.gmra.mrb[0].mxu0 %v1400_v12  ;;  %648 = vmatmul.mubr.bf16.vlgmr.msra.gmra.mrb[0].mxu1 %v1403_v13  ;;  %v1323_v13 = vunpack.c.l.bf16 %v1357_v5 }
  0x2b   : > { %1201 = vmatprep.mubr.msk.bf16.mxu0 %vm502_vm0, %v1406_v14  ;;  %1209 = vmatprep.mubr.msk.bf16.mxu1 %vm502_vm0, %v1408_v15 }
  0x32   : > { %592 = vmatmul.mubr.bf16.gmra.mrb[4].mxu0 %v1410_v16  ;;  %656 = vmatmul.mubr.bf16.gmra.mrb[4].mxu1 %v1411_v17 }
  0x33   : > { %1202 = vmatprep.mubr.msk.bf16.mxu0 %vm502_vm0, %v1412_v18  ;;  %1210 = vmatprep.mubr.msk.bf16.mxu1 %vm502_vm0, %v1414_v19 }
  0x3a   : > { %600 = vmatmul.mubr.bf16.gmra.mrb[8].mxu0 %v1416_v20  ;;  %664 = vmatmul.mubr.bf16.gmra.mrb[8].mxu1 %v1417_v21 }
  0x3b   : > { %1203 = vmatprep.mubr.msk.bf16.mxu0 %vm502_vm0, %v1418_v22  ;;  %1211 = vmatprep.mubr.msk.bf16.mxu1 %vm502_vm0, %v1420_v23  ;;  %v1292_v23 = vunpack.c.h.bf16 %v1349_v4 }
  0x42   : > { %608 = vmatmul.mubr.bf16.gmra.mrb[12].mxu0 %v1422_v24  ;;  %672 = vmatmul.mubr.bf16.gmra.mrb[12].mxu1 %v1423_v25  ;;  %v1324_v25 = vunpack.c.h.bf16 %v1357_v5 }
  0x43   : > { %1204 = vmatprep.mubr.msk.bf16.mxu0 %vm502_vm0, %v1424_v26  ;;  %1212 = vmatprep.mubr.msk.bf16.mxu1 %vm502_vm0, %v1426_v27 }
  0x4a   : > { %616 = vmatmul.mubr.bf16.gmra.mrb[16].mxu0 %v1428_v28  ;;  %680 = vmatmul.mubr.bf16.gmra.mrb[16].mxu1 %v1429_v29 }
  0x4b   : > { %1205 = vmatprep.mubr.msk.bf16.mxu0 %vm502_vm0, %v1430_v30  ;;  %1213 = vmatprep.mubr.msk.bf16.mxu1 %vm502_vm0, %v1432_v31 }
  0x52   : > { %624 = vmatmul.mubr.bf16.gmra.mrb[20].mxu0 %v1434_v32  ;;  %688 = vmatmul.mubr.bf16.gmra.mrb[20].mxu1 %v1435_v33 }
  0x53   : > { %1206 = vmatprep.mubr.msk.bf16.mxu0 %vm502_vm0, %v1436_v34  ;;  %1214 = vmatprep.mubr.msk.bf16.mxu1 %vm502_vm0, %v1438_v35 }
  0x5a   : > { %632 = vmatmul.mubr.bf16.gmra.mrb[24].mxu0 %v1440_v36  ;;  %696 = vmatmul.mubr.bf16.gmra.mrb[24].mxu1 %v1441_v37  ;;  %v1350_v36 = vld [vmem:[%s1584_s23 + $0x10] sm:$0xff]  }
  0x5b   : > { %1207 = vmatprep.mubr.msk.bf16.mxu0 %vm502_vm0, %v1442_v38  ;;  %1215 = vmatprep.mubr.msk.bf16.mxu1 %vm502_vm0, %v1444_v39  ;;  %v1358_v37 = vld [vmem:[%s1584_s23 + $0x50] sm:$0xff]  }
  0x5c   : > { %v1328_v5 = vunpack.c.h.bf16 %v1358_v37 }
  0x62   : > { %640 = vmatmul.mubr.bf16.gmra.mrb[28].mxu0 %v1446_v40  ;;  %704 = vmatmul.mubr.bf16.gmra.mrb[28].mxu1 %v1447_v41 }
  0xfd   : > { %v585_v45 = vpop.f32.mrb[0].mxu0  ;;  %v649_v47 = vpop.f32.mrb[0].mxu1 }
  0xfe   : > { %v719_v48 = vmul.f32 %v1589_v42, %v585_v45  ;;  %v735_v50 = vmul.f32 %v1589_v42, %v649_v47  ;;  %v587_v52 = vpop.f32.mrb[1].mxu0  ;;  %v651_v53 = vpop.f32.mrb[1].mxu1  ;;  %v1295_v47 = vunpack.c.l.bf16 %v1350_v36 }
  0xff   : > { %v588_v54 = vpop.f32.mrb[2].mxu0  ;;  %v652_v56 = vpop.f32.mrb[2].mxu1 }
 0x100   : > { %v758_v58 = vadd.f32 %v1596_v46, %v719_v48  ;;  %v774_v59 = vadd.f32 %v1596_v46, %v735_v50  ;;  %v720_v60 = vmul.f32 %v1589_v42, %v588_v54  ;;  %v736_v61 = vmul.f32 %v1589_v42, %v652_v56  ;;  %v590_v62 = vpop.f32.mrb[3].mxu0  ;;  %v654_v63 = vpop.f32.mrb[3].mxu1 }
 0x102   : > { %v854_v0 = vadd.f32 %v1287_v49, %v758_v58  ;;  %v870_v1 = vadd.f32 %v1319_v51, %v774_v59  ;;  %v759_v2 = vadd.f32 %v1596_v46, %v720_v60  ;;  %v775_v3 = vadd.f32 %v1596_v46, %v736_v61 }
 0x103   : > { %v1327_v49 = vunpack.c.l.bf16 %v1358_v37 }
 0x104   : > { %v886_v6 = vmax.f32 %v854_v0, 0.0  ;;  %v902_v7 = vmax.f32 %v870_v1, 0.0  ;;  %v855_v8 = vadd.f32 %v1288_v55, %v759_v2  ;;  %v871_v9 = vadd.f32 %v1320_v57, %v775_v3 }
 0x105   : > { %v593_v10 = vpop.f32.mrb[4].mxu0  ;;  %v657_v12 = vpop.f32.mrb[4].mxu1  ;;  %v1296_v3 = vunpack.c.h.bf16 %v1350_v36 }
 0x106   : > { %v1253_v14 = vpack.c.bf16 %v886_v6, %v886_v6  ;;  %v1269_v15 = vpack.c.bf16 %v902_v7, %v902_v7  ;;  %v887_v16 = vmax.f32 %v855_v8, 0.0  ;;  %v903_v17 = vmax.f32 %v871_v9, 0.0  ;;  %v595_v18 = vpop.f32.mrb[5].mxu0  ;;  %v659_v19 = vpop.f32.mrb[5].mxu1  ;;  %v1351_v8 = vld [vmem:[%s1584_s23 + $0x18] sm:$0xff]  }
 0x107   : > { %v721_v20 = vmul.f32 %v1589_v42, %v593_v10  ;;  %v737_v21 = vmul.f32 %v1589_v42, %v657_v12  ;;  %v596_v22 = vpop.f32.mrb[6].mxu0  ;;  %v660_v24 = vpop.f32.mrb[6].mxu1  ;;  %v1359_v9 = vld [vmem:[%s1584_s23 + $0x58] sm:$0xff]  }
 0x108   : > { %1047 = vst.msk [vmem:[%s1613_s30] sm:$0xf] %vm1046_vm1, %v1253_v14  ;;  %1063 = vst.msk [vmem:[%s1613_s30 + $0x40] sm:$0xf] %vm1046_vm1, %v1269_v15  ;;  %v1254_v26 = vpack.c.bf16 %v887_v16, %v887_v16  ;;  %v1270_v27 = vpack.c.bf16 %v903_v17, %v903_v17  ;;  %v722_v28 = vmul.f32 %v1589_v42, %v596_v22  ;;  %v598_v30 = vpop.f32.mrb[7].mxu0  ;;  %v662_v31 = vpop.f32.mrb[7].mxu1  ;;  %v1299_v17 = vunpack.c.l.bf16 %v1351_v8 }
 0x109   : > { %v738_v29 = vmul.f32 %v1589_v42, %v660_v24  ;;  %v760_v32 = vadd.f32 %v1596_v46, %v721_v20  ;;  %v776_v33 = vadd.f32 %v1596_v46, %v737_v21  ;;  %v1331_v19 = vunpack.c.l.bf16 %v1359_v9 }
 0x10a   : > { %1048 = vst.msk [vmem:[%s1613_s30 + $0x4] sm:$0xf] %vm1046_vm1, %v1254_v26  ;;  %1064 = vst.msk [vmem:[%s1613_s30 + $0x44] sm:$0xf] %vm1046_vm1, %v1270_v27  ;;  %v761_v34 = vadd.f32 %v1596_v46, %v722_v28  ;;  %v1332_v31 = vunpack.c.h.bf16 %v1359_v9 }
 0x10b   : > { %v777_v35 = vadd.f32 %v1596_v46, %v738_v29  ;;  %v856_v38 = vadd.f32 %v1291_v11, %v760_v32  ;;  %v872_v39 = vadd.f32 %v1323_v13, %v776_v33  ;;  %v1300_v29 = vunpack.c.h.bf16 %v1351_v8 }
 0x10c   : > { %v857_v40 = vadd.f32 %v1292_v23, %v761_v34 }
 0x10d   : > { %v873_v41 = vadd.f32 %v1324_v25, %v777_v35  ;;  %v888_v43 = vmax.f32 %v856_v38, 0.0  ;;  %v904_v44 = vmax.f32 %v872_v39, 0.0  ;;  %v601_v45 = vpop.f32.mrb[8].mxu0  ;;  %v665_v48 = vpop.f32.mrb[8].mxu1 }
 0x10e   : > { %v889_v50 = vmax.f32 %v857_v40, 0.0  ;;  %v723_v52 = vmul.f32 %v1589_v42, %v601_v45  ;;  %v739_v53 = vmul.f32 %v1589_v42, %v665_v48  ;;  %v603_v54 = vpop.f32.mrb[9].mxu0  ;;  %v667_v55 = vpop.f32.mrb[9].mxu1  ;;  %v1352_v45 = vld [vmem:[%s1584_s23 + $0x20] sm:$0xff]  }
 0x10f   : > { %v905_v51 = vmax.f32 %v873_v41, 0.0  ;;  %v1255_v56 = vpack.c.bf16 %v888_v43, %v888_v43  ;;  %v1271_v57 = vpack.c.bf16 %v904_v44, %v904_v44  ;;  %v604_v58 = vpop.f32.mrb[10].mxu0  ;;  %v668_v59 = vpop.f32.mrb[10].mxu1 }
 0x110   : > { %v1256_v60 = vpack.c.bf16 %v889_v50, %v889_v50  ;;  %v762_v62 = vadd.f32 %v1596_v46, %v723_v52  ;;  %v778_v63 = vadd.f32 %v1596_v46, %v739_v53  ;;  %v606_v0 = vpop.f32.mrb[11].mxu0  ;;  %v670_v1 = vpop.f32.mrb[11].mxu1  ;;  %v724_v2 = vmul.f32 %v1589_v42, %v604_v58 }
 0x111   : > { %v1272_v61 = vpack.c.bf16 %v905_v51, %v905_v51  ;;  %1049 = vst.msk [vmem:[%s1613_s30 + $0x8] sm:$0xf] %vm1046_vm1, %v1255_v56  ;;  %1065 = vst.msk [vmem:[%s1613_s30 + $0x48] sm:$0xf] %vm1046_vm1, %v1271_v57  ;;  %v740_v4 = vmul.f32 %v1589_v42, %v668_v59  ;;  %v1303_v53 = vunpack.c.l.bf16 %v1352_v45  ;;  %v1304_v1 = vunpack.c.h.bf16 %v1352_v45 }
 0x112   : > { %1050 = vst.msk [vmem:[%s1613_s30 + $0xc] sm:$0xf] %vm1046_vm1, %v1256_v60  ;;  %v858_v6 = vadd.f32 %v1295_v47, %v762_v62  ;;  %v874_v7 = vadd.f32 %v1327_v49, %v778_v63  ;;  %v763_v10 = vadd.f32 %v1596_v46, %v724_v2  ;;  %v1360_v47 = vld [vmem:[%s1584_s23 + $0x60] sm:$0xff]  }
 0x113   : > { %1066 = vst.msk [vmem:[%s1613_s30 + $0x4c] sm:$0xf] %vm1046_vm1, %v1272_v61  ;;  %v779_v11 = vadd.f32 %v1596_v46, %v740_v4  ;;  %v1335_v55 = vunpack.c.l.bf16 %v1360_v47 }
 0x114   : > { %v890_v12 = vmax.f32 %v858_v6, 0.0  ;;  %v906_v13 = vmax.f32 %v874_v7, 0.0  ;;  %v859_v14 = vadd.f32 %v1296_v3, %v763_v10  ;;  %v1336_v3 = vunpack.c.h.bf16 %v1360_v47 }
 0x115   : > { %v875_v15 = vadd.f32 %v1328_v5, %v779_v11  ;;  %v609_v16 = vpop.f32.mrb[12].mxu0  ;;  %v673_v18 = vpop.f32.mrb[12].mxu1 }
 0x116   : > { %v1257_v20 = vpack.c.bf16 %v890_v12, %v890_v12  ;;  %v1273_v21 = vpack.c.bf16 %v906_v13, %v906_v13  ;;  %v725_v22 = vmul.f32 %v1589_v42, %v609_v16  ;;  %v741_v23 = vmul.f32 %v1589_v42, %v673_v18  ;;  %v611_v24 = vpop.f32.mrb[13].mxu0  ;;  %v675_v25 = vpop.f32.mrb[13].mxu1 }
 0x117   : > { %v891_v26 = vmax.f32 %v859_v14, 0.0  ;;  %v907_v27 = vmax.f32 %v875_v15, 0.0  ;;  %v612_v28 = vpop.f32.mrb[14].mxu0  ;;  %v676_v30 = vpop.f32.mrb[14].mxu1  ;;  %v1353_v14 = vld [vmem:[%s1584_s23 + $0x28] sm:$0xff]  }
 0x118   : > { %1051 = vst.msk [vmem:[%s1613_s30 + $0x10] sm:$0xf] %vm1046_vm1, %v1257_v20  ;;  %1067 = vst.msk [vmem:[%s1613_s30 + $0x50] sm:$0xf] %vm1046_vm1, %v1273_v21  ;;  %v764_v32 = vadd.f32 %v1596_v46, %v725_v22  ;;  %v780_v33 = vadd.f32 %v1596_v46, %v741_v23  ;;  %v726_v34 = vmul.f32 %v1589_v42, %v612_v28  ;;  %v614_v36 = vpop.f32.mrb[15].mxu0  ;;  %v678_v37 = vpop.f32.mrb[15].mxu1  ;;  %v1307_v23 = vunpack.c.l.bf16 %v1353_v14 }
 0x119   : > { %v742_v35 = vmul.f32 %v1589_v42, %v676_v30  ;;  %v1258_v38 = vpack.c.bf16 %v891_v26, %v891_v26  ;;  %v1274_v39 = vpack.c.bf16 %v907_v27, %v907_v27  ;;  %v1361_v15 = vld [vmem:[%s1584_s23 + $0x68] sm:$0xff]  }
 0x11a   : > { %v860_v40 = vadd.f32 %v1299_v17, %v764_v32  ;;  %v876_v41 = vadd.f32 %v1331_v19, %v780_v33  ;;  %v765_v43 = vadd.f32 %v1596_v46, %v726_v34  ;;  %v1339_v25 = vunpack.c.l.bf16 %v1361_v15 }
 0x11b   : > { %v781_v44 = vadd.f32 %v1596_v46, %v742_v35  ;;  %1052 = vst.msk [vmem:[%s1613_s30 + $0x14] sm:$0xf] %vm1046_vm1, %v1258_v38  ;;  %1068 = vst.msk [vmem:[%s1613_s30 + $0x54] sm:$0xf] %vm1046_vm1, %v1274_v39  ;;  %v1340_v47 = vunpack.c.h.bf16 %v1361_v15 }
 0x11c   : > { %v892_v48 = vmax.f32 %v860_v40, 0.0  ;;  %v908_v49 = vmax.f32 %v876_v41, 0.0  ;;  %v861_v50 = vadd.f32 %v1300_v29, %v765_v43 }
 0x11d   : > { %v877_v51 = vadd.f32 %v1332_v31, %v781_v44  ;;  %v617_v52 = vpop.f32.mrb[16].mxu0  ;;  %v681_v54 = vpop.f32.mrb[16].mxu1  ;;  %v1308_v44 = vunpack.c.h.bf16 %v1353_v14 }
 0x11e   : > { %v1259_v56 = vpack.c.bf16 %v892_v48, %v892_v48  ;;  %v1275_v57 = vpack.c.bf16 %v908_v49, %v908_v49  ;;  %v893_v58 = vmax.f32 %v861_v50, 0.0  ;;  %v619_v60 = vpop.f32.mrb[17].mxu0  ;;  %v683_v61 = vpop.f32.mrb[17].mxu1  ;;  %v727_v62 = vmul.f32 %v1589_v42, %v617_v52  ;;  %v1354_v50 = vld [vmem:[%s1584_s23 + $0x30] sm:$0xff]  }
 0x11f   : > { %v909_v59 = vmax.f32 %v877_v51, 0.0  ;;  %v743_v63 = vmul.f32 %v1589_v42, %v681_v54  ;;  %v620_v0 = vpop.f32.mrb[18].mxu0  ;;  %v684_v2 = vpop.f32.mrb[18].mxu1  ;;  %v1362_v51 = vld [vmem:[%s1584_s23 + $0x70] sm:$0xff]  }
 0x120   : > { %1053 = vst.msk [vmem:[%s1613_s30 + $0x18] sm:$0xf] %vm1046_vm1, %v1259_v56  ;;  %1069 = vst.msk [vmem:[%s1613_s30 + $0x58] sm:$0xf] %vm1046_vm1, %v1275_v57  ;;  %v1260_v4 = vpack.c.bf16 %v893_v58, %v893_v58  ;;  %v728_v6 = vmul.f32 %v1589_v42, %v620_v0  ;;  %v744_v7 = vmul.f32 %v1589_v42, %v684_v2  ;;  %v622_v8 = vpop.f32.mrb[19].mxu0  ;;  %v686_v9 = vpop.f32.mrb[19].mxu1  ;;  %v1343_v61 = vunpack.c.l.bf16 %v1362_v51 }
 0x121   : > { %v1276_v5 = vpack.c.bf16 %v909_v59, %v909_v59  ;;  %v766_v10 = vadd.f32 %v1596_v46, %v727_v62  ;;  %v782_v11 = vadd.f32 %v1596_v46, %v743_v63  ;;  %v1311_v59 = vunpack.c.l.bf16 %v1354_v50 }
 0x122   : > { %1054 = vst.msk [vmem:[%s1613_s30 + $0x1c] sm:$0xf] %vm1046_vm1, %v1260_v4  ;;  %v767_v12 = vadd.f32 %v1596_v46, %v728_v6  ;;  %v783_v13 = vadd.f32 %v1596_v46, %v744_v7  ;;  %v1312_v7 = vunpack.c.h.bf16 %v1354_v50  ;;  %v1344_v9 = vunpack.c.h.bf16 %v1362_v51 }
 0x123   : > { %1070 = vst.msk [vmem:[%s1613_s30 + $0x5c] sm:$0xf] %vm1046_vm1, %v1276_v5  ;;  %v862_v16 = vadd.f32 %v1303_v53, %v766_v10  ;;  %v878_v17 = vadd.f32 %v1335_v55, %v782_v11 }
 0x124   : > { %v863_v18 = vadd.f32 %v1304_v1, %v767_v12  ;;  %v879_v19 = vadd.f32 %v1336_v3, %v783_v13 }
 0x125   : > { %v894_v20 = vmax.f32 %v862_v16, 0.0  ;;  %v910_v21 = vmax.f32 %v878_v17, 0.0  ;;  %v625_v22 = vpop.f32.mrb[20].mxu0  ;;  %v689_v24 = vpop.f32.mrb[20].mxu1 }
 0x126   : > { %v895_v26 = vmax.f32 %v863_v18, 0.0  ;;  %v911_v27 = vmax.f32 %v879_v19, 0.0  ;;  %v729_v28 = vmul.f32 %v1589_v42, %v625_v22  ;;  %v745_v29 = vmul.f32 %v1589_v42, %v689_v24  ;;  %v627_v30 = vpop.f32.mrb[21].mxu0  ;;  %v691_v31 = vpop.f32.mrb[21].mxu1  ;;  %v1355_v22 = vld [vmem:[%s1584_s23 + $0x38] sm:$0xff]  }
 0x127   : > { %v1261_v32 = vpack.c.bf16 %v894_v20, %v894_v20  ;;  %v1277_v33 = vpack.c.bf16 %v910_v21, %v910_v21  ;;  %v628_v34 = vpop.f32.mrb[22].mxu0  ;;  %v692_v35 = vpop.f32.mrb[22].mxu1 }
 0x128   : > { %v1262_v36 = vpack.c.bf16 %v895_v26, %v895_v26  ;;  %v1278_v37 = vpack.c.bf16 %v911_v27, %v911_v27  ;;  %v768_v38 = vadd.f32 %v1596_v46, %v729_v28  ;;  %v784_v39 = vadd.f32 %v1596_v46, %v745_v29  ;;  %v630_v40 = vpop.f32.mrb[23].mxu0  ;;  %v694_v41 = vpop.f32.mrb[23].mxu1 }
 0x129   : > { %1055 = vst.msk [vmem:[%s1613_s30 + $0x20] sm:$0xf] %vm1046_vm1, %v1261_v32  ;;  %1071 = vst.msk [vmem:[%s1613_s30 + $0x60] sm:$0xf] %vm1046_vm1, %v1277_v33  ;;  %v730_v43 = vmul.f32 %v1589_v42, %v628_v34  ;;  %v746_v45 = vmul.f32 %v1589_v42, %v692_v35  ;;  %v1315_v29 = vunpack.c.l.bf16 %v1355_v22  ;;  %v1316_v41 = vunpack.c.h.bf16 %v1355_v22 }
 0x12a   : > { %1056 = vst.msk [vmem:[%s1613_s30 + $0x24] sm:$0xf] %vm1046_vm1, %v1262_v36  ;;  %1072 = vst.msk [vmem:[%s1613_s30 + $0x64] sm:$0xf] %vm1046_vm1, %v1278_v37  ;;  %v864_v48 = vadd.f32 %v1307_v23, %v768_v38  ;;  %v880_v49 = vadd.f32 %v1339_v25, %v784_v39  ;;  %v1363_v23 = vld [vmem:[%s1584_s23 + $0x78] sm:$0xff]  }
 0x12b   : > { %v769_v52 = vadd.f32 %v1596_v46, %v730_v43  ;;  %v785_v53 = vadd.f32 %v1596_v46, %v746_v45  ;;  %v1347_v31 = vunpack.c.l.bf16 %v1363_v23 }
 0x12c   : > { %v896_v54 = vmax.f32 %v864_v48, 0.0  ;;  %v912_v55 = vmax.f32 %v880_v49, 0.0 }
 0x12d   : > { %v865_v56 = vadd.f32 %v1308_v44, %v769_v52  ;;  %v881_v57 = vadd.f32 %v1340_v47, %v785_v53  ;;  %v633_v58 = vpop.f32.mrb[24].mxu0  ;;  %v697_v60 = vpop.f32.mrb[24].mxu1  ;;  %v1348_v44 = vunpack.c.h.bf16 %v1363_v23 }
 0x12e   : > { %v1263_v62 = vpack.c.bf16 %v896_v54, %v896_v54  ;;  %v1279_v63 = vpack.c.bf16 %v912_v55, %v912_v55  ;;  %v731_v0 = vmul.f32 %v1589_v42, %v633_v58  ;;  %v747_v1 = vmul.f32 %v1589_v42, %v697_v60  ;;  %v635_v2 = vpop.f32.mrb[25].mxu0  ;;  %v699_v3 = vpop.f32.mrb[25].mxu1 }
 0x12f   : > { %v897_v4 = vmax.f32 %v865_v56, 0.0  ;;  %v913_v5 = vmax.f32 %v881_v57, 0.0  ;;  %v636_v6 = vpop.f32.mrb[26].mxu0  ;;  %v700_v8 = vpop.f32.mrb[26].mxu1 }
 0x130   : > { %1057 = vst.msk [vmem:[%s1613_s30 + $0x28] sm:$0xf] %vm1046_vm1, %v1263_v62  ;;  %1073 = vst.msk [vmem:[%s1613_s30 + $0x68] sm:$0xf] %vm1046_vm1, %v1279_v63  ;;  %v770_v10 = vadd.f32 %v1596_v46, %v731_v0  ;;  %v786_v11 = vadd.f32 %v1596_v46, %v747_v1  ;;  %v732_v12 = vmul.f32 %v1589_v42, %v636_v6  ;;  %v638_v14 = vpop.f32.mrb[27].mxu0  ;;  %v702_v15 = vpop.f32.mrb[27].mxu1 }
 0x131   : > { %v748_v13 = vmul.f32 %v1589_v42, %v700_v8  ;;  %v1264_v16 = vpack.c.bf16 %v897_v4, %v897_v4  ;;  %v1280_v17 = vpack.c.bf16 %v913_v5, %v913_v5 }
 0x132   : > { %v866_v18 = vadd.f32 %v1311_v59, %v770_v10  ;;  %v882_v19 = vadd.f32 %v1343_v61, %v786_v11  ;;  %v771_v20 = vadd.f32 %v1596_v46, %v732_v12 }
 0x133   : > { %v787_v21 = vadd.f32 %v1596_v46, %v748_v13  ;;  %1058 = vst.msk [vmem:[%s1613_s30 + $0x2c] sm:$0xf] %vm1046_vm1, %v1264_v16  ;;  %1074 = vst.msk [vmem:[%s1613_s30 + $0x6c] sm:$0xf] %vm1046_vm1, %v1280_v17 }
 0x134   : > { %v898_v24 = vmax.f32 %v866_v18, 0.0  ;;  %v914_v25 = vmax.f32 %v882_v19, 0.0  ;;  %v867_v26 = vadd.f32 %v1312_v7, %v771_v20 }
 0x135   : > { %v883_v27 = vadd.f32 %v1344_v9, %v787_v21  ;;  %v641_v28 = vpop.f32.mrb[28].mxu0  ;;  %v705_v30 = vpop.f32.mrb[28].mxu1 }
 0x136   : > { %v1265_v32 = vpack.c.bf16 %v898_v24, %v898_v24  ;;  %v1281_v33 = vpack.c.bf16 %v914_v25, %v914_v25  ;;  %v899_v34 = vmax.f32 %v867_v26, 0.0  ;;  %v643_v36 = vpop.f32.mrb[29].mxu0  ;;  %v707_v37 = vpop.f32.mrb[29].mxu1  ;;  %v733_v38 = vmul.f32 %v1589_v42, %v641_v28 }
 0x137   : > { %v915_v35 = vmax.f32 %v883_v27, 0.0  ;;  %v749_v39 = vmul.f32 %v1589_v42, %v705_v30  ;;  %v644_v40 = vpop.f32.mrb[30].mxu0  ;;  %v708_v43 = vpop.f32.mrb[30].mxu1 }
 0x138   : > { %1059 = vst.msk [vmem:[%s1613_s30 + $0x30] sm:$0xf] %vm1046_vm1, %v1265_v32  ;;  %1075 = vst.msk [vmem:[%s1613_s30 + $0x70] sm:$0xf] %vm1046_vm1, %v1281_v33  ;;  %v1266_v45 = vpack.c.bf16 %v899_v34, %v899_v34  ;;  %v734_v48 = vmul.f32 %v1589_v42, %v644_v40  ;;  %v750_v49 = vmul.f32 %v1589_v42, %v708_v43  ;;  %v646_v50 = vpop.f32.mrb[31].mxu0  ;;  %v710_v51 = vpop.f32.mrb[31].mxu1 }
 0x139   : > { %v1282_v47 = vpack.c.bf16 %v915_v35, %v915_v35  ;;  %v772_v52 = vadd.f32 %v1596_v46, %v733_v38  ;;  %v788_v53 = vadd.f32 %v1596_v46, %v749_v39 }
 0x13a   : > { %1060 = vst.msk [vmem:[%s1613_s30 + $0x34] sm:$0xf] %vm1046_vm1, %v1266_v45  ;;  %v773_v54 = vadd.f32 %v1596_v46, %v734_v48  ;;  %v789_v55 = vadd.f32 %v1596_v46, %v750_v49 }
 0x13b   : > { %1076 = vst.msk [vmem:[%s1613_s30 + $0x74] sm:$0xf] %vm1046_vm1, %v1282_v47  ;;  %v868_v56 = vadd.f32 %v1315_v29, %v772_v52  ;;  %v884_v42 = vadd.f32 %v1347_v31, %v788_v53 }
 0x13c   : > { %v869_v57 = vadd.f32 %v1316_v41, %v773_v54  ;;  %v885_v58 = vadd.f32 %v1348_v44, %v789_v55 }
 0x13d   : > { %v900_v59 = vmax.f32 %v868_v56, 0.0  ;;  %v916_v60 = vmax.f32 %v884_v42, 0.0 }
 0x13e   : > { %v901_v61 = vmax.f32 %v869_v57, 0.0  ;;  %v917_v62 = vmax.f32 %v885_v58, 0.0 }
 0x13f   : > { %v1267_v63 = vpack.c.bf16 %v900_v59, %v900_v59  ;;  %v1283_v0 = vpack.c.bf16 %v916_v60, %v916_v60 }
 0x140   : > { %v1268_v1 = vpack.c.bf16 %v901_v61, %v901_v61  ;;  %v1284_v2 = vpack.c.bf16 %v917_v62, %v917_v62 }
 0x141   : > { %1061 = vst.msk [vmem:[%s1613_s30 + $0x38] sm:$0xf] %vm1046_vm1, %v1267_v63  ;;  %1077 = vst.msk [vmem:[%s1613_s30 + $0x78] sm:$0xf] %vm1046_vm1, %v1283_v0 }
 0x142   : > { %1062 = vst.msk [vmem:[%s1613_s30 + $0x3c] sm:$0xf] %vm1046_vm1, %v1268_v1  ;;  %1078 = vst.msk [vmem:[%s1613_s30 + $0x7c] sm:$0xf] %vm1046_vm1, %v1284_v2 }
 0x143 PF: > { %s15_s18 = sadd.s32 1, %s1454_s18  }
 0x144   : > { %p12_p4 = scmp.ge.s32.totalorder %s15_s18, 10  }
 0x146   :  { %14 = sbr.rel (!%p12_p4) target bundleno = 1 (0x1), region = 73 }

// kernel: _lambda_.11
= control target key start
LH: loop header
LB: loop body
LE: loop exit
PB: predicated region body
PF: predicated region fallthrough
CT: control target
= control target key end

     0   :  { %s1244_s15 = smov 0   ;;  %s1482_s0 = inlined_call_operand.vmem [shape: bf16[512,144], index: 0, kind: input, shape index: {}]   ;;  %s1483_s1 = inlined_call_operand.vmem [shape: bf16[144,32], index: 1, kind: input, shape index: {}]   ;;  %s1484_s2 = inlined_call_operand.vmem [shape: f32[1,32], index: 2, kind: input, shape index: {}]   ;;  %s1485_s3 = inlined_call_operand.vmem [shape: f32[1,32], index: 3, kind: input, shape index: {}]   ;;  %s1486_s4 = inlined_call_operand.vmem [shape: bf16[512,32], index: 4, kind: output, shape index: {}]  }
   0x1 LB: > { %s990_s16 = sadd.s32 4294967295, %s1216_s15   ;;  %p994_p0 = scmp.ge.s32.totalorder %s1216_s15, 1  ;;  %s1216_s15 = sphi %s1244_s15, %s14_s15  }
   0x2   : > { %p164_p1 = scmp.lt.s32.totalorder %s1216_s15, 3 }
   0x4   : > { %p165_p2 = pnand %p994_p0, %p164_p1 }
   0x5   : > { %v1153_v0 = vld [vmem:[%s1483_s1] sm:$0xff] (!%p165_p2)   ;;  %v1218_v1 = vmov (!%p165_p2), 0   ;;  %s995_s19 = sshll.u32 (!%p165_p2), %s990_s16, 5  ;;  %v1154_v2 = vld [vmem:[%s1483_s1 + $0x8] sm:$0xff] (!%p165_p2)   ;;  %v1155_v3 = vld [vmem:[%s1483_s1 + $0x10] sm:$0xff] (!%p165_p2)   ;;  %vm453_vm0 = vcmask (!%p165_p2), 130048  }
   0x6   : > { %168 = sbr.rel (%p165_p2) target bundleno = 321 (0x141), region = 36  ;;  %502 = vmatprep.subr.bf16.mxu0 (!%p165_p2), %v1218_v1  ;;  %1126 = vmatprep.subr.bf16.mxu1 (!%p165_p2), %v1218_v1  ;;  %p192_p3 = scmp.lt.s32.totalorder (!%p165_p2), %s995_s19, 63  ;;  %v1156_v4 = vld [vmem:[%s1483_s1 + $0x18] sm:$0xff] (!%p165_p2)   ;;  %v1157_v7 = vld [vmem:[%s1483_s1 + $0x20] sm:$0xff] (!%p165_p2)   ;;  %v1158_v8 = vld [vmem:[%s1483_s1 + $0x28] sm:$0xff] (!%p165_p2)   ;;  %vm901_vm1 = vcmask (!%p165_p2), 257024  }
   0x7   : > { %503 = vmatpush1.bf16.msra.mxu0 (!%p165_p2), %v1153_v0  ;;  %1135 = vmatpush1.bf16.msra.mxu1 (!%p165_p2), %v1153_v0  ;;  %v1159_v9 = vld [vmem:[%s1483_s1 + $0x30] sm:$0xff] (!%p165_p2)   ;;  %v1160_v10 = vld [vmem:[%s1483_s1 + $0x38] sm:$0xff] (!%p165_p2)   ;;  %v1161_v11 = vld [vmem:[%s1483_s1 + $0x40] sm:$0xff] (!%p165_p2)  }
   0x8   : > { %504 = vmatprep.subr.bf16.mxu0 (!%p165_p2), %v1218_v1  ;;  %1127 = vmatprep.subr.bf16.mxu1 (!%p165_p2), %v1218_v1  ;;  %v1338_v42 = vld [vmem:[%s1484_s2] ss:$0 sm:$0xff] (!%p165_p2) }
   0x9   : > { %v1343_v44 = vld [vmem:[%s1485_s3] ss:$0 sm:$0xff] (!%p165_p2) }
   0xb   : > { %505 = vmatpush1.bf16.msra.mxu0 (!%p165_p2), %v1154_v2  ;;  %1136 = vmatpush1.bf16.msra.mxu1 (!%p165_p2), %v1154_v2 }
   0xc   : > { %506 = vmatprep.subr.bf16.mxu0 (!%p165_p2), %v1218_v1  ;;  %1128 = vmatprep.subr.bf16.mxu1 (!%p165_p2), %v1218_v1 }
   0xd   : > { %s1488_s19 = smov (!%p192_p3, %s995_s19), 63 }
   0xe   : > { %s1093_s24 = sshll.u32 %s1488_s19, 3  ;;  %s999_s20 = sshll.u32 %s1488_s19, 2 }
   0xf   : > { %s1267_s27 = scalar_lea.vmem %s1482_s0, %s1093_s24  ;;  %507 = vmatpush1.bf16.msra.mxu0 %v1155_v3  ;;  %1137 = vmatpush1.bf16.msra.mxu1 %v1155_v3  ;;  %s1357_s19 = scalar_lea.vmem %s1486_s4, %s999_s20 }
  0x10   : > { %v1164_v5 = vld [vmem:[%s1267_s27 + $0x4] ss:$8 sps:$4 sm:$0xff]   ;;  %508 = vmatprep.subr.bf16.mxu0 %v1218_v1  ;;  %1129 = vmatprep.subr.bf16.mxu1 %v1218_v1  ;;  %v1162_v12 = vld [vmem:[%s1267_s27] ss:$8 sps:$4 sm:$0xff]   ;;  %v1168_v14 = vld [vmem:[%s1267_s27 + $0x14] ss:$8 sps:$4 sm:$0xff]  }
  0x11   : > { %v1167_v6 = vld [vmem:[%s1267_s27 + $0x84] ss:$8 sps:$4 sm:$0xff]   ;;  %1041 = vmatprep.mubr.msk.bf16.mxu0 %vm453_vm0, %v1164_v5  ;;  %v1165_v13 = vld [vmem:[%s1267_s27 + $0x80] ss:$8 sps:$4 sm:$0xff]   ;;  %v1170_v15 = vld [vmem:[%s1267_s27 + $0x94] ss:$8 sps:$4 sm:$0xff]  }
  0x12   : > { %1049 = vmatprep.mubr.msk.bf16.mxu1 %vm453_vm0, %v1167_v6  ;;  %v1172_v16 = vld [vmem:[%s1267_s27 + $0x10] ss:$8 sps:$4 sm:$0xff]   ;;  %v1174_v18 = vld [vmem:[%s1267_s27 + $0x24] ss:$8 sps:$4 sm:$0xff]   ;;  %v1178_v20 = vld [vmem:[%s1267_s27 + $0x20] ss:$8 sps:$4 sm:$0xff]  }
  0x13   : > { %509 = vmatpush1.bf16.msra.mxu0 %v1156_v4  ;;  %1138 = vmatpush1.bf16.msra.mxu1 %v1156_v4  ;;  %v1173_v17 = vld [vmem:[%s1267_s27 + $0x90] ss:$8 sps:$4 sm:$0xff]   ;;  %v1176_v19 = vld [vmem:[%s1267_s27 + $0xa4] ss:$8 sps:$4 sm:$0xff]   ;;  %v1179_v21 = vld [vmem:[%s1267_s27 + $0xa0] ss:$8 sps:$4 sm:$0xff]  }
  0x14   : > { %510 = vmatprep.subr.bf16.mxu0 %v1218_v1  ;;  %1130 = vmatprep.subr.bf16.mxu1 %v1218_v1  ;;  %v1180_v22 = vld [vmem:[%s1267_s27 + $0x34] ss:$8 sps:$4 sm:$0xff]   ;;  %v1184_v24 = vld [vmem:[%s1267_s27 + $0x30] ss:$8 sps:$4 sm:$0xff]   ;;  %v1186_v26 = vld [vmem:[%s1267_s27 + $0x44] ss:$8 sps:$4 sm:$0xff]  }
  0x15   : > { %v1182_v23 = vld [vmem:[%s1267_s27 + $0xb4] ss:$8 sps:$4 sm:$0xff]   ;;  %v1185_v25 = vld [vmem:[%s1267_s27 + $0xb0] ss:$8 sps:$4 sm:$0xff]   ;;  %v1188_v27 = vld [vmem:[%s1267_s27 + $0xc4] ss:$8 sps:$4 sm:$0xff]  }
  0x16   : > { %v1190_v28 = vld [vmem:[%s1267_s27 + $0x40] ss:$8 sps:$4 sm:$0xff]   ;;  %v1192_v30 = vld [vmem:[%s1267_s27 + $0x54] ss:$8 sps:$4 sm:$0xff]   ;;  %v1196_v32 = vld [vmem:[%s1267_s27 + $0x50] ss:$8 sps:$4 sm:$0xff]  }
  0x17   : > { %511 = vmatpush1.bf16.msra.mxu0 %v1157_v7  ;;  %1139 = vmatpush1.bf16.msra.mxu1 %v1157_v7  ;;  %v1191_v29 = vld [vmem:[%s1267_s27 + $0xc0] ss:$8 sps:$4 sm:$0xff]   ;;  %v1194_v31 = vld [vmem:[%s1267_s27 + $0xd4] ss:$8 sps:$4 sm:$0xff]   ;;  %v1197_v33 = vld [vmem:[%s1267_s27 + $0xd0] ss:$8 sps:$4 sm:$0xff]  }
  0x18   : > { %512 = vmatprep.subr.bf16.mxu0 %v1218_v1  ;;  %1131 = vmatprep.subr.bf16.mxu1 %v1218_v1  ;;  %v1198_v34 = vld [vmem:[%s1267_s27 + $0x64] ss:$8 sps:$4 sm:$0xff]   ;;  %v1202_v36 = vld [vmem:[%s1267_s27 + $0x60] ss:$8 sps:$4 sm:$0xff]   ;;  %v1204_v38 = vld [vmem:[%s1267_s27 + $0x74] ss:$8 sps:$4 sm:$0xff]  }
  0x19   : > { %v1200_v35 = vld [vmem:[%s1267_s27 + $0xe4] ss:$8 sps:$4 sm:$0xff]   ;;  %v1203_v37 = vld [vmem:[%s1267_s27 + $0xe0] ss:$8 sps:$4 sm:$0xff]   ;;  %v1206_v39 = vld [vmem:[%s1267_s27 + $0xf4] ss:$8 sps:$4 sm:$0xff]  }
  0x1a   : > { %v1208_v40 = vld [vmem:[%s1267_s27 + $0x70] ss:$8 sps:$4 sm:$0xff]  }
  0x1b   : > { %513 = vmatpush1.bf16.msra.mxu0 %v1158_v8  ;;  %1140 = vmatpush1.bf16.msra.mxu1 %v1158_v8  ;;  %v1209_v41 = vld [vmem:[%s1267_s27 + $0xf0] ss:$8 sps:$4 sm:$0xff]  }
  0x1c   : > { %514 = vmatprep.subr.bf16.mxu0 %v1218_v1  ;;  %1132 = vmatprep.subr.bf16.mxu1 %v1218_v1 }
  0x1f   : > { %515 = vmatpush1.bf16.msra.mxu0 %v1159_v9  ;;  %1141 = vmatpush1.bf16.msra.mxu1 %v1159_v9 }
  0x20   : > { %516 = vmatprep.subr.bf16.mxu0 %v1218_v1  ;;  %1133 = vmatprep.subr.bf16.mxu1 %v1218_v1 }
  0x23   : > { %517 = vmatpush1.bf16.msra.mxu0 %v1160_v10  ;;  %1142 = vmatpush1.bf16.msra.mxu1 %v1160_v10 }
  0x24   : > { %518 = vmatprep.subr.bf16.mxu0 %v1218_v1  ;;  %1134 = vmatprep.subr.bf16.mxu1 %v1218_v1 }
  0x27   : > { %519 = vmatpush1.bf16.msra.mxu0 %v1161_v11  ;;  %1143 = vmatpush1.bf16.msra.mxu1 %v1161_v11 }
  0x2a   : > { %535 = vmatmul.mubr.bf16.vlgmr.msra.gmra.mrb[0].mxu0 %v1162_v12  ;;  %599 = vmatmul.mubr.bf16.vlgmr.msra.gmra.mrb[0].mxu1 %v1165_v13 }
  0x2b   : > { %1042 = vmatprep.mubr.msk.bf16.mxu0 %vm453_vm0, %v1168_v14  ;;  %1050 = vmatprep.mubr.msk.bf16.mxu1 %vm453_vm0, %v1170_v15 }
  0x32   : > { %543 = vmatmul.mubr.bf16.gmra.mrb[4].mxu0 %v1172_v16  ;;  %607 = vmatmul.mubr.bf16.gmra.mrb[4].mxu1 %v1173_v17 }
  0x33   : > { %1043 = vmatprep.mubr.msk.bf16.mxu0 %vm453_vm0, %v1174_v18  ;;  %1051 = vmatprep.mubr.msk.bf16.mxu1 %vm453_vm0, %v1176_v19 }
  0x3a   : > { %551 = vmatmul.mubr.bf16.gmra.mrb[8].mxu0 %v1178_v20  ;;  %615 = vmatmul.mubr.bf16.gmra.mrb[8].mxu1 %v1179_v21 }
  0x3b   : > { %1044 = vmatprep.mubr.msk.bf16.mxu0 %vm453_vm0, %v1180_v22  ;;  %1052 = vmatprep.mubr.msk.bf16.mxu1 %vm453_vm0, %v1182_v23 }
  0x42   : > { %559 = vmatmul.mubr.bf16.gmra.mrb[12].mxu0 %v1184_v24  ;;  %623 = vmatmul.mubr.bf16.gmra.mrb[12].mxu1 %v1185_v25 }
  0x43   : > { %1045 = vmatprep.mubr.msk.bf16.mxu0 %vm453_vm0, %v1186_v26  ;;  %1053 = vmatprep.mubr.msk.bf16.mxu1 %vm453_vm0, %v1188_v27 }
  0x4a   : > { %567 = vmatmul.mubr.bf16.gmra.mrb[16].mxu0 %v1190_v28  ;;  %631 = vmatmul.mubr.bf16.gmra.mrb[16].mxu1 %v1191_v29 }
  0x4b   : > { %1046 = vmatprep.mubr.msk.bf16.mxu0 %vm453_vm0, %v1192_v30  ;;  %1054 = vmatprep.mubr.msk.bf16.mxu1 %vm453_vm0, %v1194_v31 }
  0x52   : > { %575 = vmatmul.mubr.bf16.gmra.mrb[20].mxu0 %v1196_v32  ;;  %639 = vmatmul.mubr.bf16.gmra.mrb[20].mxu1 %v1197_v33 }
  0x53   : > { %1047 = vmatprep.mubr.msk.bf16.mxu0 %vm453_vm0, %v1198_v34  ;;  %1055 = vmatprep.mubr.msk.bf16.mxu1 %vm453_vm0, %v1200_v35 }
  0x5a   : > { %583 = vmatmul.mubr.bf16.gmra.mrb[24].mxu0 %v1202_v36  ;;  %647 = vmatmul.mubr.bf16.gmra.mrb[24].mxu1 %v1203_v37 }
  0x5b   : > { %1048 = vmatprep.mubr.msk.bf16.mxu0 %vm453_vm0, %v1204_v38  ;;  %1056 = vmatprep.mubr.msk.bf16.mxu1 %vm453_vm0, %v1206_v39 }
  0x62   : > { %591 = vmatmul.mubr.bf16.gmra.mrb[28].mxu0 %v1208_v40  ;;  %655 = vmatmul.mubr.bf16.gmra.mrb[28].mxu1 %v1209_v41 }
  0xfd   : > { %v536_v43 = vpop.f32.mrb[0].mxu0  ;;  %v600_v45 = vpop.f32.mrb[0].mxu1 }
  0xfe   : > { %v670_v46 = vmul.f32 %v1338_v42, %v536_v43  ;;  %v686_v47 = vmul.f32 %v1338_v42, %v600_v45  ;;  %v538_v48 = vpop.f32.mrb[1].mxu0  ;;  %v602_v49 = vpop.f32.mrb[1].mxu1 }
  0xff   : > { %v539_v50 = vpop.f32.mrb[2].mxu0  ;;  %v603_v51 = vpop.f32.mrb[2].mxu1 }
 0x100   : > { %v709_v52 = vadd.f32 %v1343_v44, %v670_v46  ;;  %v725_v53 = vadd.f32 %v1343_v44, %v686_v47  ;;  %v671_v54 = vmul.f32 %v1338_v42, %v539_v50  ;;  %v687_v55 = vmul.f32 %v1338_v42, %v603_v51  ;;  %v541_v56 = vpop.f32.mrb[3].mxu0  ;;  %v605_v57 = vpop.f32.mrb[3].mxu1 }
 0x102   : > { %v741_v58 = vmax.f32 %v709_v52, 0.0  ;;  %v757_v59 = vmax.f32 %v725_v53, 0.0  ;;  %v710_v60 = vadd.f32 %v1343_v44, %v671_v54  ;;  %v726_v61 = vadd.f32 %v1343_v44, %v687_v55 }
 0x104   : > { %v1094_v62 = vpack.c.bf16 %v741_v58, %v741_v58  ;;  %v1110_v63 = vpack.c.bf16 %v757_v59, %v757_v59  ;;  %v742_v0 = vmax.f32 %v710_v60, 0.0  ;;  %v758_v1 = vmax.f32 %v726_v61, 0.0 }
 0x105   : > { %v544_v2 = vpop.f32.mrb[4].mxu0  ;;  %v608_v3 = vpop.f32.mrb[4].mxu1 }
 0x106   : > { %902 = vst.msk [vmem:[%s1357_s19] sm:$0xf] %vm901_vm1, %v1094_v62  ;;  %918 = vst.msk [vmem:[%s1357_s19 + $0x40] sm:$0xf] %vm901_vm1, %v1110_v63  ;;  %v1095_v4 = vpack.c.bf16 %v742_v0, %v742_v0  ;;  %v1111_v5 = vpack.c.bf16 %v758_v1, %v758_v1  ;;  %v672_v6 = vmul.f32 %v1338_v42, %v544_v2  ;;  %v546_v8 = vpop.f32.mrb[5].mxu0  ;;  %v610_v9 = vpop.f32.mrb[5].mxu1 }
 0x107   : > { %v688_v7 = vmul.f32 %v1338_v42, %v608_v3  ;;  %v547_v10 = vpop.f32.mrb[6].mxu0  ;;  %v611_v11 = vpop.f32.mrb[6].mxu1 }
 0x108   : > { %903 = vst.msk [vmem:[%s1357_s19 + $0x4] sm:$0xf] %vm901_vm1, %v1095_v4  ;;  %919 = vst.msk [vmem:[%s1357_s19 + $0x44] sm:$0xf] %vm901_vm1, %v1111_v5  ;;  %v711_v12 = vadd.f32 %v1343_v44, %v672_v6  ;;  %v673_v14 = vmul.f32 %v1338_v42, %v547_v10  ;;  %v689_v15 = vmul.f32 %v1338_v42, %v611_v11  ;;  %v549_v16 = vpop.f32.mrb[7].mxu0  ;;  %v613_v17 = vpop.f32.mrb[7].mxu1 }
 0x109   : > { %v727_v13 = vadd.f32 %v1343_v44, %v688_v7 }
 0x10a   : > { %v743_v18 = vmax.f32 %v711_v12, 0.0  ;;  %v712_v20 = vadd.f32 %v1343_v44, %v673_v14  ;;  %v728_v21 = vadd.f32 %v1343_v44, %v689_v15 }
 0x10b   : > { %v759_v19 = vmax.f32 %v727_v13, 0.0 }
 0x10c   : > { %v1096_v22 = vpack.c.bf16 %v743_v18, %v743_v18  ;;  %v744_v24 = vmax.f32 %v712_v20, 0.0  ;;  %v760_v25 = vmax.f32 %v728_v21, 0.0 }
 0x10d   : > { %v1112_v23 = vpack.c.bf16 %v759_v19, %v759_v19  ;;  %v552_v26 = vpop.f32.mrb[8].mxu0  ;;  %v616_v27 = vpop.f32.mrb[8].mxu1 }
 0x10e   : > { %904 = vst.msk [vmem:[%s1357_s19 + $0x8] sm:$0xf] %vm901_vm1, %v1096_v22  ;;  %v1097_v28 = vpack.c.bf16 %v744_v24, %v744_v24  ;;  %v1113_v29 = vpack.c.bf16 %v760_v25, %v760_v25  ;;  %v674_v30 = vmul.f32 %v1338_v42, %v552_v26  ;;  %v690_v31 = vmul.f32 %v1338_v42, %v616_v27  ;;  %v554_v32 = vpop.f32.mrb[9].mxu0  ;;  %v618_v33 = vpop.f32.mrb[9].mxu1 }
 0x10f   : > { %920 = vst.msk [vmem:[%s1357_s19 + $0x48] sm:$0xf] %vm901_vm1, %v1112_v23  ;;  %v555_v34 = vpop.f32.mrb[10].mxu0  ;;  %v619_v35 = vpop.f32.mrb[10].mxu1 }
 0x110   : > { %905 = vst.msk [vmem:[%s1357_s19 + $0xc] sm:$0xf] %vm901_vm1, %v1097_v28  ;;  %921 = vst.msk [vmem:[%s1357_s19 + $0x4c] sm:$0xf] %vm901_vm1, %v1113_v29  ;;  %v713_v36 = vadd.f32 %v1343_v44, %v674_v30  ;;  %v729_v37 = vadd.f32 %v1343_v44, %v690_v31  ;;  %v675_v38 = vmul.f32 %v1338_v42, %v555_v34  ;;  %v557_v40 = vpop.f32.mrb[11].mxu0  ;;  %v621_v41 = vpop.f32.mrb[11].mxu1 }
 0x111   : > { %v691_v39 = vmul.f32 %v1338_v42, %v619_v35 }
 0x112   : > { %v745_v43 = vmax.f32 %v713_v36, 0.0  ;;  %v761_v45 = vmax.f32 %v729_v37, 0.0  ;;  %v714_v46 = vadd.f32 %v1343_v44, %v675_v38 }
 0x113   : > { %v730_v47 = vadd.f32 %v1343_v44, %v691_v39 }
 0x114   : > { %v1098_v48 = vpack.c.bf16 %v745_v43, %v745_v43  ;;  %v1114_v49 = vpack.c.bf16 %v761_v45, %v761_v45  ;;  %v746_v50 = vmax.f32 %v714_v46, 0.0 }
 0x115   : > { %v762_v51 = vmax.f32 %v730_v47, 0.0  ;;  %v560_v52 = vpop.f32.mrb[12].mxu0  ;;  %v624_v53 = vpop.f32.mrb[12].mxu1 }
 0x116   : > { %906 = vst.msk [vmem:[%s1357_s19 + $0x10] sm:$0xf] %vm901_vm1, %v1098_v48  ;;  %922 = vst.msk [vmem:[%s1357_s19 + $0x50] sm:$0xf] %vm901_vm1, %v1114_v49  ;;  %v1099_v54 = vpack.c.bf16 %v746_v50, %v746_v50  ;;  %v676_v56 = vmul.f32 %v1338_v42, %v560_v52  ;;  %v692_v57 = vmul.f32 %v1338_v42, %v624_v53  ;;  %v562_v58 = vpop.f32.mrb[13].mxu0  ;;  %v626_v59 = vpop.f32.mrb[13].mxu1 }
 0x117   : > { %v1115_v55 = vpack.c.bf16 %v762_v51, %v762_v51  ;;  %v563_v60 = vpop.f32.mrb[14].mxu0  ;;  %v627_v61 = vpop.f32.mrb[14].mxu1 }
 0x118   : > { %907 = vst.msk [vmem:[%s1357_s19 + $0x14] sm:$0xf] %vm901_vm1, %v1099_v54  ;;  %v715_v62 = vadd.f32 %v1343_v44, %v676_v56  ;;  %v731_v63 = vadd.f32 %v1343_v44, %v692_v57  ;;  %v677_v0 = vmul.f32 %v1338_v42, %v563_v60  ;;  %v693_v1 = vmul.f32 %v1338_v42, %v627_v61  ;;  %v565_v2 = vpop.f32.mrb[15].mxu0  ;;  %v629_v3 = vpop.f32.mrb[15].mxu1 }
 0x119   : > { %923 = vst.msk [vmem:[%s1357_s19 + $0x54] sm:$0xf] %vm901_vm1, %v1115_v55 }
 0x11a   : > { %v747_v4 = vmax.f32 %v715_v62, 0.0  ;;  %v763_v5 = vmax.f32 %v731_v63, 0.0  ;;  %v716_v6 = vadd.f32 %v1343_v44, %v677_v0  ;;  %v732_v7 = vadd.f32 %v1343_v44, %v693_v1 }
 0x11c   : > { %v1100_v8 = vpack.c.bf16 %v747_v4, %v747_v4  ;;  %v1116_v9 = vpack.c.bf16 %v763_v5, %v763_v5  ;;  %v748_v10 = vmax.f32 %v716_v6, 0.0  ;;  %v764_v11 = vmax.f32 %v732_v7, 0.0 }
 0x11d   : > { %v568_v12 = vpop.f32.mrb[16].mxu0  ;;  %v632_v13 = vpop.f32.mrb[16].mxu1 }
 0x11e   : > { %908 = vst.msk [vmem:[%s1357_s19 + $0x18] sm:$0xf] %vm901_vm1, %v1100_v8  ;;  %924 = vst.msk [vmem:[%s1357_s19 + $0x58] sm:$0xf] %vm901_vm1, %v1116_v9  ;;  %v1101_v14 = vpack.c.bf16 %v748_v10, %v748_v10  ;;  %v1117_v15 = vpack.c.bf16 %v764_v11, %v764_v11  ;;  %v678_v16 = vmul.f32 %v1338_v42, %v568_v12  ;;  %v570_v18 = vpop.f32.mrb[17].mxu0  ;;  %v634_v19 = vpop.f32.mrb[17].mxu1 }
 0x11f   : > { %v694_v17 = vmul.f32 %v1338_v42, %v632_v13  ;;  %v571_v20 = vpop.f32.mrb[18].mxu0  ;;  %v635_v21 = vpop.f32.mrb[18].mxu1 }
 0x120   : > { %909 = vst.msk [vmem:[%s1357_s19 + $0x1c] sm:$0xf] %vm901_vm1, %v1101_v14  ;;  %925 = vst.msk [vmem:[%s1357_s19 + $0x5c] sm:$0xf] %vm901_vm1, %v1117_v15  ;;  %v717_v22 = vadd.f32 %v1343_v44, %v678_v16  ;;  %v679_v24 = vmul.f32 %v1338_v42, %v571_v20  ;;  %v695_v25 = vmul.f32 %v1338_v42, %v635_v21  ;;  %v573_v26 = vpop.f32.mrb[19].mxu0  ;;  %v637_v27 = vpop.f32.mrb[19].mxu1 }
 0x121   : > { %v733_v23 = vadd.f32 %v1343_v44, %v694_v17 }
 0x122   : > { %v749_v28 = vmax.f32 %v717_v22, 0.0  ;;  %v718_v30 = vadd.f32 %v1343_v44, %v679_v24  ;;  %v734_v31 = vadd.f32 %v1343_v44, %v695_v25 }
 0x123   : > { %v765_v29 = vmax.f32 %v733_v23, 0.0 }
 0x124   : > { %v1102_v32 = vpack.c.bf16 %v749_v28, %v749_v28  ;;  %v750_v34 = vmax.f32 %v718_v30, 0.0  ;;  %v766_v35 = vmax.f32 %v734_v31, 0.0 }
 0x125   : > { %v1118_v33 = vpack.c.bf16 %v765_v29, %v765_v29  ;;  %v576_v36 = vpop.f32.mrb[20].mxu0  ;;  %v640_v37 = vpop.f32.mrb[20].mxu1 }
 0x126   : > { %910 = vst.msk [vmem:[%s1357_s19 + $0x20] sm:$0xf] %vm901_vm1, %v1102_v32  ;;  %v1103_v38 = vpack.c.bf16 %v750_v34, %v750_v34  ;;  %v1119_v39 = vpack.c.bf16 %v766_v35, %v766_v35  ;;  %v680_v40 = vmul.f32 %v1338_v42, %v576_v36  ;;  %v696_v41 = vmul.f32 %v1338_v42, %v640_v37  ;;  %v578_v43 = vpop.f32.mrb[21].mxu0  ;;  %v642_v45 = vpop.f32.mrb[21].mxu1 }
 0x127   : > { %926 = vst.msk [vmem:[%s1357_s19 + $0x60] sm:$0xf] %vm901_vm1, %v1118_v33  ;;  %v579_v46 = vpop.f32.mrb[22].mxu0  ;;  %v643_v47 = vpop.f32.mrb[22].mxu1 }
 0x128   : > { %911 = vst.msk [vmem:[%s1357_s19 + $0x24] sm:$0xf] %vm901_vm1, %v1103_v38  ;;  %927 = vst.msk [vmem:[%s1357_s19 + $0x64] sm:$0xf] %vm901_vm1, %v1119_v39  ;;  %v719_v48 = vadd.f32 %v1343_v44, %v680_v40  ;;  %v735_v49 = vadd.f32 %v1343_v44, %v696_v41  ;;  %v681_v50 = vmul.f32 %v1338_v42, %v579_v46  ;;  %v581_v52 = vpop.f32.mrb[23].mxu0  ;;  %v645_v53 = vpop.f32.mrb[23].mxu1 }
 0x129   : > { %v697_v51 = vmul.f32 %v1338_v42, %v643_v47 }
 0x12a   : > { %v751_v54 = vmax.f32 %v719_v48, 0.0  ;;  %v767_v55 = vmax.f32 %v735_v49, 0.0  ;;  %v720_v56 = vadd.f32 %v1343_v44, %v681_v50 }
 0x12b   : > { %v736_v57 = vadd.f32 %v1343_v44, %v697_v51 }
 0x12c   : > { %v1104_v58 = vpack.c.bf16 %v751_v54, %v751_v54  ;;  %v1120_v59 = vpack.c.bf16 %v767_v55, %v767_v55  ;;  %v752_v60 = vmax.f32 %v720_v56, 0.0 }
 0x12d   : > { %v768_v61 = vmax.f32 %v736_v57, 0.0  ;;  %v584_v62 = vpop.f32.mrb[24].mxu0  ;;  %v648_v63 = vpop.f32.mrb[24].mxu1 }
 0x12e   : > { %912 = vst.msk [vmem:[%s1357_s19 + $0x28] sm:$0xf] %vm901_vm1, %v1104_v58  ;;  %928 = vst.msk [vmem:[%s1357_s19 + $0x68] sm:$0xf] %vm901_vm1, %v1120_v59  ;;  %v1105_v0 = vpack.c.bf16 %v752_v60, %v752_v60  ;;  %v682_v2 = vmul.f32 %v1338_v42, %v584_v62  ;;  %v698_v3 = vmul.f32 %v1338_v42, %v648_v63  ;;  %v586_v4 = vpop.f32.mrb[25].mxu0  ;;  %v650_v5 = vpop.f32.mrb[25].mxu1 }
 0x12f   : > { %v1121_v1 = vpack.c.bf16 %v768_v61, %v768_v61  ;;  %v587_v6 = vpop.f32.mrb[26].mxu0  ;;  %v651_v7 = vpop.f32.mrb[26].mxu1 }
 0x130   : > { %913 = vst.msk [vmem:[%s1357_s19 + $0x2c] sm:$0xf] %vm901_vm1, %v1105_v0  ;;  %v721_v8 = vadd.f32 %v1343_v44, %v682_v2  ;;  %v737_v9 = vadd.f32 %v1343_v44, %v698_v3  ;;  %v683_v10 = vmul.f32 %v1338_v42, %v587_v6  ;;  %v699_v11 = vmul.f32 %v1338_v42, %v651_v7  ;;  %v589_v12 = vpop.f32.mrb[27].mxu0  ;;  %v653_v13 = vpop.f32.mrb[27].mxu1 }
 0x131   : > { %929 = vst.msk [vmem:[%s1357_s19 + $0x6c] sm:$0xf] %vm901_vm1, %v1121_v1 }
 0x132   : > { %v753_v14 = vmax.f32 %v721_v8, 0.0  ;;  %v769_v15 = vmax.f32 %v737_v9, 0.0  ;;  %v722_v16 = vadd.f32 %v1343_v44, %v683_v10  ;;  %v738_v17 = vadd.f32 %v1343_v44, %v699_v11 }
 0x134   : > { %v1106_v18 = vpack.c.bf16 %v753_v14, %v753_v14  ;;  %v1122_v19 = vpack.c.bf16 %v769_v15, %v769_v15  ;;  %v754_v20 = vmax.f32 %v722_v16, 0.0  ;;  %v770_v21 = vmax.f32 %v738_v17, 0.0 }
 0x135   : > { %v592_v22 = vpop.f32.mrb[28].mxu0  ;;  %v656_v23 = vpop.f32.mrb[28].mxu1 }
 0x136   : > { %914 = vst.msk [vmem:[%s1357_s19 + $0x30] sm:$0xf] %vm901_vm1, %v1106_v18  ;;  %930 = vst.msk [vmem:[%s1357_s19 + $0x70] sm:$0xf] %vm901_vm1, %v1122_v19  ;;  %v1107_v24 = vpack.c.bf16 %v754_v20, %v754_v20  ;;  %v1123_v25 = vpack.c.bf16 %v770_v21, %v770_v21  ;;  %v684_v26 = vmul.f32 %v1338_v42, %v592_v22  ;;  %v594_v28 = vpop.f32.mrb[29].mxu0  ;;  %v658_v29 = vpop.f32.mrb[29].mxu1 }
 0x137   : > { %v700_v27 = vmul.f32 %v1338_v42, %v656_v23  ;;  %v595_v30 = vpop.f32.mrb[30].mxu0  ;;  %v659_v31 = vpop.f32.mrb[30].mxu1 }
 0x138   : > { %915 = vst.msk [vmem:[%s1357_s19 + $0x34] sm:$0xf] %vm901_vm1, %v1107_v24  ;;  %931 = vst.msk [vmem:[%s1357_s19 + $0x74] sm:$0xf] %vm901_vm1, %v1123_v25  ;;  %v723_v32 = vadd.f32 %v1343_v44, %v684_v26  ;;  %v685_v34 = vmul.f32 %v1338_v42, %v595_v30  ;;  %v701_v35 = vmul.f32 %v1338_v42, %v659_v31  ;;  %v597_v36 = vpop.f32.mrb[31].mxu0  ;;  %v661_v37 = vpop.f32.mrb[31].mxu1 }
 0x139   : > { %v739_v33 = vadd.f32 %v1343_v44, %v700_v27 }
 0x13a   : > { %v755_v38 = vmax.f32 %v723_v32, 0.0  ;;  %v724_v40 = vadd.f32 %v1343_v44, %v685_v34  ;;  %v740_v41 = vadd.f32 %v1343_v44, %v701_v35 }
 0x13b   : > { %v771_v39 = vmax.f32 %v739_v33, 0.0 }
 0x13c   : > { %v1108_v43 = vpack.c.bf16 %v755_v38, %v755_v38  ;;  %v756_v46 = vmax.f32 %v724_v40, 0.0  ;;  %v772_v47 = vmax.f32 %v740_v41, 0.0 }
 0x13d   : > { %v1124_v45 = vpack.c.bf16 %v771_v39, %v771_v39 }
 0x13e   : > { %916 = vst.msk [vmem:[%s1357_s19 + $0x38] sm:$0xf] %vm901_vm1, %v1108_v43  ;;  %v1109_v48 = vpack.c.bf16 %v756_v46, %v756_v46  ;;  %v1125_v49 = vpack.c.bf16 %v772_v47, %v772_v47 }
 0x13f   : > { %932 = vst.msk [vmem:[%s1357_s19 + $0x78] sm:$0xf] %vm901_vm1, %v1124_v45 }
 0x140   : > { %917 = vst.msk [vmem:[%s1357_s19 + $0x3c] sm:$0xf] %vm901_vm1, %v1109_v48  ;;  %933 = vst.msk [vmem:[%s1357_s19 + $0x7c] sm:$0xf] %vm901_vm1, %v1125_v49 }
 0x141 PF: > { %s14_s15 = sadd.s32 1, %s1216_s15  }
 0x142   : > { %p11_p4 = scmp.ge.s32.totalorder %s14_s15, 4  }
 0x144   :  { %13 = sbr.rel (!%p11_p4) target bundleno = 1 (0x1), region = 66 }

// kernel: _lambda_.12
= control target key start
LH: loop header
LB: loop body
LE: loop exit
PB: predicated region body
PF: predicated region fallthrough
CT: control target
= control target key end

     0   :  { %s2507_s27 = smov 0   ;;  %s2984_s0 = inlined_call_operand.vmem [shape: bf16[512,288], index: 0, kind: input, shape index: {}]   ;;  %s2985_s1 = inlined_call_operand.vmem [shape: bf16[288,32], index: 1, kind: input, shape index: {}]   ;;  %s2986_s2 = inlined_call_operand.vmem [shape: f32[1,32], index: 2, kind: input, shape index: {}]   ;;  %s2987_s3 = inlined_call_operand.vmem [shape: f32[1,32], index: 3, kind: input, shape index: {}]   ;;  %s2988_s4 = inlined_call_operand.vmem [shape: bf16[512,16], index: 4, kind: input, shape index: {}]   ;;  %s2989_s5 = inlined_call_operand.vmem [shape: bf16[16,32], index: 5, kind: input, shape index: {}]   ;;  %s2990_s6 = inlined_call_operand.vmem [shape: f32[1,32], index: 6, kind: input, shape index: {}]   ;;  %s2991_s7 = inlined_call_operand.vmem [shape: f32[1,32], index: 7, kind: input, shape index: {}]   ;;  %s2992_s8 = inlined_call_operand.vmem [shape: bf16[512,32], index: 8, kind: output, shape index: {}]  }
   0x1 LB: > { %s1933_s28 = sadd.s32 4294967295, %s2460_s27   ;;  %p1937_p0 = scmp.ge.s32.totalorder %s2460_s27, 1  ;;  %s2460_s27 = sphi %s2507_s27, %s18_s27  }
   0x2   : > { %p275_p1 = scmp.lt.s32.totalorder %s2460_s27, 3 }
   0x4   : > { %p276_p2 = pnand %p1937_p0, %p275_p1 }
   0x5   : > { %v2355_v0 = vld [vmem:[%s2985_s1 + $0x40] sm:$0xff] (!%p276_p2)   ;;  %s1938_s9 = sshll.u32 (!%p276_p2), %s1933_s28, 5  ;;  %v2358_v3 = vld [vmem:[%s2985_s1 + $0x48] sm:$0xff] (!%p276_p2)   ;;  %v2361_v6 = vld [vmem:[%s2985_s1 + $0x50] sm:$0xff] (!%p276_p2)   ;;  %vm783_vm0 = vcmask (!%p276_p2), 261120   ;;  %vm1274_vm1 = vcmask (!%p276_p2), 130048  }
   0x6   : > { %279 = sbr.rel (%p276_p2) target bundleno = 390 (0x186), region = 52  ;;  %v2356_v1 = vld [vmem:[%s2985_s1] sm:$0xff] (!%p276_p2)   ;;  %p316_p3 = scmp.lt.s32.totalorder (!%p276_p2), %s1938_s9, 63  ;;  %2129 = vmatprep.subr.bf16.mxu0 (!%p276_p2), %v2355_v0  ;;  %v2359_v4 = vld [vmem:[%s2985_s1 + $0x8] sm:$0xff] (!%p276_p2)   ;;  %v2363_v7 = vld [vmem:[%s2985_s1 + $0x10] sm:$0xff] (!%p276_p2)   ;;  %vm1832_vm2 = vcmask (!%p276_p2), 257024  }
   0x7   : > { %v2357_v2 = vld [vmem:[%s2985_s1 + $0x80] sm:$0xff] (!%p276_p2)   ;;  %2130 = vmatpush3.bf16.msra.mxu0 (!%p276_p2), %v2356_v1  ;;  %v2360_v5 = vld [vmem:[%s2985_s1 + $0x88] sm:$0xff] (!%p276_p2)   ;;  %v2365_v10 = vld [vmem:[%s2985_s1 + $0x58] sm:$0xff] (!%p276_p2)  }
   0x8   : > { %2276 = vmatprep.subr.bf16.mxu1 (!%p276_p2), %v2357_v2  ;;  %2131 = vmatprep.subr.bf16.mxu0 (!%p276_p2), %v2358_v3  ;;  %v2366_v11 = vld [vmem:[%s2985_s1 + $0x18] sm:$0xff] (!%p276_p2)   ;;  %v2367_v12 = vld [vmem:[%s2985_s1 + $0x60] sm:$0xff] (!%p276_p2)   ;;  %v2371_v16 = vld [vmem:[%s2985_s1 + $0x68] sm:$0xff] (!%p276_p2)  }
   0x9   : > { %2277 = vmatpush3.bf16.msra.mxu1 (!%p276_p2), %v2357_v2  ;;  %v2369_v14 = vld [vmem:[%s2985_s1 + $0x20] sm:$0xff] (!%p276_p2)   ;;  %v2372_v17 = vld [vmem:[%s2985_s1 + $0x28] sm:$0xff] (!%p276_p2)   ;;  %v2373_v19 = vld [vmem:[%s2985_s1 + $0x70] sm:$0xff] (!%p276_p2)  }
   0xa   : > { %2278 = vmatprep.subr.bf16.mxu1 (!%p276_p2), %v2360_v5  ;;  %v2375_v20 = vld [vmem:[%s2985_s1 + $0x30] sm:$0xff] (!%p276_p2)   ;;  %v2377_v22 = vld [vmem:[%s2985_s1 + $0x78] sm:$0xff] (!%p276_p2)   ;;  %v2384_v26 = vld [vmem:[%s2989_s5] sm:$0xff] (!%p276_p2)  }
   0xb   : > { %2132 = vmatpush3.bf16.msra.mxu0 (!%p276_p2), %v2359_v4  ;;  %v2378_v25 = vld [vmem:[%s2985_s1 + $0x38] sm:$0xff] (!%p276_p2)  }
   0xc   : > { %2133 = vmatprep.subr.bf16.mxu0 (!%p276_p2), %v2361_v6 }
   0xd   : > { %s2994_s9 = smov (!%p316_p3, %s1938_s9), 63  ;;  %2279 = vmatpush3.bf16.msra.mxu1 %v2360_v5 }
   0xe   : > { %s2346_s20 = smul.u32 12, %s2994_s9  ;;  %2312 = vmatprep.subr.bf16.mxu1 %v2384_v26  ;;  %s1941_s11 = sshll.u32 %s2994_s9, 2 }
   0xf   : > { %2134 = vmatpush3.bf16.msra.mxu0 %v2363_v7  ;;  %s2611_s14 = scalar_lea.vmem %s2988_s4, %s1941_s11  ;;  %s2780_s24 = scalar_lea.vmem %s2992_s8, %s1941_s11 }
  0x10   : > { %s2542_s25 = scalar_lea.vmem %s2984_s0, %s2346_s20  ;;  %2135 = vmatprep.subr.bf16.mxu0 %v2365_v10  ;;  %v2408_v46 = vld [vmem:[%s2611_s14] sm:$0xff]   ;;  %v2409_v49 = vld [vmem:[%s2611_s14 + $0x8] sm:$0xff]   ;;  %v2413_v50 = vld [vmem:[%s2611_s14 + $0x10] sm:$0xff]  }
  0x11   : > { %v2362_v8 = vld [vmem:[%s2542_s25 + $0x8] ss:$12 sps:$4 sm:$0xff]   ;;  %v2364_v9 = vld [vmem:[%s2542_s25 + $0x20] ss:$12 sps:$4 sm:$0xff]   ;;  %v2368_v13 = vld [vmem:[%s2542_s25 + $0x38] ss:$12 sps:$4 sm:$0xff]  }
  0x12   : > { %2280 = vmatprep.mubr.msk.bf16.mxu1 %vm783_vm0, %v2362_v8  ;;  %v2370_v15 = vld [vmem:[%s2542_s25 + $0x50] ss:$12 sps:$4 sm:$0xff]   ;;  %v2374_v18 = vld [vmem:[%s2542_s25 + $0x68] ss:$12 sps:$4 sm:$0xff]   ;;  %v2376_v21 = vld [vmem:[%s2542_s25 + $0x80] ss:$12 sps:$4 sm:$0xff]  }
  0x13   : > { %2281 = vmatmul.mubr.msk.bf16.vlgmr.msra.gmra.mrb[0].mxu1 %vm783_vm0, %v2364_v9  ;;  %2136 = vmatpush3.bf16.msra.mxu0 %v2366_v11  ;;  %v2381_v23 = vld [vmem:[%s2542_s25 + $0x4] ss:$12 sps:$4 sm:$0xff]   ;;  %v2379_v27 = vld [vmem:[%s2542_s25] ss:$12 sps:$4 sm:$0xff]   ;;  %v2385_v28 = vld [vmem:[%s2542_s25 + $0x1c] ss:$12 sps:$4 sm:$0xff]  }
  0x14   : > { %2284 = vmatprep.mubr.msk.bf16.mxu1 %vm783_vm0, %v2368_v13  ;;  %2137 = vmatprep.subr.bf16.mxu0 %v2367_v12  ;;  %v2382_v24 = vld [vmem:[%s2542_s25 + $0x98] ss:$12 sps:$4 sm:$0xff]   ;;  %v2383_v29 = vld [vmem:[%s2542_s25 + $0xb0] ss:$12 sps:$4 sm:$0xff]   ;;  %v2388_v30 = vld [vmem:[%s2542_s25 + $0xc8] ss:$12 sps:$4 sm:$0xff]  }
  0x15   : > { %864 = vmatprep.mubr.bf16.mxu0 %v2381_v23  ;;  %2313 = vmatpush3.bf16.msra.mxu1 %v2384_v26  ;;  %v2387_v31 = vld [vmem:[%s2542_s25 + $0x18] ss:$12 sps:$4 sm:$0xff]   ;;  %v2390_v32 = vld [vmem:[%s2542_s25 + $0x34] ss:$12 sps:$4 sm:$0xff]   ;;  %v2392_v35 = vld [vmem:[%s2542_s25 + $0x30] ss:$12 sps:$4 sm:$0xff]  }
  0x16   : > { %v2389_v33 = vld [vmem:[%s2542_s25 + $0xe0] ss:$12 sps:$4 sm:$0xff]   ;;  %v2393_v34 = vld [vmem:[%s2542_s25 + $0xf8] ss:$12 sps:$4 sm:$0xff]   ;;  %v2394_v37 = vld [vmem:[%s2542_s25 + $0x110] ss:$12 sps:$4 sm:$0xff]  }
  0x17   : > { %2138 = vmatpush3.bf16.msra.mxu0 %v2369_v14  ;;  %v2395_v36 = vld [vmem:[%s2542_s25 + $0x4c] ss:$12 sps:$4 sm:$0xff]   ;;  %v2398_v38 = vld [vmem:[%s2542_s25 + $0x128] ss:$12 sps:$4 sm:$0xff]   ;;  %v2400_v40 = vld [vmem:[%s2542_s25 + $0x64] ss:$12 sps:$4 sm:$0xff]  }
  0x18   : > { %2139 = vmatprep.subr.bf16.mxu0 %v2371_v16  ;;  %v2397_v39 = vld [vmem:[%s2542_s25 + $0x48] ss:$12 sps:$4 sm:$0xff]   ;;  %v2399_v41 = vld [vmem:[%s2542_s25 + $0x140] ss:$12 sps:$4 sm:$0xff]   ;;  %v2403_v42 = vld [vmem:[%s2542_s25 + $0x158] ss:$12 sps:$4 sm:$0xff]  }
  0x19   : > { %v2402_v43 = vld [vmem:[%s2542_s25 + $0x60] ss:$12 sps:$4 sm:$0xff]   ;;  %v2405_v44 = vld [vmem:[%s2542_s25 + $0x7c] ss:$12 sps:$4 sm:$0xff]   ;;  %v2407_v47 = vld [vmem:[%s2542_s25 + $0x78] ss:$12 sps:$4 sm:$0xff]  }
  0x1a   : > { %v2404_v45 = vld [vmem:[%s2542_s25 + $0x170] ss:$12 sps:$4 sm:$0xff]   ;;  %v2410_v48 = vld [vmem:[%s2542_s25 + $0x94] ss:$12 sps:$4 sm:$0xff]   ;;  %v2415_v52 = vld [vmem:[%s2542_s25 + $0xac] ss:$12 sps:$4 sm:$0xff]  }
  0x1b   : > { %2285 = vmatmul.mubr.msk.bf16.gmra.mrb[4].mxu1 %vm783_vm0, %v2370_v15  ;;  %2140 = vmatpush3.bf16.msra.mxu0 %v2372_v17  ;;  %v2412_v51 = vld [vmem:[%s2542_s25 + $0x90] ss:$12 sps:$4 sm:$0xff]   ;;  %v2418_v54 = vld [vmem:[%s2611_s14 + $0x20] sm:$0xff]   ;;  %v2417_v55 = vld [vmem:[%s2542_s25 + $0xa8] ss:$12 sps:$4 sm:$0xff]  }
  0x1c   : > { %2288 = vmatprep.mubr.msk.bf16.mxu1 %vm783_vm0, %v2374_v18  ;;  %2141 = vmatprep.subr.bf16.mxu0 %v2373_v19  ;;  %v2414_v53 = vld [vmem:[%s2611_s14 + $0x18] sm:$0xff]   ;;  %v2420_v56 = vld [vmem:[%s2542_s25 + $0xc4] ss:$12 sps:$4 sm:$0xff]   ;;  %v2419_v57 = vld [vmem:[%s2611_s14 + $0x28] sm:$0xff]  }
  0x1d   : > { %v2423_v58 = vld [vmem:[%s2611_s14 + $0x30] sm:$0xff]   ;;  %v2422_v59 = vld [vmem:[%s2542_s25 + $0xc0] ss:$12 sps:$4 sm:$0xff]   ;;  %v2425_v60 = vld [vmem:[%s2542_s25 + $0xdc] ss:$12 sps:$4 sm:$0xff]  }
  0x1e   : > { %v2424_v61 = vld [vmem:[%s2611_s14 + $0x38] sm:$0xff]   ;;  %v2428_v62 = vld [vmem:[%s2611_s14 + $0x40] sm:$0xff]   ;;  %v2429_v1 = vld [vmem:[%s2611_s14 + $0x48] sm:$0xff]  }
  0x1f   : > { %2142 = vmatpush3.bf16.msra.mxu0 %v2375_v20  ;;  %v2427_v63 = vld [vmem:[%s2542_s25 + $0xd8] ss:$12 sps:$4 sm:$0xff]   ;;  %v2430_v0 = vld [vmem:[%s2542_s25 + $0xf4] ss:$12 sps:$4 sm:$0xff]   ;;  %v2432_v3 = vld [vmem:[%s2542_s25 + $0xf0] ss:$12 sps:$4 sm:$0xff]  }
  0x20   : > { %2143 = vmatprep.subr.bf16.mxu0 %v2377_v22  ;;  %v2433_v2 = vld [vmem:[%s2611_s14 + $0x50] sm:$0xff]   ;;  %v2435_v4 = vld [vmem:[%s2542_s25 + $0x10c] ss:$12 sps:$4 sm:$0xff]   ;;  %v2441_v6 = vld [vmem:[%s2611_s14 + $0x60] sm:$0xff]  }
  0x21   : > { %v2434_v5 = vld [vmem:[%s2611_s14 + $0x58] sm:$0xff]   ;;  %v2437_v7 = vld [vmem:[%s2542_s25 + $0x108] ss:$12 sps:$4 sm:$0xff]   ;;  %v2438_v8 = vld [vmem:[%s2542_s25 + $0x124] ss:$12 sps:$4 sm:$0xff]  }
  0x22   : > { %v2442_v9 = vld [vmem:[%s2611_s14 + $0x68] sm:$0xff]   ;;  %v2449_v10 = vld [vmem:[%s2611_s14 + $0x70] sm:$0xff]   ;;  %v2450_v13 = vld [vmem:[%s2611_s14 + $0x78] sm:$0xff]  }
  0x23   : > { %2289 = vmatmul.mubr.msk.bf16.gmra.mrb[8].mxu1 %vm783_vm0, %v2376_v21  ;;  %2144 = vmatpush3.bf16.msra.mxu0 %v2378_v25  ;;  %v2440_v11 = vld [vmem:[%s2542_s25 + $0x120] ss:$12 sps:$4 sm:$0xff]   ;;  %v2443_v12 = vld [vmem:[%s2542_s25 + $0x13c] ss:$12 sps:$4 sm:$0xff]   ;;  %v2445_v14 = vld [vmem:[%s2542_s25 + $0x138] ss:$12 sps:$4 sm:$0xff]  }
  0x24   : > { %2292 = vmatprep.mubr.msk.bf16.mxu1 %vm783_vm0, %v2382_v24  ;;  %v2446_v15 = vld [vmem:[%s2542_s25 + $0x154] ss:$12 sps:$4 sm:$0xff]   ;;  %v2448_v16 = vld [vmem:[%s2542_s25 + $0x150] ss:$12 sps:$4 sm:$0xff]   ;;  %v2451_v17 = vld [vmem:[%s2542_s25 + $0x16c] ss:$12 sps:$4 sm:$0xff]  }
  0x25   : > { %v2453_v18 = vld [vmem:[%s2542_s25 + $0x168] ss:$12 sps:$4 sm:$0xff]  }
  0x26   : > { %865 = vmatmul.mubr.bf16.vlgmr.msra.gmra.mrb[0].mxu0 %v2379_v27 }
  0x27   : > { %872 = vmatprep.mubr.bf16.mxu0 %v2385_v28 }
  0x2b   : > { %2293 = vmatmul.mubr.msk.bf16.gmra.mrb[12].mxu1 %vm783_vm0, %v2383_v29 }
  0x2c   : > { %2296 = vmatprep.mubr.msk.bf16.mxu1 %vm783_vm0, %v2388_v30 }
  0x2e   : > { %873 = vmatmul.mubr.bf16.gmra.mrb[4].mxu0 %v2387_v31 }
  0x2f   : > { %880 = vmatprep.mubr.bf16.mxu0 %v2390_v32 }
  0x33   : > { %2297 = vmatmul.mubr.msk.bf16.gmra.mrb[16].mxu1 %vm783_vm0, %v2389_v33 }
  0x34   : > { %2300 = vmatprep.mubr.msk.bf16.mxu1 %vm783_vm0, %v2393_v34 }
  0x36   : > { %881 = vmatmul.mubr.bf16.gmra.mrb[8].mxu0 %v2392_v35 }
  0x37   : > { %888 = vmatprep.mubr.bf16.mxu0 %v2395_v36 }
  0x3b   : > { %2301 = vmatmul.mubr.msk.bf16.gmra.mrb[20].mxu1 %vm783_vm0, %v2394_v37 }
  0x3c   : > { %2304 = vmatprep.mubr.msk.bf16.mxu1 %vm783_vm0, %v2398_v38 }
  0x3e   : > { %889 = vmatmul.mubr.bf16.gmra.mrb[12].mxu0 %v2397_v39 }
  0x3f   : > { %896 = vmatprep.mubr.bf16.mxu0 %v2400_v40 }
  0x43   : > { %2305 = vmatmul.mubr.msk.bf16.gmra.mrb[24].mxu1 %vm783_vm0, %v2399_v41 }
  0x44   : > { %2308 = vmatprep.mubr.msk.bf16.mxu1 %vm783_vm0, %v2403_v42 }
  0x46   : > { %897 = vmatmul.mubr.bf16.gmra.mrb[16].mxu0 %v2402_v43 }
  0x47   : > { %904 = vmatprep.mubr.bf16.mxu0 %v2405_v44 }
  0x4b   : > { %2309 = vmatmul.mubr.msk.bf16.gmra.mrb[28].mxu1 %vm783_vm0, %v2404_v45 }
  0x4c   : > { %2314 = vmatprep.mubr.msk.bf16.mxu1 %vm1274_vm1, %v2408_v46 }
  0x4e   : > { %905 = vmatmul.mubr.bf16.gmra.mrb[20].mxu0 %v2407_v47 }
  0x4f   : > { %912 = vmatprep.mubr.bf16.mxu0 %v2410_v48 }
  0x53   : > { %2315 = vmatmul.mubr.msk.bf16.vlgmr.msra.gmra.mrb[32].mxu1 %vm1274_vm1, %v2409_v49 }
  0x54   : > { %2318 = vmatprep.mubr.msk.bf16.mxu1 %vm1274_vm1, %v2413_v50 }
  0x56   : > { %913 = vmatmul.mubr.bf16.gmra.mrb[24].mxu0 %v2412_v51 }
  0x57   : > { %920 = vmatprep.mubr.bf16.mxu0 %v2415_v52 }
  0x5b   : > { %2319 = vmatmul.mubr.msk.bf16.gmra.mrb[36].mxu1 %vm1274_vm1, %v2414_v53 }
  0x5c   : > { %2322 = vmatprep.mubr.msk.bf16.mxu1 %vm1274_vm1, %v2418_v54 }
  0x5e   : > { %921 = vmatmul.mubr.bf16.gmra.mrb[28].mxu0 %v2417_v55 }
  0x5f   : > { %928 = vmatprep.mubr.bf16.mxu0 %v2420_v56 }
  0x63   : > { %2323 = vmatmul.mubr.msk.bf16.gmra.mrb[40].mxu1 %vm1274_vm1, %v2419_v57 }
  0x64   : > { %2326 = vmatprep.mubr.msk.bf16.mxu1 %vm1274_vm1, %v2423_v58 }
  0x66   : > { %929 = vmatmul.mubr.bf16.gmra.mrb[32].mxu0 %v2422_v59 }
  0x67   : > { %936 = vmatprep.mubr.bf16.mxu0 %v2425_v60 }
  0x6b   : > { %2327 = vmatmul.mubr.msk.bf16.gmra.mrb[44].mxu1 %vm1274_vm1, %v2424_v61 }
  0x6c   : > { %2330 = vmatprep.mubr.msk.bf16.mxu1 %vm1274_vm1, %v2428_v62 }
  0x6e   : > { %937 = vmatmul.mubr.bf16.gmra.mrb[36].mxu0 %v2427_v63 }
  0x6f   : > { %944 = vmatprep.mubr.bf16.mxu0 %v2430_v0 }
  0x73   : > { %2331 = vmatmul.mubr.msk.bf16.gmra.mrb[48].mxu1 %vm1274_vm1, %v2429_v1 }
  0x74   : > { %2334 = vmatprep.mubr.msk.bf16.mxu1 %vm1274_vm1, %v2433_v2 }
  0x76   : > { %945 = vmatmul.mubr.bf16.gmra.mrb[40].mxu0 %v2432_v3 }
  0x77   : > { %952 = vmatprep.mubr.bf16.mxu0 %v2435_v4 }
  0x7b   : > { %2335 = vmatmul.mubr.msk.bf16.gmra.mrb[52].mxu1 %vm1274_vm1, %v2434_v5 }
  0x7c   : > { %2338 = vmatprep.mubr.msk.bf16.mxu1 %vm1274_vm1, %v2441_v6 }
  0x7e   : > { %953 = vmatmul.mubr.bf16.gmra.mrb[44].mxu0 %v2437_v7 }
  0x7f   : > { %960 = vmatprep.mubr.bf16.mxu0 %v2438_v8 }
  0x83   : > { %2339 = vmatmul.mubr.msk.bf16.gmra.mrb[56].mxu1 %vm1274_vm1, %v2442_v9 }
  0x84   : > { %2342 = vmatprep.mubr.msk.bf16.mxu1 %vm1274_vm1, %v2449_v10 }
  0x86   : > { %961 = vmatmul.mubr.bf16.gmra.mrb[48].mxu0 %v2440_v11 }
  0x87   : > { %968 = vmatprep.mubr.bf16.mxu0 %v2443_v12 }
  0x8b   : > { %2343 = vmatmul.mubr.msk.bf16.gmra.mrb[60].mxu1 %vm1274_vm1, %v2450_v13 }
  0x8e   : > { %969 = vmatmul.mubr.bf16.gmra.mrb[52].mxu0 %v2445_v14 }
  0x8f   : > { %976 = vmatprep.mubr.bf16.mxu0 %v2446_v15 }
  0x96   : > { %977 = vmatmul.mubr.bf16.gmra.mrb[56].mxu0 %v2448_v16 }
  0x97   : > { %984 = vmatprep.mubr.bf16.mxu0 %v2451_v17 }
  0x9e   : > { %985 = vmatmul.mubr.bf16.gmra.mrb[60].mxu0 %v2453_v18 }
  0xe6   : > { %v2282_v19 = vpop.f32.mrb[0].mxu1 }
  0xe7   : > { %v1027_v20 = vpop.f32.mrb[1].mxu1 }
  0xe8   : > { %v2283_v21 = vpop.f32.mrb[2].mxu1 }
  0xe9   : > { %v1030_v22 = vpop.f32.mrb[3].mxu1 }
  0xee   : > { %v2286_v23 = vpop.f32.mrb[4].mxu1 }
  0xef   : > { %v1043_v24 = vpop.f32.mrb[5].mxu1 }
  0xf0   : > { %v2287_v25 = vpop.f32.mrb[6].mxu1 }
  0xf1   : > { %v1046_v26 = vpop.f32.mrb[7].mxu1 }
  0xf6   : > { %v2684_v27 = vpop.f32.mrb[8].mxu1 }
  0xf7   : > { %v1059_v28 = vpop.f32.mrb[9].mxu1 }
  0xf8   : > { %v2686_v29 = vpop.f32.mrb[10].mxu1 }
  0xf9   : > { %v1062_v30 = vpop.f32.mrb[11].mxu1  ;;  %v2145_v31 = vpop.f32.mrb[0].mxu0 }
  0xfa   : > { %v2146_v32 = vpop.f32.mrb[1].mxu0 }
  0xfb   : > { %v2147_v33 = vadd.f32 %v2146_v32, %v2145_v31  ;;  %v2148_v34 = vpop.f32.mrb[2].mxu0 }
  0xfc   : > { %v2149_v36 = vpop.f32.mrb[3].mxu0 }
  0xfd   : > { %v2150_v38 = vadd.f32 %v2149_v36, %v2148_v34  ;;  %v1028_v39 = vadd.f32 %v2147_v33, %v1027_v20  ;;  %v2725_v20 = vld [vmem:[%s2986_s2] ss:$0 sm:$0xff] }
  0xfe   : > { %v2688_v35 = vpop.f32.mrb[12].mxu1  ;;  %v2738_v34 = vld [vmem:[%s2987_s3] ss:$0 sm:$0xff] }
  0xff   : > { %v2690_v37 = vpop.f32.mrb[13].mxu1  ;;  %v1031_v42 = vadd.f32 %v2150_v38, %v1030_v22 }
 0x100   : > { %v2692_v40 = vpop.f32.mrb[14].mxu1 }
 0x101   : > { %v2694_v41 = vpop.f32.mrb[15].mxu1  ;;  %v2151_v43 = vpop.f32.mrb[4].mxu0 }
 0x102   : > { %v2152_v44 = vpop.f32.mrb[5].mxu0 }
 0x103   : > { %v2153_v45 = vadd.f32 %v2152_v44, %v2151_v43  ;;  %v2154_v46 = vpop.f32.mrb[6].mxu0  ;;  %v1492_v44 = vmul.f32 %v2725_v20, %v1031_v42  ;;  %v2757_v42 = vld [vmem:[%s2991_s7] ss:$0 sm:$0xff] }
 0x104   : > { %v2155_v48 = vpop.f32.mrb[7].mxu0 }
 0x105   : > { %v1036_v50 = vadd.f32 %v2282_v19, %v2153_v45  ;;  %v2156_v51 = vadd.f32 %v2155_v48, %v2154_v46 }
 0x106   : > { %v2696_v47 = vpop.f32.mrb[16].mxu1 }
 0x107   : > { %v2698_v49 = vpop.f32.mrb[17].mxu1  ;;  %v1039_v54 = vadd.f32 %v2283_v21, %v2156_v51  ;;  %v1493_v33 = vmul.f32 %v2725_v20, %v1036_v50 }
 0x108   : > { %v2700_v52 = vpop.f32.mrb[18].mxu1 }
 0x109   : > { %v2702_v53 = vpop.f32.mrb[19].mxu1  ;;  %v2157_v55 = vpop.f32.mrb[8].mxu0  ;;  %v1494_v38 = vmul.f32 %v2725_v20, %v1039_v54  ;;  %v1532_v51 = vadd.f32 %v2738_v34, %v1493_v33 }
 0x10a   : > { %v2158_v56 = vpop.f32.mrb[9].mxu0 }
 0x10b   : > { %v2159_v57 = vadd.f32 %v2158_v56, %v2157_v55  ;;  %v2160_v58 = vpop.f32.mrb[10].mxu0 }
 0x10c   : > { %v2161_v60 = vpop.f32.mrb[11].mxu0 }
 0x10d   : > { %v1044_v62 = vadd.f32 %v2159_v57, %v1043_v24  ;;  %v2162_v63 = vadd.f32 %v2161_v60, %v2160_v58 }
 0x10e   : > { %v2704_v59 = vpop.f32.mrb[20].mxu1 }
 0x10f   : > { %v2706_v61 = vpop.f32.mrb[21].mxu1  ;;  %v1047_v2 = vadd.f32 %v2162_v63, %v1046_v26  ;;  %v1495_v48 = vmul.f32 %v2725_v20, %v1044_v62 }
 0x110   : > { %v2708_v0 = vpop.f32.mrb[22].mxu1 }
 0x111   : > { %v2710_v1 = vpop.f32.mrb[23].mxu1  ;;  %v2163_v3 = vpop.f32.mrb[12].mxu0  ;;  %v1496_v50 = vmul.f32 %v2725_v20, %v1047_v2 }
 0x112   : > { %v2164_v4 = vpop.f32.mrb[13].mxu0 }
 0x113   : > { %v2165_v5 = vadd.f32 %v2164_v4, %v2163_v3  ;;  %v2166_v6 = vpop.f32.mrb[14].mxu0  ;;  %v1533_v4 = vadd.f32 %v2738_v34, %v1494_v38 }
 0x114   : > { %v2167_v8 = vpop.f32.mrb[15].mxu0 }
 0x115   : > { %v1052_v10 = vadd.f32 %v2286_v23, %v2165_v5  ;;  %v2168_v11 = vadd.f32 %v2167_v8, %v2166_v6 }
 0x116   : > { %v2712_v7 = vpop.f32.mrb[24].mxu1 }
 0x117   : > { %v2714_v9 = vpop.f32.mrb[25].mxu1  ;;  %v1055_v14 = vadd.f32 %v2287_v25, %v2168_v11  ;;  %v1491_v25 = vmul.f32 %v2725_v20, %v1028_v39  ;;  %v1497_v54 = vmul.f32 %v2725_v20, %v1052_v10  ;;  %v1531_v10 = vadd.f32 %v2738_v34, %v1492_v44 }
 0x118   : > { %v2716_v12 = vpop.f32.mrb[26].mxu1 }
 0x119   : > { %v2718_v13 = vpop.f32.mrb[27].mxu1  ;;  %v2169_v15 = vpop.f32.mrb[16].mxu0  ;;  %v1530_v46 = vadd.f32 %v2738_v34, %v1491_v25  ;;  %v1498_v2 = vmul.f32 %v2725_v20, %v1055_v14  ;;  %v1534_v14 = vadd.f32 %v2738_v34, %v1495_v48  ;;  %v1535_v25 = vadd.f32 %v2738_v34, %v1496_v50 }
 0x11a   : > { %v2170_v16 = vpop.f32.mrb[17].mxu0 }
 0x11b   : > { %v2171_v17 = vadd.f32 %v2170_v16, %v2169_v15  ;;  %v2172_v18 = vpop.f32.mrb[18].mxu0 }
 0x11c   : > { %v2173_v21 = vpop.f32.mrb[19].mxu0 }
 0x11d   : > { %v1060_v23 = vadd.f32 %v2171_v17, %v1059_v28  ;;  %v2174_v24 = vadd.f32 %v2173_v21, %v2172_v18  ;;  %v2743_v28 = vld [vmem:[%s2990_s6] ss:$0 sm:$0xff] }
 0x11e   : > { %v2720_v19 = vpop.f32.mrb[28].mxu1 }
 0x11f   : > { %v2727_v22 = vpop.f32.mrb[29].mxu1  ;;  %v1063_v32 = vadd.f32 %v2174_v24, %v1062_v30  ;;  %v1536_v24 = vadd.f32 %v2738_v34, %v1497_v54 }
 0x120   : > { %v2729_v26 = vpop.f32.mrb[30].mxu1 }
 0x121   : > { %v2731_v31 = vpop.f32.mrb[31].mxu1  ;;  %v2175_v36 = vpop.f32.mrb[20].mxu0  ;;  %v1500_v44 = vmul.f32 %v2725_v20, %v1063_v32 }
 0x122   : > { %v2176_v43 = vpop.f32.mrb[21].mxu0 }
 0x123   : > { %v2177_v39 = vadd.f32 %v2176_v43, %v2175_v36  ;;  %v2178_v45 = vpop.f32.mrb[22].mxu0  ;;  %v1537_v43 = vadd.f32 %v2738_v34, %v1498_v2 }
 0x124   : > { %v2179_v57 = vpop.f32.mrb[23].mxu0 }
 0x125   : > { %v1068_v58 = vadd.f32 %v2684_v27, %v2177_v39  ;;  %v2180_v62 = vadd.f32 %v2179_v57, %v2178_v45 }
 0x126   : > { %v2316_v30 = vpop.f32.mrb[32].mxu1 }
 0x127   : > { %v1571_v55 = vmul.f32 %v2316_v30, %v2743_v28  ;;  %v1357_v56 = vpop.f32.mrb[33].mxu1  ;;  %v1071_v27 = vadd.f32 %v2686_v29, %v2180_v62  ;;  %v1499_v29 = vmul.f32 %v2725_v20, %v1060_v23  ;;  %v1501_v48 = vmul.f32 %v2725_v20, %v1068_v58 }
 0x128   : > { %v1569_v60 = vmul.f32 %v2743_v28, %v1357_v56  ;;  %v2317_v63 = vpop.f32.mrb[34].mxu1 }
 0x129   : > { %v1603_v3 = vadd.f32 %v1571_v55, %v1532_v51  ;;  %v1572_v5 = vmul.f32 %v2317_v63, %v2743_v28  ;;  %v1360_v6 = vpop.f32.mrb[35].mxu1  ;;  %v2181_v21 = vpop.f32.mrb[24].mxu0 }
 0x12a   : > { %v1601_v8 = vadd.f32 %v1569_v60, %v1530_v46  ;;  %v1570_v11 = vmul.f32 %v2743_v28, %v1360_v6  ;;  %v2182_v38 = vpop.f32.mrb[25].mxu0  ;;  %v1502_v6 = vmul.f32 %v2725_v20, %v1071_v27 }
 0x12b   : > { %v1642_v15 = vadd.f32 %v2757_v42, %v1603_v3  ;;  %v1604_v16 = vadd.f32 %v1572_v5, %v1533_v4  ;;  %v2183_v45 = vadd.f32 %v2182_v38, %v2181_v21  ;;  %v2184_v46 = vpop.f32.mrb[26].mxu0  ;;  %v1539_v38 = vadd.f32 %v2738_v34, %v1500_v44 }
 0x12c   : > { %v1640_v17 = vadd.f32 %v2757_v42, %v1601_v8  ;;  %v1602_v18 = vadd.f32 %v1570_v11, %v1531_v10  ;;  %v2185_v56 = vpop.f32.mrb[27].mxu0 }
 0x12d   : > { %v1674_v33 = vmax.f32 %v1642_v15, 0.0  ;;  %v1643_v36 = vadd.f32 %v2757_v42, %v1604_v16  ;;  %v1076_v60 = vadd.f32 %v2183_v45, %v2690_v37  ;;  %v2186_v3 = vadd.f32 %v2185_v56, %v2184_v46 }
 0x12e   : > { %v1672_v39 = vmax.f32 %v1640_v17, 0.0  ;;  %v1641_v30 = vadd.f32 %v2757_v42, %v1602_v18  ;;  %v2320_v23 = vpop.f32.mrb[36].mxu1 }
 0x12f   : > { %v2099_v50 = vpack.c.bf16 %v1674_v33, %v1674_v33  ;;  %v1675_v51 = vmax.f32 %v1643_v36, 0.0  ;;  %v1575_v32 = vmul.f32 %v2320_v23, %v2743_v28  ;;  %v1373_v55 = vpop.f32.mrb[37].mxu1  ;;  %v1079_v15 = vadd.f32 %v2186_v3, %v2694_v41 }
 0x130   : > { %v2097_v57 = vpack.c.bf16 %v1672_v39, %v1672_v39  ;;  %v1673_v54 = vmax.f32 %v1641_v30, 0.0  ;;  %v1573_v62 = vmul.f32 %v2743_v28, %v1373_v55  ;;  %v2321_v63 = vpop.f32.mrb[38].mxu1  ;;  %v1540_v36 = vadd.f32 %v2738_v34, %v1501_v48 }
 0x131   : > { %1835 = vst.msk [vmem:[%s2780_s24 + $0x8] sm:$0xf] %vm1832_vm2, %v2099_v50  ;;  %v2100_v2 = vpack.c.bf16 %v1675_v51, %v1675_v51  ;;  %v1607_v58 = vadd.f32 %v1575_v32, %v1536_v24  ;;  %v1576_v4 = vmul.f32 %v2321_v63, %v2743_v28  ;;  %v1376_v5 = vpop.f32.mrb[39].mxu1  ;;  %v2187_v21 = vpop.f32.mrb[28].mxu0  ;;  %v1538_v24 = vadd.f32 %v2738_v34, %v1499_v29 }
 0x132   : > { %1833 = vst.msk [vmem:[%s2780_s24] sm:$0xf] %vm1832_vm2, %v2097_v57  ;;  %v2098_v8 = vpack.c.bf16 %v1673_v54, %v1673_v54  ;;  %v1605_v10 = vadd.f32 %v1573_v62, %v1534_v14  ;;  %v1574_v37 = vmul.f32 %v2743_v28, %v1376_v5  ;;  %v2188_v33 = vpop.f32.mrb[29].mxu0  ;;  %v1503_v23 = vmul.f32 %v2725_v20, %v1076_v60 }
 0x133   : > { %1836 = vst.msk [vmem:[%s2780_s24 + $0xc] sm:$0xf] %vm1832_vm2, %v2100_v2  ;;  %v1646_v11 = vadd.f32 %v2757_v42, %v1607_v58  ;;  %v1608_v16 = vadd.f32 %v1576_v4, %v1537_v43  ;;  %v2189_v43 = vadd.f32 %v2188_v33, %v2187_v21  ;;  %v2190_v45 = vpop.f32.mrb[30].mxu0 }
 0x134   : > { %1834 = vst.msk [vmem:[%s2780_s24 + $0x4] sm:$0xf] %vm1832_vm2, %v2098_v8  ;;  %v1644_v17 = vadd.f32 %v2757_v42, %v1605_v10  ;;  %v1606_v18 = vadd.f32 %v1574_v37, %v1535_v25  ;;  %v1541_v25 = vadd.f32 %v2738_v34, %v1502_v6  ;;  %v2191_v48 = vpop.f32.mrb[31].mxu0 }
 0x135   : > { %v1678_v27 = vmax.f32 %v1646_v11, 0.0  ;;  %v1647_v14 = vadd.f32 %v2757_v42, %v1608_v16  ;;  %v1084_v55 = vadd.f32 %v2688_v35, %v2189_v43  ;;  %v2192_v62 = vadd.f32 %v2191_v48, %v2190_v45 }
 0x136   : > { %v1676_v39 = vmax.f32 %v1644_v17, 0.0  ;;  %v1645_v41 = vadd.f32 %v2757_v42, %v1606_v18  ;;  %v2324_v30 = vpop.f32.mrb[40].mxu1  ;;  %v1542_v16 = vadd.f32 %v2738_v34, %v1503_v23  ;;  %v1504_v17 = vmul.f32 %v2725_v20, %v1079_v15 }
 0x137   : > { %v2103_v29 = vpack.c.bf16 %v1678_v27, %v1678_v27  ;;  %v1679_v46 = vmax.f32 %v1647_v14, 0.0  ;;  %v1579_v50 = vmul.f32 %v2324_v30, %v2743_v28  ;;  %v1389_v51 = vpop.f32.mrb[41].mxu1  ;;  %v1505_v3 = vmul.f32 %v2725_v20, %v1084_v55 }
 0x138   : > { %v2101_v32 = vpack.c.bf16 %v1676_v39, %v1676_v39  ;;  %v1677_v44 = vmax.f32 %v1645_v41, 0.0  ;;  %v1577_v56 = vmul.f32 %v2743_v28, %v1389_v51  ;;  %v2325_v57 = vpop.f32.mrb[42].mxu1  ;;  %v1087_v6 = vadd.f32 %v2692_v40, %v2192_v62 }
 0x139   : > { %1839 = vst.msk [vmem:[%s2780_s24 + $0x18] sm:$0xf] %vm1832_vm2, %v2103_v29  ;;  %v2104_v54 = vpack.c.bf16 %v1679_v46, %v1679_v46  ;;  %v1611_v60 = vadd.f32 %v1579_v50, %v1540_v36  ;;  %v1580_v63 = vmul.f32 %v2325_v57, %v2743_v28  ;;  %v1392_v2 = vpop.f32.mrb[43].mxu1  ;;  %v2193_v11 = vpop.f32.mrb[32].mxu0  ;;  %v1544_v39 = vadd.f32 %v2738_v34, %v1505_v3 }
 0x13a   : > { %1837 = vst.msk [vmem:[%s2780_s24 + $0x10] sm:$0xf] %vm1832_vm2, %v2101_v32  ;;  %v2102_v58 = vpack.c.bf16 %v1677_v44, %v1677_v44  ;;  %v1609_v4 = vadd.f32 %v1577_v56, %v1538_v24  ;;  %v1578_v35 = vmul.f32 %v2743_v28, %v1392_v2  ;;  %v1506_v21 = vmul.f32 %v2725_v20, %v1087_v6  ;;  %v2194_v27 = vpop.f32.mrb[33].mxu0 }
 0x13b   : > { %1840 = vst.msk [vmem:[%s2780_s24 + $0x1c] sm:$0xf] %vm1832_vm2, %v2104_v54  ;;  %v1650_v5 = vadd.f32 %v2757_v42, %v1611_v60  ;;  %v1612_v8 = vadd.f32 %v1580_v63, %v1541_v25  ;;  %v2195_v33 = vadd.f32 %v2194_v27, %v2193_v11  ;;  %v1543_v60 = vadd.f32 %v2738_v34, %v1504_v17 }
 0x13c   : > { %1838 = vst.msk [vmem:[%s2780_s24 + $0x14] sm:$0xf] %vm1832_vm2, %v2102_v58  ;;  %v1648_v10 = vadd.f32 %v2757_v42, %v1609_v4  ;;  %v1610_v37 = vadd.f32 %v1578_v35, %v1539_v38  ;;  %v2196_v38 = vpop.f32.mrb[34].mxu0  ;;  %v1545_v25 = vadd.f32 %v2738_v34, %v1506_v21 }
 0x13d   : > { %v1682_v18 = vmax.f32 %v1650_v5, 0.0  ;;  %v1651_v24 = vadd.f32 %v2757_v42, %v1612_v8  ;;  %v2197_v45 = vpop.f32.mrb[35].mxu0  ;;  %v1092_v46 = vadd.f32 %v2195_v33, %v2698_v49 }
 0x13e   : > { %v1680_v14 = vmax.f32 %v1648_v10, 0.0  ;;  %v1649_v40 = vadd.f32 %v2757_v42, %v1610_v37  ;;  %v2328_v36 = vpop.f32.mrb[44].mxu1  ;;  %v2198_v44 = vadd.f32 %v2197_v45, %v2196_v38 }
 0x13f   : > { %v2107_v41 = vpack.c.bf16 %v1682_v18, %v1682_v18  ;;  %v1683_v43 = vmax.f32 %v1651_v24, 0.0  ;;  %v1583_v15 = vmul.f32 %v2328_v36, %v2743_v28  ;;  %v1405_v30 = vpop.f32.mrb[45].mxu1  ;;  %v1507_v62 = vmul.f32 %v2725_v20, %v1092_v46 }
 0x140   : > { %v2105_v23 = vpack.c.bf16 %v1680_v14, %v1680_v14  ;;  %v1681_v29 = vmax.f32 %v1649_v40, 0.0  ;;  %v1581_v50 = vmul.f32 %v2743_v28, %v1405_v30  ;;  %v2329_v51 = vpop.f32.mrb[46].mxu1  ;;  %v1095_v2 = vadd.f32 %v2198_v44, %v2702_v53 }
 0x141   : > { %1843 = vst.msk [vmem:[%s2780_s24 + $0x28] sm:$0xf] %vm1832_vm2, %v2107_v41  ;;  %v2108_v48 = vpack.c.bf16 %v1683_v43, %v1683_v43  ;;  %v1615_v32 = vadd.f32 %v1583_v15, %v1544_v39  ;;  %v1584_v55 = vmul.f32 %v2329_v51, %v2743_v28  ;;  %v1408_v56 = vpop.f32.mrb[47].mxu1  ;;  %v2199_v35 = vpop.f32.mrb[36].mxu0  ;;  %v1546_v27 = vadd.f32 %v2738_v34, %v1507_v62 }
 0x142   : > { %1841 = vst.msk [vmem:[%s2780_s24 + $0x20] sm:$0xf] %vm1832_vm2, %v2105_v23  ;;  %v2106_v57 = vpack.c.bf16 %v1681_v29, %v1681_v29  ;;  %v1613_v54 = vadd.f32 %v1581_v50, %v1542_v16  ;;  %v1582_v49 = vmul.f32 %v2743_v28, %v1408_v56  ;;  %v1508_v6 = vmul.f32 %v2725_v20, %v1095_v2  ;;  %v2200_v10 = vpop.f32.mrb[37].mxu0 }
 0x143   : > { %1844 = vst.msk [vmem:[%s2780_s24 + $0x2c] sm:$0xf] %vm1832_vm2, %v2108_v48  ;;  %v1654_v63 = vadd.f32 %v2757_v42, %v1615_v32  ;;  %v1616_v58 = vadd.f32 %v1584_v55, %v1545_v25  ;;  %v2201_v16 = vadd.f32 %v2200_v10, %v2199_v35  ;;  %v2202_v53 = vpop.f32.mrb[38].mxu0 }
 0x144   : > { %1842 = vst.msk [vmem:[%s2780_s24 + $0x24] sm:$0xf] %vm1832_vm2, %v2106_v57  ;;  %v1652_v3 = vadd.f32 %v2757_v42, %v1613_v54  ;;  %v1614_v4 = vadd.f32 %v1582_v49, %v1543_v60  ;;  %v2203_v14 = vpop.f32.mrb[39].mxu0  ;;  %v1547_v45 = vadd.f32 %v2738_v34, %v1508_v6 }
 0x145   : > { %v1686_v5 = vmax.f32 %v1654_v63, 0.0  ;;  %v1655_v8 = vadd.f32 %v2757_v42, %v1616_v58  ;;  %v1100_v36 = vadd.f32 %v2696_v47, %v2201_v16  ;;  %v2204_v15 = vadd.f32 %v2203_v14, %v2202_v53 }
 0x146   : > { %v1684_v37 = vmax.f32 %v1652_v3, 0.0  ;;  %v1653_v11 = vadd.f32 %v2757_v42, %v1614_v4  ;;  %v2332_v17 = vpop.f32.mrb[48].mxu1 }
 0x147   : > { %v2111_v18 = vpack.c.bf16 %v1686_v5, %v1686_v5  ;;  %v1687_v21 = vmax.f32 %v1655_v8, 0.0  ;;  %v1421_v24 = vpop.f32.mrb[49].mxu1  ;;  %v1587_v43 = vmul.f32 %v2332_v17, %v2743_v28  ;;  %v1509_v23 = vmul.f32 %v2725_v20, %v1100_v36 }
 0x148   : > { %v2109_v40 = vpack.c.bf16 %v1684_v37, %v1684_v37  ;;  %v1685_v33 = vmax.f32 %v1653_v11, 0.0  ;;  %v1585_v39 = vmul.f32 %v2743_v28, %v1421_v24  ;;  %v2333_v38 = vpop.f32.mrb[50].mxu1  ;;  %v1103_v46 = vadd.f32 %v2700_v52, %v2204_v15 }
 0x149   : > { %1847 = vst.msk [vmem:[%s2780_s24 + $0x38] sm:$0xf] %vm1832_vm2, %v2111_v18  ;;  %v2112_v41 = vpack.c.bf16 %v1687_v21, %v1687_v21  ;;  %v1424_v30 = vpop.f32.mrb[51].mxu1  ;;  %v1548_v50 = vadd.f32 %v2738_v34, %v1509_v23  ;;  %v2205_v32 = vpop.f32.mrb[40].mxu0  ;;  %v1588_v55 = vmul.f32 %v2333_v38, %v2743_v28 }
 0x14a   : > { %1845 = vst.msk [vmem:[%s2780_s24 + $0x30] sm:$0xf] %vm1832_vm2, %v2109_v40  ;;  %v2110_v25 = vpack.c.bf16 %v1685_v33, %v1685_v33  ;;  %v1617_v29 = vadd.f32 %v1585_v39, %v1546_v27  ;;  %v1586_v47 = vmul.f32 %v2743_v28, %v1424_v30  ;;  %v1510_v44 = vmul.f32 %v2725_v20, %v1103_v46  ;;  %v2206_v56 = vpop.f32.mrb[41].mxu0 }
 0x14b   : > { %1848 = vst.msk [vmem:[%s2780_s24 + $0x3c] sm:$0xf] %vm1832_vm2, %v2112_v41  ;;  %v1619_v57 = vadd.f32 %v1587_v43, %v1548_v50  ;;  %v2207_v49 = vadd.f32 %v2206_v56, %v2205_v32  ;;  %v2208_v52 = vpop.f32.mrb[42].mxu0 }
 0x14c   : > { %1846 = vst.msk [vmem:[%s2780_s24 + $0x34] sm:$0xf] %vm1832_vm2, %v2110_v25  ;;  %v1656_v51 = vadd.f32 %v2757_v42, %v1617_v29  ;;  %v1618_v48 = vadd.f32 %v1586_v47, %v1547_v45  ;;  %v1549_v63 = vadd.f32 %v2738_v34, %v1510_v44  ;;  %v2209_v2 = vpop.f32.mrb[43].mxu0 }
 0x14d   : > { %v1658_v3 = vadd.f32 %v2757_v42, %v1619_v57  ;;  %v1108_v5 = vadd.f32 %v2207_v49, %v2706_v61  ;;  %v2210_v10 = vadd.f32 %v2209_v2, %v2208_v52 }
 0x14e   : > { %v1688_v54 = vmax.f32 %v1656_v51, 0.0  ;;  %v1657_v60 = vadd.f32 %v2757_v42, %v1618_v48  ;;  %v2336_v62 = vpop.f32.mrb[52].mxu1  ;;  %v1620_v8 = vadd.f32 %v1588_v55, %v1549_v63 }
 0x14f   : > { %v1437_v58 = vpop.f32.mrb[53].mxu1  ;;  %v1690_v11 = vmax.f32 %v1658_v3, 0.0  ;;  %v1511_v17 = vmul.f32 %v2725_v20, %v1108_v5  ;;  %v1111_v21 = vadd.f32 %v2210_v10, %v2710_v1  ;;  %v1591_v32 = vmul.f32 %v2336_v62, %v2743_v28 }
 0x150   : > { %v2113_v4 = vpack.c.bf16 %v1688_v54, %v1688_v54  ;;  %v1689_v35 = vmax.f32 %v1657_v60, 0.0  ;;  %v2337_v6 = vpop.f32.mrb[54].mxu1  ;;  %v1589_v53 = vmul.f32 %v2743_v28, %v1437_v58  ;;  %v1659_v18 = vadd.f32 %v2757_v42, %v1620_v8 }
 0x151   : > { %v1440_v37 = vpop.f32.mrb[55].mxu1  ;;  %v2115_v24 = vpack.c.bf16 %v1690_v11, %v1690_v11  ;;  %v1550_v61 = vadd.f32 %v2738_v34, %v1511_v17  ;;  %v2211_v27 = vpop.f32.mrb[44].mxu0  ;;  %v1512_v40 = vmul.f32 %v2725_v20, %v1111_v21  ;;  %v1592_v54 = vmul.f32 %v2337_v6, %v2743_v28 }
 0x152   : > { %1849 = vst.msk [vmem:[%s2780_s24 + $0x40] sm:$0xf] %vm1832_vm2, %v2113_v4  ;;  %v2114_v16 = vpack.c.bf16 %v1689_v35, %v1689_v35  ;;  %v1691_v14 = vmax.f32 %v1659_v18, 0.0  ;;  %v2212_v33 = vpop.f32.mrb[45].mxu0  ;;  %v1590_v36 = vmul.f32 %v2743_v28, %v1440_v37 }
 0x153   : > { %1851 = vst.msk [vmem:[%s2780_s24 + $0x48] sm:$0xf] %vm1832_vm2, %v2115_v24  ;;  %v1621_v39 = vadd.f32 %v1589_v53, %v1550_v61  ;;  %v2213_v38 = vadd.f32 %v2212_v33, %v2211_v27  ;;  %v2214_v41 = vpop.f32.mrb[46].mxu0  ;;  %v1551_v15 = vadd.f32 %v2738_v34, %v1512_v40 }
 0x154   : > { %1850 = vst.msk [vmem:[%s2780_s24 + $0x44] sm:$0xf] %vm1832_vm2, %v2114_v16  ;;  %v2116_v1 = vpack.c.bf16 %v1691_v14, %v1691_v14  ;;  %v2215_v30 = vpop.f32.mrb[47].mxu0 }
 0x155   : > { %v1660_v23 = vadd.f32 %v2757_v42, %v1621_v39  ;;  %v1116_v29 = vadd.f32 %v2704_v59, %v2213_v38  ;;  %v2216_v47 = vadd.f32 %v2215_v30, %v2214_v41  ;;  %v1622_v50 = vadd.f32 %v1590_v36, %v1551_v15 }
 0x156   : > { %v2340_v43 = vpop.f32.mrb[56].mxu1  ;;  %1852 = vst.msk [vmem:[%s2780_s24 + $0x4c] sm:$0xf] %vm1832_vm2, %v2116_v1 }
 0x157   : > { %v2892_v45 = vmul.f32 %v2340_v43, %v2743_v28  ;;  %v1453_v25 = vpop.f32.mrb[57].mxu1  ;;  %v1692_v44 = vmax.f32 %v1660_v23, 0.0  ;;  %v1513_v55 = vmul.f32 %v2725_v20, %v1116_v29  ;;  %v1119_v56 = vadd.f32 %v2708_v0, %v2216_v47 }
 0x158   : > { %v2341_v46 = vpop.f32.mrb[58].mxu1  ;;  %v1661_v57 = vadd.f32 %v2757_v42, %v1622_v50  ;;  %v1593_v53 = vmul.f32 %v2743_v28, %v1453_v25 }
 0x159   : > { %v2899_v51 = vmul.f32 %v2341_v46, %v2743_v28  ;;  %v1456_v48 = vpop.f32.mrb[59].mxu1  ;;  %v2117_v59 = vpack.c.bf16 %v1692_v44, %v1692_v44  ;;  %v1552_v60 = vadd.f32 %v2738_v34, %v1513_v55  ;;  %v1514_v49 = vmul.f32 %v2725_v20, %v1119_v56  ;;  %v2217_v52 = vpop.f32.mrb[48].mxu0 }
 0x15a   : > { %v1693_v63 = vmax.f32 %v1661_v57, 0.0  ;;  %v2218_v2 = vpop.f32.mrb[49].mxu0  ;;  %v1594_v40 = vmul.f32 %v2743_v28, %v1456_v48 }
 0x15b   : > { %1853 = vst.msk [vmem:[%s2780_s24 + $0x50] sm:$0xf] %vm1832_vm2, %v2117_v59  ;;  %v1623_v62 = vadd.f32 %v1591_v32, %v1552_v60  ;;  %v1553_v58 = vadd.f32 %v2738_v34, %v1514_v49  ;;  %v2219_v3 = vadd.f32 %v2218_v2, %v2217_v52  ;;  %v2220_v0 = vpop.f32.mrb[50].mxu0 }
 0x15c   : > { %v2118_v35 = vpack.c.bf16 %v1693_v63, %v1693_v63  ;;  %v2221_v5 = vpop.f32.mrb[51].mxu0 }
 0x15d   : > { %v1662_v10 = vadd.f32 %v2757_v42, %v1623_v62  ;;  %v1624_v37 = vadd.f32 %v1592_v54, %v1553_v58  ;;  %v1124_v11 = vadd.f32 %v2219_v3, %v2714_v9  ;;  %v2222_v16 = vadd.f32 %v2221_v5, %v2220_v0 }
 0x15e   : > { %v2344_v4 = vpop.f32.mrb[60].mxu1  ;;  %1854 = vst.msk [vmem:[%s2780_s24 + $0x54] sm:$0xf] %vm1832_vm2, %v2118_v35 }
 0x15f   : > { %v2912_v6 = vmul.f32 %v2344_v4, %v2743_v28  ;;  %v1469_v8 = vpop.f32.mrb[61].mxu1  ;;  %v1694_v61 = vmax.f32 %v1662_v10, 0.0  ;;  %v1663_v27 = vadd.f32 %v2757_v42, %v1624_v37  ;;  %v1515_v14 = vmul.f32 %v2725_v20, %v1124_v11 }
 0x160   : > { %v2345_v17 = vpop.f32.mrb[62].mxu1  ;;  %v1597_v18 = vmul.f32 %v2743_v28, %v1469_v8  ;;  %v1127_v9 = vadd.f32 %v2222_v16, %v2718_v13 }
 0x161   : > { %v2921_v21 = vmul.f32 %v2345_v17, %v2743_v28  ;;  %v1472_v24 = vpop.f32.mrb[63].mxu1  ;;  %v2119_v36 = vpack.c.bf16 %v1694_v61, %v1694_v61  ;;  %v1695_v39 = vmax.f32 %v1663_v27, 0.0  ;;  %v1554_v41 = vadd.f32 %v2738_v34, %v1515_v14  ;;  %v2223_v43 = vpop.f32.mrb[52].mxu0 }
 0x162   : > { %v1598_v33 = vmul.f32 %v2743_v28, %v1472_v24  ;;  %v1516_v38 = vmul.f32 %v2725_v20, %v1127_v9  ;;  %v2224_v1 = vpop.f32.mrb[53].mxu0 }
 0x163   : > { %1855 = vst.msk [vmem:[%s2780_s24 + $0x58] sm:$0xf] %vm1832_vm2, %v2119_v36  ;;  %v2120_v15 = vpack.c.bf16 %v1695_v39, %v1695_v39  ;;  %v1625_v30 = vadd.f32 %v1593_v53, %v1554_v41  ;;  %v2225_v25 = vadd.f32 %v2224_v1, %v2223_v43  ;;  %v2226_v23 = vpop.f32.mrb[54].mxu0 }
 0x164   : > { %v1555_v13 = vadd.f32 %v2738_v34, %v1516_v38  ;;  %v2227_v29 = vpop.f32.mrb[55].mxu0 }
 0x165   : > { %1856 = vst.msk [vmem:[%s2780_s24 + $0x5c] sm:$0xf] %vm1832_vm2, %v2120_v15  ;;  %v1664_v28 = vadd.f32 %v2757_v42, %v1625_v30  ;;  %v1132_v47 = vadd.f32 %v2712_v7, %v2225_v25  ;;  %v2228_v50 = vadd.f32 %v2227_v29, %v2226_v23 }
 0x166   : > { %v1626_v46 = vadd.f32 %v1594_v40, %v1555_v13 }
 0x167   : > { %v1696_v48 = vmax.f32 %v1664_v28, 0.0  ;;  %v1517_v32 = vmul.f32 %v2725_v20, %v1132_v47  ;;  %v1135_v55 = vadd.f32 %v2716_v12, %v2228_v50 }
 0x168   : > { %v1665_v44 = vadd.f32 %v2757_v42, %v1626_v46 }
 0x169   : > { %v2121_v56 = vpack.c.bf16 %v1696_v48, %v1696_v48  ;;  %v1556_v57 = vadd.f32 %v2738_v34, %v1517_v32  ;;  %v1518_v54 = vmul.f32 %v2725_v20, %v1135_v55  ;;  %v2229_v60 = vpop.f32.mrb[56].mxu0 }
 0x16a   : > { %v1697_v59 = vmax.f32 %v1665_v44, 0.0  ;;  %v2230_v49 = vpop.f32.mrb[57].mxu0 }
 0x16b   : > { %1857 = vst.msk [vmem:[%s2780_s24 + $0x60] sm:$0xf] %vm1832_vm2, %v2121_v56  ;;  %v1627_v7 = vadd.f32 %v2892_v45, %v1556_v57  ;;  %v1557_v63 = vadd.f32 %v2738_v34, %v1518_v54  ;;  %v2231_v2 = vadd.f32 %v2230_v49, %v2229_v60  ;;  %v2232_v62 = vpop.f32.mrb[58].mxu0 }
 0x16c   : > { %v2122_v52 = vpack.c.bf16 %v1697_v59, %v1697_v59  ;;  %v2233_v58 = vpop.f32.mrb[59].mxu0 }
 0x16d   : > { %v1666_v12 = vadd.f32 %v2757_v42, %v1627_v7  ;;  %v1628_v3 = vadd.f32 %v2899_v51, %v1557_v63  ;;  %v1140_v0 = vadd.f32 %v2231_v2, %v2727_v22  ;;  %v2234_v4 = vadd.f32 %v2233_v58, %v2232_v62 }
 0x16e   : > { %1858 = vst.msk [vmem:[%s2780_s24 + $0x64] sm:$0xf] %vm1832_vm2, %v2122_v52 }
 0x16f   : > { %v1698_v35 = vmax.f32 %v1666_v12, 0.0  ;;  %v1667_v5 = vadd.f32 %v2757_v42, %v1628_v3  ;;  %v1519_v45 = vmul.f32 %v2725_v20, %v1140_v0  ;;  %v1143_v8 = vadd.f32 %v2234_v4, %v2731_v31 }
 0x171   : > { %v2123_v10 = vpack.c.bf16 %v1698_v35, %v1698_v35  ;;  %v1699_v37 = vmax.f32 %v1667_v5, 0.0  ;;  %v1520_v11 = vmul.f32 %v2725_v20, %v1143_v8  ;;  %v1558_v16 = vadd.f32 %v2738_v34, %v1519_v45  ;;  %v2235_v17 = vpop.f32.mrb[60].mxu0 }
 0x172   : > { %v2236_v53 = vpop.f32.mrb[61].mxu0 }
 0x173   : > { %1859 = vst.msk [vmem:[%s2780_s24 + $0x68] sm:$0xf] %vm1832_vm2, %v2123_v10  ;;  %v2124_v22 = vpack.c.bf16 %v1699_v37, %v1699_v37  ;;  %v1629_v51 = vadd.f32 %v1597_v18, %v1558_v16  ;;  %v2237_v24 = vadd.f32 %v2236_v53, %v2235_v17  ;;  %v1559_v61 = vadd.f32 %v2738_v34, %v1520_v11  ;;  %v2238_v27 = vpop.f32.mrb[62].mxu0 }
 0x174   : > { %v2239_v14 = vpop.f32.mrb[63].mxu0 }
 0x175   : > { %1860 = vst.msk [vmem:[%s2780_s24 + $0x6c] sm:$0xf] %vm1832_vm2, %v2124_v22  ;;  %v1668_v31 = vadd.f32 %v2757_v42, %v1629_v51  ;;  %v1148_v9 = vadd.f32 %v2720_v19, %v2237_v24  ;;  %v1630_v40 = vadd.f32 %v1598_v33, %v1559_v61  ;;  %v2240_v36 = vadd.f32 %v2239_v14, %v2238_v27 }
 0x177   : > { %v1700_v39 = vmax.f32 %v1668_v31, 0.0  ;;  %v1521_v38 = vmul.f32 %v2725_v20, %v1148_v9  ;;  %v1669_v18 = vadd.f32 %v2757_v42, %v1630_v40  ;;  %v1151_v41 = vadd.f32 %v2729_v26, %v2240_v36 }
 0x179   : > { %v2125_v43 = vpack.c.bf16 %v1700_v39, %v1700_v39  ;;  %v1560_v1 = vadd.f32 %v2738_v34, %v1521_v38  ;;  %v1701_v15 = vmax.f32 %v1669_v18, 0.0  ;;  %v1522_v30 = vmul.f32 %v2725_v20, %v1151_v41 }
 0x17b   : > { %1861 = vst.msk [vmem:[%s2780_s24 + $0x70] sm:$0xf] %vm1832_vm2, %v2125_v43  ;;  %v1631_v19 = vadd.f32 %v2912_v6, %v1560_v1  ;;  %v2126_v33 = vpack.c.bf16 %v1701_v15, %v1701_v15  ;;  %v1561_v25 = vadd.f32 %v2738_v34, %v1522_v30 }
 0x17d   : > { %v1670_v13 = vadd.f32 %v2757_v42, %v1631_v19  ;;  %1862 = vst.msk [vmem:[%s2780_s24 + $0x74] sm:$0xf] %vm1832_vm2, %v2126_v33  ;;  %v1632_v26 = vadd.f32 %v2921_v21, %v1561_v25 }
 0x17f   : > { %v1702_v23 = vmax.f32 %v1670_v13, 0.0  ;;  %v1671_v29 = vadd.f32 %v2757_v42, %v1632_v26 }
 0x181   : > { %v2127_v28 = vpack.c.bf16 %v1702_v23, %v1702_v23  ;;  %v1703_v47 = vmax.f32 %v1671_v29, 0.0 }
 0x183   : > { %1863 = vst.msk [vmem:[%s2780_s24 + $0x78] sm:$0xf] %vm1832_vm2, %v2127_v28  ;;  %v2128_v20 = vpack.c.bf16 %v1703_v47, %v1703_v47 }
 0x185   : > { %1864 = vst.msk [vmem:[%s2780_s24 + $0x7c] sm:$0xf] %vm1832_vm2, %v2128_v20 }
 0x186 PF: > { %s18_s27 = sadd.s32 1, %s2460_s27  }
 0x187   : > { %p15_p4 = scmp.ge.s32.totalorder %s18_s27, 4  }
 0x189   :  { %17 = sbr.rel (!%p15_p4) target bundleno = 1 (0x1), region = 85 }

// kernel: _lambda_.13
= control target key start
LH: loop header
LB: loop body
LE: loop exit
PB: predicated region body
PF: predicated region fallthrough
CT: control target
= control target key end

     0   :  { %vm314_vm0 = vcmask 261120   ;;  %vm659_vm1 = vcmask 519168   ;;  %s1201_s1 = inlined_call_operand.vmem [shape: bf16[288,64], index: 1, kind: input, shape index: {}]   ;;  %s1202_s0 = inlined_call_operand.vmem [shape: bf16[128,288], index: 0, kind: input, shape index: {}]   ;;  %s1203_s2 = inlined_call_operand.vmem [shape: f32[1,64], index: 2, kind: input, shape index: {}]   ;;  %s1204_s3 = inlined_call_operand.vmem [shape: f32[1,64], index: 3, kind: input, shape index: {}]   ;;  %s1205_s4 = inlined_call_operand.vmem [shape: bf16[128,64], index: 4, kind: output, shape index: {}]  }
   0x1   :  { %v874_v0 = vld [vmem:[%s1201_s1 + $0x40] sm:$0xff]   ;;  %v876_v2 = vld [vmem:[%s1201_s1 + $0x48] sm:$0xff]   ;;  %v878_v4 = vld [vmem:[%s1201_s1 + $0x50] sm:$0xff]  }
   0x2   :  { %v875_v1 = vld [vmem:[%s1201_s1] sm:$0xff]   ;;  %764 = vmatprep.subr.bf16.mxu0 %v874_v0  ;;  %858 = vmatprep.subr.bf16.mxu1 %v874_v0  ;;  %v877_v3 = vld [vmem:[%s1201_s1 + $0x8] sm:$0xff]   ;;  %v879_v5 = vld [vmem:[%s1201_s1 + $0x10] sm:$0xff]  }
   0x3   :  { %765 = vmatpush3.bf16.msra.mxu0 %v875_v1  ;;  %866 = vmatpush3.bf16.msra.mxu1 %v875_v1  ;;  %v880_v6 = vld [vmem:[%s1201_s1 + $0x58] sm:$0xff]   ;;  %v882_v8 = vld [vmem:[%s1201_s1 + $0x60] sm:$0xff]   ;;  %v884_v10 = vld [vmem:[%s1201_s1 + $0x68] sm:$0xff]  }
   0x4   :  { %766 = vmatprep.subr.bf16.mxu0 %v876_v2  ;;  %859 = vmatprep.subr.bf16.mxu1 %v876_v2  ;;  %v881_v7 = vld [vmem:[%s1201_s1 + $0x18] sm:$0xff]   ;;  %v883_v9 = vld [vmem:[%s1201_s1 + $0x20] sm:$0xff]   ;;  %v885_v13 = vld [vmem:[%s1201_s1 + $0x28] sm:$0xff]  }
   0x5   :  { %v892_v11 = vld [vmem:[%s1202_s0 + $0x4] ss:$12 sps:$4 sm:$0xff]   ;;  %v895_v12 = vld [vmem:[%s1202_s0 + $0x94] ss:$12 sps:$4 sm:$0xff]   ;;  %v888_v16 = vld [vmem:[%s1201_s1 + $0x78] sm:$0xff]  }
   0x6   :  { %v886_v14 = vld [vmem:[%s1201_s1 + $0x70] sm:$0xff]   ;;  %371 = vmatprep.mubr.bf16.mxu0 %v892_v11  ;;  %419 = vmatprep.mubr.bf16.mxu1 %v895_v12  ;;  %v889_v17 = vld [vmem:[%s1201_s1 + $0x38] sm:$0xff]   ;;  %v890_v18 = vld [vmem:[%s1202_s0] ss:$12 sps:$4 sm:$0xff]  }
   0x7   :  { %767 = vmatpush3.bf16.msra.mxu0 %v877_v3  ;;  %867 = vmatpush3.bf16.msra.mxu1 %v877_v3  ;;  %v887_v15 = vld [vmem:[%s1201_s1 + $0x30] sm:$0xff]   ;;  %v896_v19 = vld [vmem:[%s1201_s1 + $0x80] sm:$0xff]   ;;  %v897_v21 = vld [vmem:[%s1202_s0 + $0x1c] ss:$12 sps:$4 sm:$0xff]  }
   0x8   :  { %768 = vmatprep.subr.bf16.mxu0 %v878_v4  ;;  %860 = vmatprep.subr.bf16.mxu1 %v878_v4  ;;  %v893_v20 = vld [vmem:[%s1202_s0 + $0x90] ss:$12 sps:$4 sm:$0xff]   ;;  %v899_v22 = vld [vmem:[%s1202_s0 + $0xac] ss:$12 sps:$4 sm:$0xff]   ;;  %v902_v25 = vld [vmem:[%s1202_s0 + $0xa8] ss:$12 sps:$4 sm:$0xff]  }
   0x9   :  { %v903_v23 = vld [vmem:[%s1201_s1 + $0x88] sm:$0xff]   ;;  %v901_v24 = vld [vmem:[%s1202_s0 + $0x18] ss:$12 sps:$4 sm:$0xff]   ;;  %v904_v26 = vld [vmem:[%s1202_s0 + $0x34] ss:$12 sps:$4 sm:$0xff]  }
   0xa   :  { %v906_v27 = vld [vmem:[%s1202_s0 + $0x8] ss:$12 sps:$4 sm:$0xff]   ;;  %v907_v28 = vld [vmem:[%s1202_s0 + $0x30] ss:$12 sps:$4 sm:$0xff]   ;;  %v908_v29 = vld [vmem:[%s1202_s0 + $0x20] ss:$12 sps:$4 sm:$0xff]  }
   0xb   :  { %769 = vmatpush3.bf16.msra.mxu0 %v879_v5  ;;  %868 = vmatpush3.bf16.msra.mxu1 %v879_v5  ;;  %v909_v30 = vld [vmem:[%s1202_s0 + $0x4c] ss:$12 sps:$4 sm:$0xff]   ;;  %v912_v32 = vld [vmem:[%s1202_s0 + $0x48] ss:$12 sps:$4 sm:$0xff]   ;;  %v913_v33 = vld [vmem:[%s1202_s0 + $0x50] ss:$12 sps:$4 sm:$0xff]  }
   0xc   :  { %770 = vmatprep.subr.bf16.mxu0 %v880_v6  ;;  %861 = vmatprep.subr.bf16.mxu1 %v880_v6  ;;  %v911_v31 = vld [vmem:[%s1202_s0 + $0x38] ss:$12 sps:$4 sm:$0xff]   ;;  %v916_v35 = vld [vmem:[%s1202_s0 + $0x68] ss:$12 sps:$4 sm:$0xff]   ;;  %v917_v36 = vld [vmem:[%s1202_s0 + $0x60] ss:$12 sps:$4 sm:$0xff]  }
   0xd   :  { %v914_v34 = vld [vmem:[%s1202_s0 + $0x64] ss:$12 sps:$4 sm:$0xff]   ;;  %v918_v37 = vld [vmem:[%s1202_s0 + $0x80] ss:$12 sps:$4 sm:$0xff]   ;;  %v919_v38 = vld [vmem:[%s1202_s0 + $0x7c] ss:$12 sps:$4 sm:$0xff]  }
   0xe   :  { %v921_v39 = vld [vmem:[%s1202_s0 + $0x98] ss:$12 sps:$4 sm:$0xff]   ;;  %v923_v41 = vld [vmem:[%s1202_s0 + $0xb0] ss:$12 sps:$4 sm:$0xff]   ;;  %v1094_v4 = vld [vmem:[%s1203_s2] ss:$0 sm:$0xff] }
   0xf   :  { %771 = vmatpush3.bf16.msra.mxu0 %v881_v7  ;;  %869 = vmatpush3.bf16.msra.mxu1 %v881_v7  ;;  %v922_v40 = vld [vmem:[%s1202_s0 + $0x78] ss:$12 sps:$4 sm:$0xff]  }
  0x10   :  { %772 = vmatprep.subr.bf16.mxu0 %v882_v8  ;;  %862 = vmatprep.subr.bf16.mxu1 %v882_v8  ;;  %v1099_v8 = vld [vmem:[%s1204_s3] ss:$0 sm:$0xff] }
  0x13   :  { %773 = vmatpush3.bf16.msra.mxu0 %v883_v9  ;;  %870 = vmatpush3.bf16.msra.mxu1 %v883_v9 }
  0x14   :  { %774 = vmatprep.subr.bf16.mxu0 %v884_v10  ;;  %863 = vmatprep.subr.bf16.mxu1 %v884_v10 }
  0x17   :  { %775 = vmatpush3.bf16.msra.mxu0 %v885_v13  ;;  %871 = vmatpush3.bf16.msra.mxu1 %v885_v13 }
  0x18   :  { %776 = vmatprep.subr.bf16.mxu0 %v886_v14  ;;  %864 = vmatprep.subr.bf16.mxu1 %v886_v14 }
  0x1b   :  { %777 = vmatpush3.bf16.msra.mxu0 %v887_v15  ;;  %872 = vmatpush3.bf16.msra.mxu1 %v887_v15 }
  0x1c   :  { %778 = vmatprep.subr.bf16.mxu0 %v888_v16  ;;  %865 = vmatprep.subr.bf16.mxu1 %v888_v16 }
  0x1f   :  { %779 = vmatpush3.bf16.msra.mxu0 %v889_v17  ;;  %873 = vmatpush3.bf16.msra.mxu1 %v889_v17 }
  0x20   :  { %838 = vmatprep.subr.bf16.mxu1 %v896_v19 }
  0x22   :  { %372 = vmatmul.mubr.bf16.vlgmr.msra.gmra.mrb[0].mxu0 %v890_v18  ;;  %420 = vmatmul.mubr.bf16.vlgmr.msra.gmra.mrb[0].mxu1 %v893_v20 }
  0x23   :  { %839 = vmatpush3.bf16.msra.mxu1 %v896_v19  ;;  %379 = vmatprep.mubr.bf16.mxu0 %v897_v21 }
  0x24   :  { %427 = vmatprep.mubr.bf16.mxu1 %v899_v22  ;;  %840 = vmatprep.subr.bf16.mxu1 %v903_v23 }
  0x27   :  { %841 = vmatpush3.bf16.msra.mxu1 %v903_v23 }
  0x2a   :  { %380 = vmatmul.mubr.bf16.gmra.mrb[4].mxu0 %v901_v24  ;;  %428 = vmatmul.mubr.bf16.gmra.mrb[4].mxu1 %v902_v25 }
  0x2b   :  { %387 = vmatprep.mubr.bf16.mxu0 %v904_v26  ;;  %842 = vmatprep.mubr.msk.bf16.mxu1 %vm314_vm0, %v906_v27 }
  0x32   :  { %388 = vmatmul.mubr.bf16.gmra.mrb[8].mxu0 %v907_v28  ;;  %843 = vmatmul.mubr.msk.bf16.vlgmr.msra.gmra.mrb[8].mxu1 %vm314_vm0, %v908_v29 }
  0x33   :  { %395 = vmatprep.mubr.bf16.mxu0 %v909_v30  ;;  %846 = vmatprep.mubr.msk.bf16.mxu1 %vm314_vm0, %v911_v31 }
  0x3a   :  { %396 = vmatmul.mubr.bf16.gmra.mrb[12].mxu0 %v912_v32  ;;  %847 = vmatmul.mubr.msk.bf16.gmra.mrb[12].mxu1 %vm314_vm0, %v913_v33 }
  0x3b   :  { %403 = vmatprep.mubr.bf16.mxu0 %v914_v34  ;;  %850 = vmatprep.mubr.msk.bf16.mxu1 %vm314_vm0, %v916_v35 }
  0x42   :  { %404 = vmatmul.mubr.bf16.gmra.mrb[16].mxu0 %v917_v36  ;;  %851 = vmatmul.mubr.msk.bf16.gmra.mrb[16].mxu1 %vm314_vm0, %v918_v37 }
  0x43   :  { %411 = vmatprep.mubr.bf16.mxu0 %v919_v38  ;;  %854 = vmatprep.mubr.msk.bf16.mxu1 %vm314_vm0, %v921_v39 }
  0x4a   :  { %412 = vmatmul.mubr.bf16.gmra.mrb[20].mxu0 %v922_v40  ;;  %855 = vmatmul.mubr.msk.bf16.gmra.mrb[20].mxu1 %vm314_vm0, %v923_v41 }
  0xf5   :  { %v780_v42 = vpop.f32.mrb[0].mxu0  ;;  %v816_v43 = vpop.f32.mrb[0].mxu1 }
  0xf6   :  { %v781_v44 = vpop.f32.mrb[1].mxu0  ;;  %v817_v45 = vpop.f32.mrb[1].mxu1 }
  0xf7   :  { %v782_v46 = vadd.f32 %v781_v44, %v780_v42  ;;  %v1083_v47 = vadd.f32 %v817_v45, %v816_v43  ;;  %v783_v48 = vpop.f32.mrb[2].mxu0  ;;  %v819_v49 = vpop.f32.mrb[2].mxu1 }
  0xf8   :  { %v784_v50 = vpop.f32.mrb[3].mxu0  ;;  %v820_v51 = vpop.f32.mrb[3].mxu1 }
  0xf9   :  { %v785_v52 = vadd.f32 %v784_v50, %v783_v48  ;;  %v1085_v53 = vadd.f32 %v820_v51, %v819_v49 }
  0xfd   :  { %v786_v54 = vpop.f32.mrb[4].mxu0  ;;  %v822_v55 = vpop.f32.mrb[4].mxu1 }
  0xfe   :  { %v787_v56 = vpop.f32.mrb[5].mxu0  ;;  %v823_v57 = vpop.f32.mrb[5].mxu1 }
  0xff   :  { %v788_v58 = vadd.f32 %v787_v56, %v786_v54  ;;  %v1087_v59 = vadd.f32 %v823_v57, %v822_v55  ;;  %v789_v60 = vpop.f32.mrb[6].mxu0  ;;  %v825_v61 = vpop.f32.mrb[6].mxu1 }
 0x100   :  { %v790_v62 = vpop.f32.mrb[7].mxu0  ;;  %v826_v63 = vpop.f32.mrb[7].mxu1 }
 0x101   :  { %v791_v0 = vadd.f32 %v790_v62, %v789_v60  ;;  %v1089_v1 = vadd.f32 %v826_v63, %v825_v61 }
 0x105   :  { %v792_v2 = vpop.f32.mrb[8].mxu0  ;;  %v844_v3 = vpop.f32.mrb[8].mxu1 }
 0x106   :  { %v479_v5 = vadd.f32 %v844_v3, %v788_v58  ;;  %v793_v6 = vpop.f32.mrb[9].mxu0  ;;  %v470_v7 = vpop.f32.mrb[9].mxu1 }
 0x107   :  { %v794_v9 = vadd.f32 %v793_v6, %v792_v2  ;;  %v471_v10 = vadd.f32 %v782_v46, %v470_v7  ;;  %v795_v11 = vpop.f32.mrb[10].mxu0  ;;  %v845_v12 = vpop.f32.mrb[10].mxu1 }
 0x108   :  { %v542_v13 = vmul.f32 %v1094_v4, %v479_v5  ;;  %v482_v14 = vadd.f32 %v845_v12, %v791_v0  ;;  %v796_v15 = vpop.f32.mrb[11].mxu0  ;;  %v473_v16 = vpop.f32.mrb[11].mxu1 }
 0x109   :  { %v540_v17 = vmul.f32 %v1094_v4, %v471_v10  ;;  %v797_v18 = vadd.f32 %v796_v15, %v795_v11  ;;  %v474_v19 = vadd.f32 %v785_v52, %v473_v16 }
 0x10a   :  { %v565_v20 = vadd.f32 %v1099_v8, %v542_v13  ;;  %v543_v21 = vmul.f32 %v1094_v4, %v482_v14 }
 0x10b   :  { %v563_v22 = vadd.f32 %v1099_v8, %v540_v17  ;;  %v541_v23 = vmul.f32 %v1094_v4, %v474_v19 }
 0x10c   :  { %v581_v24 = vmax.f32 %v565_v20, 0.0  ;;  %v566_v25 = vadd.f32 %v1099_v8, %v543_v21 }
 0x10d   :  { %v579_v26 = vmax.f32 %v563_v22, 0.0  ;;  %v564_v27 = vadd.f32 %v1099_v8, %v541_v23  ;;  %v798_v28 = vpop.f32.mrb[12].mxu0  ;;  %v848_v29 = vpop.f32.mrb[12].mxu1 }
 0x10e   :  { %v750_v30 = vpack.c.bf16 %v581_v24, %v581_v24  ;;  %v582_v31 = vmax.f32 %v566_v25, 0.0  ;;  %v799_v32 = vpop.f32.mrb[13].mxu0  ;;  %v486_v33 = vpop.f32.mrb[13].mxu1 }
 0x10f   :  { %v748_v34 = vpack.c.bf16 %v579_v26, %v579_v26  ;;  %v580_v35 = vmax.f32 %v564_v27, 0.0  ;;  %v800_v36 = vadd.f32 %v799_v32, %v798_v28  ;;  %v487_v37 = vadd.f32 %v794_v9, %v486_v33  ;;  %v801_v38 = vpop.f32.mrb[14].mxu0  ;;  %v849_v39 = vpop.f32.mrb[14].mxu1 }
 0x110   :  { %662 = vst.msk [vmem:[%s1205_s4 + $0x8] sm:$0xf] %vm659_vm1, %v750_v30  ;;  %v751_v40 = vpack.c.bf16 %v582_v31, %v582_v31  ;;  %v802_v41 = vpop.f32.mrb[15].mxu0  ;;  %v489_v42 = vpop.f32.mrb[15].mxu1 }
 0x111   :  { %660 = vst.msk [vmem:[%s1205_s4] sm:$0xf] %vm659_vm1, %v748_v34  ;;  %v749_v43 = vpack.c.bf16 %v580_v35, %v580_v35  ;;  %v495_v44 = vadd.f32 %v848_v29, %v800_v36  ;;  %v544_v45 = vmul.f32 %v1094_v4, %v487_v37  ;;  %v803_v46 = vadd.f32 %v802_v41, %v801_v38 }
 0x112   :  { %663 = vst.msk [vmem:[%s1205_s4 + $0xc] sm:$0xf] %vm659_vm1, %v751_v40  ;;  %v490_v48 = vadd.f32 %v797_v18, %v489_v42 }
 0x113   :  { %661 = vst.msk [vmem:[%s1205_s4 + $0x4] sm:$0xf] %vm659_vm1, %v749_v43  ;;  %v546_v49 = vmul.f32 %v1094_v4, %v495_v44  ;;  %v567_v50 = vadd.f32 %v1099_v8, %v544_v45  ;;  %v498_v51 = vadd.f32 %v849_v39, %v803_v46 }
 0x114   :  { %v545_v52 = vmul.f32 %v1094_v4, %v490_v48 }
 0x115   :  { %v569_v54 = vadd.f32 %v1099_v8, %v546_v49  ;;  %v583_v55 = vmax.f32 %v567_v50, 0.0  ;;  %v547_v56 = vmul.f32 %v1094_v4, %v498_v51  ;;  %v804_v57 = vpop.f32.mrb[16].mxu0  ;;  %v852_v58 = vpop.f32.mrb[16].mxu1 }
 0x116   :  { %v568_v60 = vadd.f32 %v1099_v8, %v545_v52  ;;  %v805_v61 = vpop.f32.mrb[17].mxu0  ;;  %v502_v62 = vpop.f32.mrb[17].mxu1 }
 0x117   :  { %v585_v63 = vmax.f32 %v569_v54, 0.0  ;;  %v752_v0 = vpack.c.bf16 %v583_v55, %v583_v55  ;;  %v570_v2 = vadd.f32 %v1099_v8, %v547_v56  ;;  %v806_v3 = vadd.f32 %v805_v61, %v804_v57  ;;  %v807_v5 = vpop.f32.mrb[18].mxu0  ;;  %v853_v6 = vpop.f32.mrb[18].mxu1 }
 0x118   :  { %v584_v7 = vmax.f32 %v568_v60, 0.0  ;;  %v808_v9 = vpop.f32.mrb[19].mxu0  ;;  %v505_v10 = vpop.f32.mrb[19].mxu1 }
 0x119   :  { %v754_v11 = vpack.c.bf16 %v585_v63, %v585_v63  ;;  %664 = vst.msk [vmem:[%s1205_s4 + $0x10] sm:$0xf] %vm659_vm1, %v752_v0  ;;  %v586_v12 = vmax.f32 %v570_v2, 0.0  ;;  %v503_v13 = vadd.f32 %v806_v3, %v502_v62  ;;  %v809_v14 = vadd.f32 %v808_v9, %v807_v5 }
 0x11a   :  { %v753_v15 = vpack.c.bf16 %v584_v7, %v584_v7 }
 0x11b   :  { %666 = vst.msk [vmem:[%s1205_s4 + $0x18] sm:$0xf] %vm659_vm1, %v754_v11  ;;  %v755_v16 = vpack.c.bf16 %v586_v12, %v586_v12  ;;  %v548_v17 = vmul.f32 %v1094_v4, %v503_v13  ;;  %v506_v18 = vadd.f32 %v809_v14, %v505_v10 }
 0x11c   :  { %665 = vst.msk [vmem:[%s1205_s4 + $0x14] sm:$0xf] %vm659_vm1, %v753_v15 }
 0x11d   :  { %667 = vst.msk [vmem:[%s1205_s4 + $0x1c] sm:$0xf] %vm659_vm1, %v755_v16  ;;  %v571_v19 = vadd.f32 %v1099_v8, %v548_v17  ;;  %v549_v20 = vmul.f32 %v1094_v4, %v506_v18  ;;  %v810_v21 = vpop.f32.mrb[20].mxu0  ;;  %v856_v22 = vpop.f32.mrb[20].mxu1 }
 0x11e   :  { %v527_v23 = vadd.f32 %v856_v22, %v1087_v59  ;;  %v811_v24 = vpop.f32.mrb[21].mxu0  ;;  %v518_v25 = vpop.f32.mrb[21].mxu1 }
 0x11f   :  { %v587_v26 = vmax.f32 %v571_v19, 0.0  ;;  %v572_v27 = vadd.f32 %v1099_v8, %v549_v20  ;;  %v812_v28 = vadd.f32 %v811_v24, %v810_v21  ;;  %v519_v29 = vadd.f32 %v1083_v47, %v518_v25  ;;  %v813_v30 = vpop.f32.mrb[22].mxu0  ;;  %v857_v31 = vpop.f32.mrb[22].mxu1 }
 0x120   :  { %v554_v32 = vmul.f32 %v1094_v4, %v527_v23  ;;  %v530_v33 = vadd.f32 %v857_v31, %v1089_v1  ;;  %v814_v34 = vpop.f32.mrb[23].mxu0  ;;  %v521_v35 = vpop.f32.mrb[23].mxu1 }
 0x121   :  { %v756_v36 = vpack.c.bf16 %v587_v26, %v587_v26  ;;  %v588_v37 = vmax.f32 %v572_v27, 0.0  ;;  %v511_v38 = vadd.f32 %v852_v58, %v812_v28  ;;  %v552_v59 = vmul.f32 %v1094_v4, %v519_v29 }
 0x122   :  { %v577_v39 = vadd.f32 %v1099_v8, %v554_v32  ;;  %v555_v40 = vmul.f32 %v1094_v4, %v530_v33  ;;  %v815_v41 = vadd.f32 %v814_v34, %v813_v30  ;;  %v522_v47 = vadd.f32 %v1085_v53, %v521_v35 }
 0x123   :  { %668 = vst.msk [vmem:[%s1205_s4 + $0x20] sm:$0xf] %vm659_vm1, %v756_v36  ;;  %v757_v1 = vpack.c.bf16 %v588_v37, %v588_v37  ;;  %v550_v42 = vmul.f32 %v1094_v4, %v511_v38  ;;  %v575_v43 = vadd.f32 %v1099_v8, %v552_v59 }
 0x124   :  { %v593_v44 = vmax.f32 %v577_v39, 0.0  ;;  %v578_v45 = vadd.f32 %v1099_v8, %v555_v40  ;;  %v514_v46 = vadd.f32 %v853_v6, %v815_v41  ;;  %v553_v48 = vmul.f32 %v1094_v4, %v522_v47 }
 0x125   :  { %669 = vst.msk [vmem:[%s1205_s4 + $0x24] sm:$0xf] %vm659_vm1, %v757_v1  ;;  %v573_v53 = vadd.f32 %v1099_v8, %v550_v42  ;;  %v591_v49 = vmax.f32 %v575_v43, 0.0 }
 0x126   :  { %v762_v50 = vpack.c.bf16 %v593_v44, %v593_v44  ;;  %v594_v51 = vmax.f32 %v578_v45, 0.0  ;;  %v551_v52 = vmul.f32 %v1094_v4, %v514_v46  ;;  %v576_v54 = vadd.f32 %v1099_v8, %v553_v48 }
 0x127   :  { %v589_v55 = vmax.f32 %v573_v53, 0.0  ;;  %v760_v56 = vpack.c.bf16 %v591_v49, %v591_v49 }
 0x128   :  { %674 = vst.msk [vmem:[%s1205_s4 + $0x38] sm:$0xf] %vm659_vm1, %v762_v50  ;;  %v763_v57 = vpack.c.bf16 %v594_v51, %v594_v51  ;;  %v574_v58 = vadd.f32 %v1099_v8, %v551_v52  ;;  %v592_v60 = vmax.f32 %v576_v54, 0.0 }
 0x129   :  { %v758_v61 = vpack.c.bf16 %v589_v55, %v589_v55  ;;  %672 = vst.msk [vmem:[%s1205_s4 + $0x30] sm:$0xf] %vm659_vm1, %v760_v56 }
 0x12a   :  { %675 = vst.msk [vmem:[%s1205_s4 + $0x3c] sm:$0xf] %vm659_vm1, %v763_v57  ;;  %v590_v4 = vmax.f32 %v574_v58, 0.0  ;;  %v761_v62 = vpack.c.bf16 %v592_v60, %v592_v60 }
 0x12b   :  { %670 = vst.msk [vmem:[%s1205_s4 + $0x28] sm:$0xf] %vm659_vm1, %v758_v61 }
 0x12c   :  { %v759_v8 = vpack.c.bf16 %v590_v4, %v590_v4  ;;  %673 = vst.msk [vmem:[%s1205_s4 + $0x34] sm:$0xf] %vm659_vm1, %v761_v62 }
 0x12e   :  { %671 = vst.msk [vmem:[%s1205_s4 + $0x2c] sm:$0xf] %vm659_vm1, %v759_v8 }

// kernel: _lambda_.15
= control target key start
LH: loop header
LB: loop body
LE: loop exit
PB: predicated region body
PF: predicated region fallthrough
CT: control target
= control target key end

     0   :  { %9 = vsyncpa [#allocation3], 0  ;;  %v218_v1 = vmov 0.0   ;;  %v40_v3 = vlaneseq  ;;  %vm219_vm0 = vmmov 0   ;;  %v220_v9 = vmov 1966171168   ;;  %s291_s0 = inlined_call_operand.vmem [shape: bf16[2,64], index: 0, kind: input, shape index: {}]   ;;  %s292_s1 = inlined_call_operand.vmem [shape: bf16[64,128], index: 1, kind: input, shape index: {}]   ;;  %s293_s2 = inlined_call_operand.vmem [shape: f32[1,128], index: 2, kind: input, shape index: {}]   ;;  %s294_s3 = inlined_call_operand.vmem [shape: f32[1,128], index: 3, kind: input, shape index: {}]   ;;  %s295_s4 = inlined_call_operand.hbm [shape: f32[2,128], index: 4, kind: output, shape index: {}]  }
   0x1   :  { %v190_v0 = vld [vmem:[%s292_s1] sm:$0xff]   ;;  %172 = vmatprep.subr.bf16.mxu0 %v218_v1  ;;  %v191_v2 = vld [vmem:[%s292_s1 + $0x8] sm:$0xff]   ;;  %180 = vmatprep.mubr.msk.bf16.mxu0 %vm219_vm0, %v218_v1  ;;  %v192_v8 = vld [vmem:[%s292_s1 + $0x10] sm:$0xff]   ;;  %v38_v10 = vunpack.c.l.s4 %v220_v9  ;;  %vm83_vm1 = vcmask 523264  }
   0x2   :  { %173 = vmatpush3.bf16.msra.mxu0 %v190_v0  ;;  %v19_v4 = vld [vmem:[%s291_s0] sm:$0x1]  ;;  %v20_v5 = vld [vmem:[%s291_s0 + $0x1] sm:$0x1]  ;;  %v21_v6 = vld [vmem:[%s291_s0 + $0x2] sm:$0x1] }
   0x3   :  { %174 = vmatprep.subr.bf16.mxu0 %v218_v1  ;;  %v22_v7 = vld [vmem:[%s291_s0 + $0x3] sm:$0x1]  ;;  %v41_v11 = vshrl.u32 %v40_v3, 7  ;;  %v35_v12 = vcombine.low %v19_v4, %v20_v5  ;;  %v39_v14 = vunpack.c.0.s8 %v38_v10  ;;  %v193_v15 = vld [vmem:[%s292_s1 + $0x18] sm:$0xff]   ;;  %v165_v21 = vld [vmem:[%s293_s2] ss:$0 sm:$0xff] }
   0x4   :  { %v36_v13 = vcombine.low %v21_v6, %v22_v7  ;;  %v166_v23 = vld [vmem:[%s294_s3] ss:$0 sm:$0xff] }
   0x5   :  { %v42_v16 = vsub.s32 %v39_v14, %v41_v11 }
   0x6   :  { %175 = vmatpush3.bf16.msra.mxu0 %v191_v2 }
   0x7   :  { %176 = vmatprep.subr.bf16.mxu0 %v218_v1  ;;  %v43_v17 = vrot.slane %v35_v12, %v42_v16  ;;  %v50_v18 = vrot.slane %v36_v13, %v42_v16 }
   0x9   :  { %v51_v19 = vcombine.low %v43_v17, %v50_v18 }
   0xa   :  { %177 = vmatpush3.bf16.msra.mxu0 %v192_v8 }
   0xb   :  { %178 = vmatprep.subr.bf16.mxu0 %v218_v1  ;;  %v58_v20 = vrot.slane %v51_v19, %v42_v16 }
   0xe   :  { %179 = vmatpush3.bf16.msra.mxu0 %v193_v15 }
  0x11   :  { %181 = vmatmul.mubr.msk.bf16.vlgmr.msra.gmra.mrb[0].mxu0 %vm83_vm1, %v58_v20 }
  0xe4   :  { %v121_v22 = vpop.f32.mrb[0].mxu0 }
  0xe5   :  { %v134_v24 = vmul.f32 %v165_v21, %v121_v22  ;;  %v182_v25 = vpop.f32.mrb[1].mxu0 }
  0xe6   :  { %v124_v26 = vpop.f32.mrb[2].mxu0 }
  0xe7   :  { %v142_v27 = vadd.f32 %v166_v23, %v134_v24  ;;  %v183_v28 = vpop.f32.mrb[3].mxu0 }
  0xe9   :  { %143 = vst [vmem:[#allocation2] sm:$0xff] %v142_v27 }
  0xea   :  { %148 = vsyncadd [#allocation3], 96  ;;  %s221_s1 = smov [#allocation2]  }
  0xeb   :  { %s149_s8 = sshll.u32 %s221_s1, 4  ;;  %s150_s8 = int_to_ptr.vmem [resolvable:$true] %s149_s8 }
  0xec   :  { %s194_s9 = scalar_lea.vmem %s150_s8, 32  ;;  %s198_s10 = scalar_lea.vmem %s150_s8, 128 }
  0xed   :  { %p195_p0 = scmp.ne.s32.totalorder %s150_s8, %s194_s9  ;;  %p199_p1 = scmp.lt.s32.totalorder %s150_s8, %s150_s8 }
  0xee   :  { %p200_p2 = scmp.lt.s32.totalorder %s198_s10, %s194_s9 }
  0xf0   :  { %p201_p3 = por %p200_p2, %p199_p1 }
  0xf2   :  { %p202_p4 = pnand %p201_p3, %p195_p0 }
  0xf4   :  { %205 = shalt.err (!%p202_p4)
}
  0xf5   :  { %s206_s11 = scalar_lea.hbm %s295_s4, 32 }
  0xf6   :  { %p207_p5 = scmp.ne.s32.totalorder %s295_s4, %s206_s11  ;;  %p210_p6 = scmp.lt.u32.totalorder %s206_s11, %s295_s4 }
  0xf8   :  { %p212_p7 = pnand %p210_p6, %p207_p5 }
  0xfa   :  { %215 = shalt.err (!%p212_p7)
}
  0xfb   :  { %s222_s16 = smov 32   ;;  %s223_s17 = smov 2  }
  0xfc   :  { %155 = dma.vmem_to_hbm [thread:$0]  %s150_s8, 32, %s295_s4, [#allocation3], %s222_s16, %s222_s16, %s223_s17  }
  0xfd   :  { %216 = dma.done.wait [#allocation3], 128  }
  0xfe   :  { %217 = vsyncadd [#allocation3], 4294967168 }
  0xff   :  { %159 = vsyncpa [#allocation3], 1 }

// kernel: _lambda_.14
= control target key start
LH: loop header
LB: loop body
LE: loop exit
PB: predicated region body
PF: predicated region fallthrough
CT: control target
= control target key end

     0   :  { %vm566_vm0 = vcmask 523264   ;;  %vm954_vm1 = vcmask 261120   ;;  %vm1264_vm2 = vcmask 519168   ;;  %s2234_s1 = inlined_call_operand.vmem [shape: bf16[576,64], index: 1, kind: input, shape index: {}]   ;;  %s2235_s0 = inlined_call_operand.vmem [shape: bf16[128,576], index: 0, kind: input, shape index: {}]   ;;  %s2236_s5 = inlined_call_operand.vmem [shape: bf16[32,64], index: 5, kind: input, shape index: {}]   ;;  %s2237_s4 = inlined_call_operand.vmem [shape: bf16[128,32], index: 4, kind: input, shape index: {}]   ;;  %s2238_s2 = inlined_call_operand.vmem [shape: f32[1,64], index: 2, kind: input, shape index: {}]   ;;  %s2239_s6 = inlined_call_operand.vmem [shape: f32[1,64], index: 6, kind: input, shape index: {}]   ;;  %s2240_s3 = inlined_call_operand.vmem [shape: f32[1,64], index: 3, kind: input, shape index: {}]   ;;  %s2241_s7 = inlined_call_operand.vmem [shape: f32[1,64], index: 7, kind: input, shape index: {}]   ;;  %s2242_s8 = inlined_call_operand.vmem [shape: bf16[128,64], index: 8, kind: output, shape index: {}]  }
   0x1   :  { %v1617_v0 = vld [vmem:[%s2234_s1 + $0x40] sm:$0xff]   ;;  %v1621_v4 = vld [vmem:[%s2234_s1 + $0x48] sm:$0xff]   ;;  %v1625_v8 = vld [vmem:[%s2234_s1 + $0x50] sm:$0xff]  }
   0x2   :  { %v1618_v1 = vld [vmem:[%s2234_s1 + $0xc0] sm:$0xff]   ;;  %1423 = vmatprep.subr.bf16.mxu0 %v1617_v0  ;;  %v1622_v5 = vld [vmem:[%s2234_s1 + $0xc8] sm:$0xff]   ;;  %v1626_v9 = vld [vmem:[%s2234_s1 + $0xd0] sm:$0xff]  }
   0x3   :  { %v1619_v2 = vld [vmem:[%s2234_s1] sm:$0xff]   ;;  %1487 = vmatprep.subr.bf16.mxu1 %v1618_v1  ;;  %v1623_v6 = vld [vmem:[%s2234_s1 + $0x8] sm:$0xff]   ;;  %v1627_v10 = vld [vmem:[%s2234_s1 + $0x10] sm:$0xff]  }
   0x4   :  { %v1620_v3 = vld [vmem:[%s2234_s1 + $0x80] sm:$0xff]   ;;  %1424 = vmatpush3.bf16.msra.mxu0 %v1619_v2  ;;  %v1624_v7 = vld [vmem:[%s2234_s1 + $0x88] sm:$0xff]   ;;  %v1628_v11 = vld [vmem:[%s2234_s1 + $0x90] sm:$0xff]  }
   0x5   :  { %1488 = vmatpush3.bf16.msra.mxu1 %v1620_v3  ;;  %1425 = vmatprep.subr.bf16.mxu0 %v1621_v4  ;;  %v1629_v12 = vld [vmem:[%s2234_s1 + $0x58] sm:$0xff]   ;;  %v1633_v16 = vld [vmem:[%s2234_s1 + $0x60] sm:$0xff]   ;;  %v1637_v20 = vld [vmem:[%s2234_s1 + $0x68] sm:$0xff]  }
   0x6   :  { %1489 = vmatprep.subr.bf16.mxu1 %v1622_v5  ;;  %v1630_v13 = vld [vmem:[%s2234_s1 + $0xd8] sm:$0xff]   ;;  %v1634_v17 = vld [vmem:[%s2234_s1 + $0xe0] sm:$0xff]   ;;  %v1638_v21 = vld [vmem:[%s2234_s1 + $0xe8] sm:$0xff]  }
   0x7   :  { %v1631_v14 = vld [vmem:[%s2234_s1 + $0x18] sm:$0xff]   ;;  %v1635_v18 = vld [vmem:[%s2234_s1 + $0x20] sm:$0xff]   ;;  %v1639_v22 = vld [vmem:[%s2234_s1 + $0x28] sm:$0xff]  }
   0x8   :  { %1426 = vmatpush3.bf16.msra.mxu0 %v1623_v6  ;;  %v1632_v15 = vld [vmem:[%s2234_s1 + $0x98] sm:$0xff]   ;;  %v1636_v19 = vld [vmem:[%s2234_s1 + $0xa0] sm:$0xff]   ;;  %v1640_v23 = vld [vmem:[%s2234_s1 + $0xa8] sm:$0xff]  }
   0x9   :  { %1490 = vmatpush3.bf16.msra.mxu1 %v1624_v7  ;;  %1427 = vmatprep.subr.bf16.mxu0 %v1625_v8  ;;  %v1641_v24 = vld [vmem:[%s2234_s1 + $0x70] sm:$0xff]   ;;  %v1645_v28 = vld [vmem:[%s2234_s1 + $0x78] sm:$0xff]   ;;  %v1654_v35 = vld [vmem:[%s2235_s0 + $0xc] ss:$20 sps:$4 sm:$0xff]  }
   0xa   :  { %1491 = vmatprep.subr.bf16.mxu1 %v1626_v9  ;;  %v1642_v25 = vld [vmem:[%s2234_s1 + $0xf0] sm:$0xff]   ;;  %v1646_v29 = vld [vmem:[%s2234_s1 + $0xf8] sm:$0xff]   ;;  %v1655_v36 = vld [vmem:[%s2234_s1 + $0x100] sm:$0xff]   ;;  %720 = vmatprep.mubr.bf16.mxu1 %v1654_v35 }
   0xb   :  { %v1643_v26 = vld [vmem:[%s2234_s1 + $0x30] sm:$0xff]   ;;  %v1647_v30 = vld [vmem:[%s2234_s1 + $0x38] sm:$0xff]   ;;  %v1656_v37 = vld [vmem:[%s2236_s5] sm:$0xff]  }
   0xc   :  { %1428 = vmatpush3.bf16.msra.mxu0 %v1627_v10  ;;  %v1644_v27 = vld [vmem:[%s2234_s1 + $0xb0] sm:$0xff]   ;;  %v1648_v31 = vld [vmem:[%s2234_s1 + $0xb8] sm:$0xff]   ;;  %v1657_v38 = vld [vmem:[%s2235_s0 + $0x2c] ss:$20 sps:$4 sm:$0xff]  }
   0xd   :  { %1492 = vmatpush3.bf16.msra.mxu1 %v1628_v11  ;;  %1429 = vmatprep.subr.bf16.mxu0 %v1629_v12  ;;  %v1649_v32 = vld [vmem:[%s2235_s0] ss:$20 sps:$4 sm:$0xff]   ;;  %v1651_v33 = vld [vmem:[%s2235_s0 + $0x4] ss:$20 sps:$4 sm:$0xff]   ;;  %v1652_v34 = vld [vmem:[%s2235_s0 + $0x8] ss:$20 sps:$4 sm:$0xff]  }
   0xe   :  { %1493 = vmatprep.subr.bf16.mxu1 %v1630_v13  ;;  %623 = vmatprep.mubr.bf16.mxu0 %v1651_v33  ;;  %v1659_v39 = vld [vmem:[%s2235_s0 + $0x34] ss:$20 sps:$4 sm:$0xff]   ;;  %v1662_v41 = vld [vmem:[%s2235_s0 + $0x30] ss:$20 sps:$4 sm:$0xff]   ;;  %v1668_v46 = vld [vmem:[%s2235_s0 + $0x58] ss:$20 sps:$4 sm:$0xff]  }
   0xf   :  { %v1661_v40 = vld [vmem:[%s2235_s0 + $0x28] ss:$20 sps:$4 sm:$0xff]   ;;  %v1667_v45 = vld [vmem:[%s2235_s0 + $0x50] ss:$20 sps:$4 sm:$0xff]   ;;  %v1674_v51 = vld [vmem:[%s2235_s0 + $0x78] ss:$20 sps:$4 sm:$0xff]  }
  0x10   :  { %1430 = vmatpush3.bf16.msra.mxu0 %v1631_v14  ;;  %v1663_v42 = vld [vmem:[%s2235_s0 + $0x54] ss:$20 sps:$4 sm:$0xff]   ;;  %v1665_v43 = vld [vmem:[%s2235_s0 + $0x5c] ss:$20 sps:$4 sm:$0xff]   ;;  %v1672_v48 = vld [vmem:[%s2235_s0 + $0x84] ss:$20 sps:$4 sm:$0xff]  }
  0x11   :  { %1494 = vmatpush3.bf16.msra.mxu1 %v1632_v15  ;;  %1431 = vmatprep.subr.bf16.mxu0 %v1633_v16  ;;  %v1669_v44 = vld [vmem:[%s2234_s1 + $0x108] sm:$0xff]   ;;  %v1670_v47 = vld [vmem:[%s2235_s0 + $0x7c] ss:$20 sps:$4 sm:$0xff]   ;;  %v1675_v52 = vld [vmem:[%s2235_s0 + $0x80] ss:$20 sps:$4 sm:$0xff]  }
  0x12   :  { %1495 = vmatprep.subr.bf16.mxu1 %v1634_v17  ;;  %v1682_v49 = vld [vmem:[%s2234_s1 + $0x110] sm:$0xff]   ;;  %v1683_v50 = vld [vmem:[%s2236_s5 + $0x8] sm:$0xff]   ;;  %v1696_v53 = vld [vmem:[%s2234_s1 + $0x118] sm:$0xff]  }
  0x13   :  { %v1676_v54 = vld [vmem:[%s2235_s0 + $0xa4] ss:$20 sps:$4 sm:$0xff]   ;;  %v1678_v55 = vld [vmem:[%s2235_s0 + $0xac] ss:$20 sps:$4 sm:$0xff]   ;;  %v1681_v57 = vld [vmem:[%s2235_s0 + $0xa8] ss:$20 sps:$4 sm:$0xff]  }
  0x14   :  { %1432 = vmatpush3.bf16.msra.mxu0 %v1635_v18  ;;  %v1680_v56 = vld [vmem:[%s2235_s0 + $0xa0] ss:$20 sps:$4 sm:$0xff]   ;;  %v1688_v60 = vld [vmem:[%s2235_s0 + $0xc8] ss:$20 sps:$4 sm:$0xff]   ;;  %v1689_v61 = vld [vmem:[%s2235_s0 + $0xd0] ss:$20 sps:$4 sm:$0xff]  }
  0x15   :  { %1496 = vmatpush3.bf16.msra.mxu1 %v1636_v19  ;;  %1433 = vmatprep.subr.bf16.mxu0 %v1637_v20  ;;  %v1684_v58 = vld [vmem:[%s2235_s0 + $0xcc] ss:$20 sps:$4 sm:$0xff]   ;;  %v1686_v59 = vld [vmem:[%s2235_s0 + $0xd4] ss:$20 sps:$4 sm:$0xff]   ;;  %v1692_v63 = vld [vmem:[%s2235_s0 + $0xfc] ss:$20 sps:$4 sm:$0xff]  }
  0x16   :  { %1497 = vmatprep.subr.bf16.mxu1 %v1638_v21  ;;  %v1690_v62 = vld [vmem:[%s2235_s0 + $0xf4] ss:$20 sps:$4 sm:$0xff]   ;;  %v1694_v0 = vld [vmem:[%s2235_s0 + $0xf0] ss:$20 sps:$4 sm:$0xff]   ;;  %v1695_v1 = vld [vmem:[%s2235_s0 + $0xf8] ss:$20 sps:$4 sm:$0xff]  }
  0x17   :  { %v1697_v2 = vld [vmem:[%s2235_s0 + $0x11c] ss:$20 sps:$4 sm:$0xff]   ;;  %v1699_v3 = vld [vmem:[%s2235_s0 + $0x124] ss:$20 sps:$4 sm:$0xff]   ;;  %v1702_v5 = vld [vmem:[%s2235_s0 + $0x120] ss:$20 sps:$4 sm:$0xff]  }
  0x18   :  { %1434 = vmatpush3.bf16.msra.mxu0 %v1639_v22  ;;  %v1701_v4 = vld [vmem:[%s2235_s0 + $0x118] ss:$20 sps:$4 sm:$0xff]   ;;  %v1703_v6 = vld [vmem:[%s2235_s0 + $0x10] ss:$20 sps:$4 sm:$0xff]   ;;  %v1707_v10 = vld [vmem:[%s2235_s0 + $0x60] ss:$20 sps:$4 sm:$0xff]  }
  0x19   :  { %1498 = vmatpush3.bf16.msra.mxu1 %v1640_v23  ;;  %1435 = vmatprep.subr.bf16.mxu0 %v1641_v24  ;;  %v1705_v7 = vld [vmem:[%s2237_s4] sm:$0xff]   ;;  %v1704_v8 = vld [vmem:[%s2235_s0 + $0x38] ss:$20 sps:$4 sm:$0xff]   ;;  %v1709_v11 = vld [vmem:[%s2237_s4 + $0x10] sm:$0xff]  }
  0x1a   :  { %1499 = vmatprep.subr.bf16.mxu1 %v1642_v25  ;;  %v1706_v9 = vld [vmem:[%s2237_s4 + $0x8] sm:$0xff]   ;;  %v1710_v13 = vld [vmem:[%s2237_s4 + $0x18] sm:$0xff]   ;;  %v1711_v14 = vld [vmem:[%s2235_s0 + $0xb0] ss:$20 sps:$4 sm:$0xff]  }
  0x1b   :  { %v1708_v12 = vld [vmem:[%s2235_s0 + $0x88] ss:$20 sps:$4 sm:$0xff]   ;;  %v1713_v15 = vld [vmem:[%s2237_s4 + $0x20] sm:$0xff]   ;;  %v1712_v16 = vld [vmem:[%s2235_s0 + $0xd8] ss:$20 sps:$4 sm:$0xff]  }
  0x1c   :  { %1436 = vmatpush3.bf16.msra.mxu0 %v1643_v26  ;;  %v1714_v17 = vld [vmem:[%s2237_s4 + $0x28] sm:$0xff]   ;;  %v1715_v18 = vld [vmem:[%s2235_s0 + $0x100] ss:$20 sps:$4 sm:$0xff]   ;;  %v1718_v21 = vld [vmem:[%s2237_s4 + $0x38] sm:$0xff]  }
  0x1d   :  { %1500 = vmatpush3.bf16.msra.mxu1 %v1644_v27  ;;  %1437 = vmatprep.subr.bf16.mxu0 %v1645_v28  ;;  %v1717_v19 = vld [vmem:[%s2237_s4 + $0x30] sm:$0xff]   ;;  %v1716_v20 = vld [vmem:[%s2235_s0 + $0x128] ss:$20 sps:$4 sm:$0xff]  }
  0x1e   :  { %1501 = vmatprep.subr.bf16.mxu1 %v1646_v29 }
  0x20   :  { %1438 = vmatpush3.bf16.msra.mxu0 %v1647_v30 }
  0x21   :  { %1502 = vmatpush3.bf16.msra.mxu1 %v1648_v31  ;;  %1573 = vmatprep.subr.bf16.mxu0 %v1655_v36 }
  0x22   :  { %1597 = vmatprep.subr.bf16.mxu1 %v1656_v37 }
  0x23   :  { %624 = vmatmul.mubr.bf16.vlgmr.msra.gmra.mrb[0].mxu0 %v1649_v32 }
  0x24   :  { %721 = vmatmul.mubr.bf16.vlgmr.msra.gmra.mrb[0].mxu1 %v1652_v34  ;;  %1574 = vmatpush3.bf16.msra.mxu0 %v1655_v36 }
  0x25   :  { %1598 = vmatpush3.bf16.msra.mxu1 %v1656_v37  ;;  %631 = vmatprep.mubr.bf16.mxu0 %v1657_v38 }
  0x26   :  { %728 = vmatprep.mubr.bf16.mxu1 %v1659_v39  ;;  %1575 = vmatprep.subr.bf16.mxu0 %v1669_v44 }
  0x27   :  { %1599 = vmatprep.subr.bf16.mxu1 %v1683_v50 }
  0x28   :  { %1576 = vmatpush3.bf16.msra.mxu0 %v1669_v44 }
  0x29   :  { %1577 = vmatprep.subr.bf16.mxu0 %v1682_v49  ;;  %1600 = vmatpush3.bf16.msra.mxu1 %v1683_v50 }
  0x2b   :  { %632 = vmatmul.mubr.bf16.gmra.mrb[4].mxu0 %v1661_v40 }
  0x2c   :  { %729 = vmatmul.mubr.bf16.gmra.mrb[4].mxu1 %v1662_v41  ;;  %639 = vmatprep.mubr.bf16.mxu0 %v1663_v42 }
  0x2d   :  { %736 = vmatprep.mubr.bf16.mxu1 %v1665_v43  ;;  %1578 = vmatpush3.bf16.msra.mxu0 %v1682_v49 }
  0x2e   :  { %1579 = vmatprep.subr.bf16.mxu0 %v1696_v53 }
  0x31   :  { %1580 = vmatpush3.bf16.msra.mxu0 %v1696_v53 }
  0x33   :  { %640 = vmatmul.mubr.bf16.gmra.mrb[8].mxu0 %v1667_v45 }
  0x34   :  { %737 = vmatmul.mubr.bf16.gmra.mrb[8].mxu1 %v1668_v46  ;;  %647 = vmatprep.mubr.bf16.mxu0 %v1670_v47 }
  0x35   :  { %744 = vmatprep.mubr.bf16.mxu1 %v1672_v48 }
  0x3b   :  { %648 = vmatmul.mubr.bf16.gmra.mrb[12].mxu0 %v1674_v51 }
  0x3c   :  { %745 = vmatmul.mubr.bf16.gmra.mrb[12].mxu1 %v1675_v52  ;;  %655 = vmatprep.mubr.bf16.mxu0 %v1676_v54 }
  0x3d   :  { %752 = vmatprep.mubr.bf16.mxu1 %v1678_v55 }
  0x43   :  { %656 = vmatmul.mubr.bf16.gmra.mrb[16].mxu0 %v1680_v56 }
  0x44   :  { %753 = vmatmul.mubr.bf16.gmra.mrb[16].mxu1 %v1681_v57  ;;  %663 = vmatprep.mubr.bf16.mxu0 %v1684_v58 }
  0x45   :  { %760 = vmatprep.mubr.bf16.mxu1 %v1686_v59 }
  0x4b   :  { %664 = vmatmul.mubr.bf16.gmra.mrb[20].mxu0 %v1688_v60 }
  0x4c   :  { %761 = vmatmul.mubr.bf16.gmra.mrb[20].mxu1 %v1689_v61  ;;  %671 = vmatprep.mubr.bf16.mxu0 %v1690_v62 }
  0x4d   :  { %768 = vmatprep.mubr.bf16.mxu1 %v1692_v63 }
  0x53   :  { %672 = vmatmul.mubr.bf16.gmra.mrb[24].mxu0 %v1694_v0 }
  0x54   :  { %769 = vmatmul.mubr.bf16.gmra.mrb[24].mxu1 %v1695_v1  ;;  %679 = vmatprep.mubr.bf16.mxu0 %v1697_v2 }
  0x55   :  { %776 = vmatprep.mubr.bf16.mxu1 %v1699_v3 }
  0x5b   :  { %680 = vmatmul.mubr.bf16.gmra.mrb[28].mxu0 %v1701_v4 }
  0x5c   :  { %777 = vmatmul.mubr.bf16.gmra.mrb[28].mxu1 %v1702_v5  ;;  %1581 = vmatprep.mubr.msk.bf16.mxu0 %vm566_vm0, %v1703_v6 }
  0x5d   :  { %1601 = vmatprep.mubr.msk.bf16.mxu1 %vm954_vm1, %v1705_v7 }
  0x63   :  { %1582 = vmatmul.mubr.msk.bf16.vlgmr.msra.gmra.mrb[32].mxu0 %vm566_vm0, %v1704_v8 }
  0x64   :  { %1602 = vmatmul.mubr.msk.bf16.vlgmr.msra.gmra.mrb[32].mxu1 %vm954_vm1, %v1706_v9  ;;  %1585 = vmatprep.mubr.msk.bf16.mxu0 %vm566_vm0, %v1707_v10 }
  0x65   :  { %1605 = vmatprep.mubr.msk.bf16.mxu1 %vm954_vm1, %v1709_v11 }
  0x6b   :  { %1586 = vmatmul.mubr.msk.bf16.gmra.mrb[36].mxu0 %vm566_vm0, %v1708_v12 }
  0x6c   :  { %1606 = vmatmul.mubr.msk.bf16.gmra.mrb[36].mxu1 %vm954_vm1, %v1710_v13  ;;  %1589 = vmatprep.mubr.msk.bf16.mxu0 %vm566_vm0, %v1711_v14 }
  0x6d   :  { %1609 = vmatprep.mubr.msk.bf16.mxu1 %vm954_vm1, %v1713_v15 }
  0x73   :  { %1590 = vmatmul.mubr.msk.bf16.gmra.mrb[40].mxu0 %vm566_vm0, %v1712_v16 }
  0x74   :  { %1610 = vmatmul.mubr.msk.bf16.gmra.mrb[40].mxu1 %vm954_vm1, %v1714_v17  ;;  %1593 = vmatprep.mubr.msk.bf16.mxu0 %vm566_vm0, %v1715_v18 }
  0x75   :  { %1613 = vmatprep.mubr.msk.bf16.mxu1 %vm954_vm1, %v1717_v19 }
  0x7b   :  { %1594 = vmatmul.mubr.msk.bf16.gmra.mrb[44].mxu0 %vm566_vm0, %v1716_v20 }
  0x7c   :  { %1614 = vmatmul.mubr.msk.bf16.gmra.mrb[44].mxu1 %vm954_vm1, %v1718_v21 }
  0xf6   :  { %v1439_v22 = vpop.f32.mrb[0].mxu0 }
  0xf7   :  { %v1503_v23 = vpop.f32.mrb[0].mxu1  ;;  %v1440_v24 = vpop.f32.mrb[1].mxu0 }
  0xf8   :  { %v1441_v25 = vadd.f32 %v1440_v24, %v1439_v22  ;;  %v1504_v26 = vpop.f32.mrb[1].mxu1  ;;  %v1442_v27 = vpop.f32.mrb[2].mxu0 }
  0xf9   :  { %v1505_v28 = vadd.f32 %v1504_v26, %v1503_v23  ;;  %v1506_v29 = vpop.f32.mrb[2].mxu1  ;;  %v1443_v30 = vpop.f32.mrb[3].mxu0 }
  0xfa   :  { %v1444_v31 = vadd.f32 %v1443_v30, %v1442_v27  ;;  %v1507_v32 = vpop.f32.mrb[3].mxu1 }
  0xfb   :  { %v1508_v33 = vadd.f32 %v1507_v32, %v1506_v29  ;;  %v2038_v34 = vadd.f32 %v1505_v28, %v1441_v25 }
  0xfd   :  { %v2040_v35 = vadd.f32 %v1508_v33, %v1444_v31 }
  0xfe   :  { %v1445_v36 = vpop.f32.mrb[4].mxu0 }
  0xff   :  { %v1509_v37 = vpop.f32.mrb[4].mxu1  ;;  %v1446_v38 = vpop.f32.mrb[5].mxu0 }
 0x100   :  { %v1447_v39 = vadd.f32 %v1446_v38, %v1445_v36  ;;  %v1510_v40 = vpop.f32.mrb[5].mxu1  ;;  %v1448_v41 = vpop.f32.mrb[6].mxu0 }
 0x101   :  { %v1511_v42 = vadd.f32 %v1510_v40, %v1509_v37  ;;  %v1512_v43 = vpop.f32.mrb[6].mxu1  ;;  %v1449_v44 = vpop.f32.mrb[7].mxu0 }
 0x102   :  { %v1450_v45 = vadd.f32 %v1449_v44, %v1448_v41  ;;  %v1513_v46 = vpop.f32.mrb[7].mxu1 }
 0x103   :  { %v1514_v47 = vadd.f32 %v1513_v46, %v1512_v43  ;;  %v2042_v48 = vadd.f32 %v1511_v42, %v1447_v39 }
 0x105   :  { %v2044_v49 = vadd.f32 %v1514_v47, %v1450_v45 }
 0x106   :  { %v1451_v50 = vpop.f32.mrb[8].mxu0 }
 0x107   :  { %v1515_v51 = vpop.f32.mrb[8].mxu1  ;;  %v1452_v52 = vpop.f32.mrb[9].mxu0 }
 0x108   :  { %v1453_v53 = vadd.f32 %v1452_v52, %v1451_v50  ;;  %v1516_v54 = vpop.f32.mrb[9].mxu1  ;;  %v1454_v55 = vpop.f32.mrb[10].mxu0 }
 0x109   :  { %v1517_v56 = vadd.f32 %v1516_v54, %v1515_v51  ;;  %v1518_v57 = vpop.f32.mrb[10].mxu1  ;;  %v1455_v58 = vpop.f32.mrb[11].mxu0 }
 0x10a   :  { %v1456_v59 = vadd.f32 %v1455_v58, %v1454_v55  ;;  %v1519_v60 = vpop.f32.mrb[11].mxu1 }
 0x10b   :  { %v1520_v61 = vadd.f32 %v1519_v60, %v1518_v57  ;;  %v2046_v62 = vadd.f32 %v1517_v56, %v1453_v53 }
 0x10d   :  { %v2048_v63 = vadd.f32 %v1520_v61, %v1456_v59 }
 0x10e   :  { %v1457_v0 = vpop.f32.mrb[12].mxu0 }
 0x10f   :  { %v1521_v1 = vpop.f32.mrb[12].mxu1  ;;  %v1458_v2 = vpop.f32.mrb[13].mxu0 }
 0x110   :  { %v1459_v3 = vadd.f32 %v1458_v2, %v1457_v0  ;;  %v1522_v4 = vpop.f32.mrb[13].mxu1  ;;  %v1460_v5 = vpop.f32.mrb[14].mxu0 }
 0x111   :  { %v1523_v6 = vadd.f32 %v1522_v4, %v1521_v1  ;;  %v1524_v7 = vpop.f32.mrb[14].mxu1  ;;  %v1461_v8 = vpop.f32.mrb[15].mxu0 }
 0x112   :  { %v1462_v9 = vadd.f32 %v1461_v8, %v1460_v5  ;;  %v1525_v10 = vpop.f32.mrb[15].mxu1 }
 0x113   :  { %v1526_v11 = vadd.f32 %v1525_v10, %v1524_v7  ;;  %v2050_v12 = vadd.f32 %v1523_v6, %v1459_v3 }
 0x115   :  { %v2052_v13 = vadd.f32 %v1526_v11, %v1462_v9 }
 0x116   :  { %v1463_v14 = vpop.f32.mrb[16].mxu0 }
 0x117   :  { %v1527_v15 = vpop.f32.mrb[16].mxu1  ;;  %v1464_v16 = vpop.f32.mrb[17].mxu0 }
 0x118   :  { %v1465_v17 = vadd.f32 %v1464_v16, %v1463_v14  ;;  %v1528_v18 = vpop.f32.mrb[17].mxu1  ;;  %v1466_v19 = vpop.f32.mrb[18].mxu0  ;;  %v2078_v16 = vld [vmem:[%s2239_s6] ss:$0 sm:$0xff] }
 0x119   :  { %v1529_v20 = vadd.f32 %v1528_v18, %v1527_v15  ;;  %v1530_v21 = vpop.f32.mrb[18].mxu1  ;;  %v1467_v22 = vpop.f32.mrb[19].mxu0  ;;  %v2073_v15 = vld [vmem:[%s2238_s2] ss:$0 sm:$0xff] }
 0x11a   :  { %v1468_v23 = vadd.f32 %v1467_v22, %v1466_v19  ;;  %v1531_v24 = vpop.f32.mrb[19].mxu1  ;;  %v2085_v22 = vld [vmem:[%s2240_s3] ss:$0 sm:$0xff] }
 0x11b   :  { %v1532_v25 = vadd.f32 %v1531_v24, %v1530_v21  ;;  %v2054_v26 = vadd.f32 %v1529_v20, %v1465_v17 }
 0x11d   :  { %v2056_v27 = vadd.f32 %v1532_v25, %v1468_v23 }
 0x11e   :  { %v1469_v28 = vpop.f32.mrb[20].mxu0 }
 0x11f   :  { %v1533_v29 = vpop.f32.mrb[20].mxu1  ;;  %v1470_v30 = vpop.f32.mrb[21].mxu0 }
 0x120   :  { %v1471_v31 = vadd.f32 %v1470_v30, %v1469_v28  ;;  %v1534_v32 = vpop.f32.mrb[21].mxu1  ;;  %v1472_v33 = vpop.f32.mrb[22].mxu0 }
 0x121   :  { %v1535_v36 = vadd.f32 %v1534_v32, %v1533_v29  ;;  %v1536_v37 = vpop.f32.mrb[22].mxu1  ;;  %v1473_v38 = vpop.f32.mrb[23].mxu0 }
 0x122   :  { %v1474_v39 = vadd.f32 %v1473_v38, %v1472_v33  ;;  %v1537_v40 = vpop.f32.mrb[23].mxu1 }
 0x123   :  { %v1538_v41 = vadd.f32 %v1537_v40, %v1536_v37  ;;  %v2058_v42 = vadd.f32 %v1535_v36, %v1471_v31  ;;  %v2098_v37 = vld [vmem:[%s2241_s7] ss:$0 sm:$0xff] }
 0x125   :  { %v2060_v43 = vadd.f32 %v1538_v41, %v1474_v39 }
 0x126   :  { %v1475_v44 = vpop.f32.mrb[24].mxu0 }
 0x127   :  { %v1539_v45 = vpop.f32.mrb[24].mxu1  ;;  %v1476_v46 = vpop.f32.mrb[25].mxu0 }
 0x128   :  { %v1477_v47 = vadd.f32 %v1476_v46, %v1475_v44  ;;  %v1540_v50 = vpop.f32.mrb[25].mxu1  ;;  %v1478_v51 = vpop.f32.mrb[26].mxu0 }
 0x129   :  { %v1541_v52 = vadd.f32 %v1540_v50, %v1539_v45  ;;  %v1542_v53 = vpop.f32.mrb[26].mxu1  ;;  %v1479_v54 = vpop.f32.mrb[27].mxu0 }
 0x12a   :  { %v1480_v55 = vadd.f32 %v1479_v54, %v1478_v51  ;;  %v1543_v56 = vpop.f32.mrb[27].mxu1 }
 0x12b   :  { %v1544_v57 = vadd.f32 %v1543_v56, %v1542_v53  ;;  %v2062_v58 = vadd.f32 %v1541_v52, %v1477_v47 }
 0x12d   :  { %v2064_v59 = vadd.f32 %v1544_v57, %v1480_v55 }
 0x12e   :  { %v1481_v60 = vpop.f32.mrb[28].mxu0 }
 0x12f   :  { %v1545_v61 = vpop.f32.mrb[28].mxu1  ;;  %v1482_v0 = vpop.f32.mrb[29].mxu0 }
 0x130   :  { %v1483_v1 = vadd.f32 %v1482_v0, %v1481_v60  ;;  %v1546_v2 = vpop.f32.mrb[29].mxu1  ;;  %v1484_v3 = vpop.f32.mrb[30].mxu0 }
 0x131   :  { %v1547_v4 = vadd.f32 %v1546_v2, %v1545_v61  ;;  %v1548_v5 = vpop.f32.mrb[30].mxu1  ;;  %v1485_v6 = vpop.f32.mrb[31].mxu0 }
 0x132   :  { %v1486_v7 = vadd.f32 %v1485_v6, %v1484_v3  ;;  %v1549_v8 = vpop.f32.mrb[31].mxu1 }
 0x133   :  { %v1550_v9 = vadd.f32 %v1549_v8, %v1548_v5  ;;  %v2066_v10 = vadd.f32 %v1547_v4, %v1483_v1 }
 0x135   :  { %v2068_v11 = vadd.f32 %v1550_v9, %v1486_v7 }
 0x136   :  { %v1583_v14 = vpop.f32.mrb[32].mxu0 }
 0x137   :  { %v828_v17 = vadd.f32 %v1583_v14, %v2042_v48  ;;  %v819_v18 = vpop.f32.mrb[33].mxu0  ;;  %v1603_v19 = vpop.f32.mrb[32].mxu1 }
 0x138   :  { %v820_v20 = vadd.f32 %v819_v18, %v2038_v34  ;;  %v1584_v21 = vpop.f32.mrb[34].mxu0  ;;  %v1013_v23 = vpop.f32.mrb[33].mxu1  ;;  %v1131_v28 = vmul.f32 %v1603_v19, %v2078_v16 }
 0x139   :  { %v1085_v24 = vmul.f32 %v2073_v15, %v828_v17  ;;  %v831_v25 = vadd.f32 %v1584_v21, %v2044_v49  ;;  %v822_v29 = vpop.f32.mrb[35].mxu0  ;;  %v1604_v30 = vpop.f32.mrb[34].mxu1  ;;  %v1129_v34 = vmul.f32 %v2078_v16, %v1013_v23 }
 0x13a   :  { %v1083_v48 = vmul.f32 %v2073_v15, %v820_v20  ;;  %v823_v31 = vadd.f32 %v822_v29, %v2040_v35  ;;  %v1016_v32 = vpop.f32.mrb[35].mxu1  ;;  %v1132_v35 = vmul.f32 %v1604_v30, %v2078_v16 }
 0x13b   :  { %v1086_v33 = vmul.f32 %v2073_v15, %v831_v25  ;;  %v1108_v36 = vadd.f32 %v2085_v22, %v1085_v24  ;;  %v1130_v45 = vmul.f32 %v2078_v16, %v1016_v32 }
 0x13c   :  { %v1084_v49 = vmul.f32 %v2073_v15, %v823_v31  ;;  %v1106_v38 = vadd.f32 %v2085_v22, %v1083_v48 }
 0x13d   :  { %v1147_v39 = vadd.f32 %v1131_v28, %v1108_v36  ;;  %v1109_v40 = vadd.f32 %v2085_v22, %v1086_v33 }
 0x13e   :  { %v1145_v41 = vadd.f32 %v1129_v34, %v1106_v38  ;;  %v1107_v44 = vadd.f32 %v2085_v22, %v1084_v49  ;;  %v1587_v46 = vpop.f32.mrb[36].mxu0 }
 0x13f   :  { %v1170_v47 = vadd.f32 %v2098_v37, %v1147_v39  ;;  %v1148_v50 = vadd.f32 %v1132_v35, %v1109_v40  ;;  %v844_v51 = vadd.f32 %v1587_v46, %v2050_v12  ;;  %v835_v52 = vpop.f32.mrb[37].mxu0  ;;  %v1607_v53 = vpop.f32.mrb[36].mxu1 }
 0x140   :  { %v1168_v54 = vadd.f32 %v2098_v37, %v1145_v41  ;;  %v1146_v55 = vadd.f32 %v1130_v45, %v1107_v44  ;;  %v836_v56 = vadd.f32 %v835_v52, %v2046_v62  ;;  %v1588_v57 = vpop.f32.mrb[38].mxu0  ;;  %v1135_v60 = vmul.f32 %v1607_v53, %v2078_v16  ;;  %v1029_v61 = vpop.f32.mrb[37].mxu1 }
 0x141   :  { %v1186_v0 = vmax.f32 %v1170_v47, 0.0  ;;  %v1171_v1 = vadd.f32 %v2098_v37, %v1148_v50  ;;  %v1089_v2 = vmul.f32 %v2073_v15, %v844_v51  ;;  %v847_v3 = vadd.f32 %v1588_v57, %v2052_v13  ;;  %v838_v4 = vpop.f32.mrb[39].mxu0  ;;  %v1608_v12 = vpop.f32.mrb[38].mxu1 }
 0x142   :  { %v1184_v5 = vmax.f32 %v1168_v54, 0.0  ;;  %v1169_v6 = vadd.f32 %v2098_v37, %v1146_v55  ;;  %v1087_v7 = vmul.f32 %v2073_v15, %v836_v56  ;;  %v839_v62 = vadd.f32 %v838_v4, %v2048_v63  ;;  %v1032_v8 = vpop.f32.mrb[39].mxu1 }
 0x143   :  { %v1409_v9 = vpack.c.bf16 %v1186_v0, %v1186_v0  ;;  %v1187_v14 = vmax.f32 %v1171_v1, 0.0  ;;  %v1090_v17 = vmul.f32 %v2073_v15, %v847_v3  ;;  %v1112_v18 = vadd.f32 %v2085_v22, %v1089_v2 }
 0x144   :  { %v1407_v19 = vpack.c.bf16 %v1184_v5, %v1184_v5  ;;  %v1185_v20 = vmax.f32 %v1169_v6, 0.0  ;;  %v1088_v13 = vmul.f32 %v2073_v15, %v839_v62  ;;  %v1110_v21 = vadd.f32 %v2085_v22, %v1087_v7 }
 0x145   :  { %1267 = vst.msk [vmem:[%s2242_s8 + $0x8] sm:$0xf] %vm1264_vm2, %v1409_v9  ;;  %v1410_v23 = vpack.c.bf16 %v1187_v14, %v1187_v14  ;;  %v1151_v63 = vadd.f32 %v1135_v60, %v1112_v18  ;;  %v1133_v24 = vmul.f32 %v2078_v16, %v1029_v61  ;;  %v1113_v25 = vadd.f32 %v2085_v22, %v1090_v17 }
 0x146   :  { %1265 = vst.msk [vmem:[%s2242_s8] sm:$0xf] %vm1264_vm2, %v1407_v19  ;;  %v1408_v28 = vpack.c.bf16 %v1185_v20, %v1185_v20  ;;  %v1136_v29 = vmul.f32 %v1608_v12, %v2078_v16  ;;  %v1111_v30 = vadd.f32 %v2085_v22, %v1088_v13  ;;  %v1134_v48 = vmul.f32 %v2078_v16, %v1032_v8  ;;  %v1591_v31 = vpop.f32.mrb[40].mxu0 }
 0x147   :  { %1268 = vst.msk [vmem:[%s2242_s8 + $0xc] sm:$0xf] %vm1264_vm2, %v1410_v23  ;;  %v1174_v34 = vadd.f32 %v2098_v37, %v1151_v63  ;;  %v1149_v32 = vadd.f32 %v1133_v24, %v1110_v21  ;;  %v860_v33 = vadd.f32 %v1591_v31, %v2058_v42  ;;  %v851_v36 = vpop.f32.mrb[41].mxu0  ;;  %v1611_v49 = vpop.f32.mrb[40].mxu1 }
 0x148   :  { %1266 = vst.msk [vmem:[%s2242_s8 + $0x4] sm:$0xf] %vm1264_vm2, %v1408_v28  ;;  %v1152_v38 = vadd.f32 %v1136_v29, %v1113_v25  ;;  %v1150_v39 = vadd.f32 %v1134_v48, %v1111_v30  ;;  %v852_v40 = vadd.f32 %v851_v36, %v2054_v26  ;;  %v1592_v35 = vpop.f32.mrb[42].mxu0  ;;  %v1139_v41 = vmul.f32 %v1611_v49, %v2078_v16  ;;  %v1045_v44 = vpop.f32.mrb[41].mxu1 }
 0x149   :  { %v1190_v45 = vmax.f32 %v1174_v34, 0.0  ;;  %v1172_v46 = vadd.f32 %v2098_v37, %v1149_v32  ;;  %v1093_v42 = vmul.f32 %v2073_v15, %v860_v33  ;;  %v863_v47 = vadd.f32 %v1592_v35, %v2060_v43  ;;  %v854_v50 = vpop.f32.mrb[43].mxu0  ;;  %v1612_v51 = vpop.f32.mrb[42].mxu1 }
 0x14a   :  { %v1175_v52 = vadd.f32 %v2098_v37, %v1152_v38  ;;  %v1173_v53 = vadd.f32 %v2098_v37, %v1150_v39  ;;  %v1091_v54 = vmul.f32 %v2073_v15, %v852_v40  ;;  %v855_v26 = vadd.f32 %v854_v50, %v2056_v27  ;;  %v1048_v55 = vpop.f32.mrb[43].mxu1 }
 0x14b   :  { %v1413_v56 = vpack.c.bf16 %v1190_v45, %v1190_v45  ;;  %v1188_v57 = vmax.f32 %v1172_v46, 0.0  ;;  %v1094_v60 = vmul.f32 %v2073_v15, %v863_v47  ;;  %v1116_v61 = vadd.f32 %v2085_v22, %v1093_v42 }
 0x14c   :  { %v1191_v0 = vmax.f32 %v1175_v52, 0.0  ;;  %v1189_v1 = vmax.f32 %v1173_v53, 0.0  ;;  %v1092_v43 = vmul.f32 %v2073_v15, %v855_v26  ;;  %v1114_v2 = vadd.f32 %v2085_v22, %v1091_v54 }
 0x14d   :  { %1271 = vst.msk [vmem:[%s2242_s8 + $0x18] sm:$0xf] %vm1264_vm2, %v1413_v56  ;;  %v1411_v3 = vpack.c.bf16 %v1188_v57, %v1188_v57  ;;  %v1155_v27 = vadd.f32 %v1139_v41, %v1116_v61  ;;  %v1137_v4 = vmul.f32 %v2078_v16, %v1045_v44  ;;  %v1117_v12 = vadd.f32 %v2085_v22, %v1094_v60 }
 0x14e   :  { %v1414_v5 = vpack.c.bf16 %v1191_v0, %v1191_v0  ;;  %v1412_v6 = vpack.c.bf16 %v1189_v1, %v1189_v1  ;;  %v1140_v7 = vmul.f32 %v1612_v51, %v2078_v16  ;;  %v1115_v62 = vadd.f32 %v2085_v22, %v1092_v43  ;;  %v1595_v8 = vpop.f32.mrb[44].mxu0 }
 0x14f   :  { %1269 = vst.msk [vmem:[%s2242_s8 + $0x10] sm:$0xf] %vm1264_vm2, %v1411_v3  ;;  %v1178_v9 = vadd.f32 %v2098_v37, %v1155_v27  ;;  %v1153_v14 = vadd.f32 %v1137_v4, %v1114_v2  ;;  %v1138_v17 = vmul.f32 %v2078_v16, %v1048_v55  ;;  %v876_v18 = vadd.f32 %v1595_v8, %v2066_v10  ;;  %v867_v19 = vpop.f32.mrb[45].mxu0  ;;  %v1615_v20 = vpop.f32.mrb[44].mxu1 }
 0x150   :  { %1272 = vst.msk [vmem:[%s2242_s8 + $0x1c] sm:$0xf] %vm1264_vm2, %v1414_v5  ;;  %1270 = vst.msk [vmem:[%s2242_s8 + $0x14] sm:$0xf] %vm1264_vm2, %v1412_v6  ;;  %v1156_v13 = vadd.f32 %v1140_v7, %v1117_v12  ;;  %v868_v21 = vadd.f32 %v867_v19, %v2062_v58  ;;  %v1596_v23 = vpop.f32.mrb[46].mxu0  ;;  %v1143_v63 = vmul.f32 %v1615_v20, %v2078_v16  ;;  %v1061_v24 = vpop.f32.mrb[45].mxu1 }
 0x151   :  { %v1194_v10 = vmax.f32 %v1178_v9, 0.0  ;;  %v1176_v25 = vadd.f32 %v2098_v37, %v1153_v14  ;;  %v1154_v28 = vadd.f32 %v1138_v17, %v1115_v62  ;;  %v1097_v29 = vmul.f32 %v2073_v15, %v876_v18  ;;  %v870_v30 = vpop.f32.mrb[47].mxu0  ;;  %v1616_v48 = vpop.f32.mrb[46].mxu1 }
 0x152   :  { %v1179_v31 = vadd.f32 %v2098_v37, %v1156_v13  ;;  %v1095_v34 = vmul.f32 %v2073_v15, %v868_v21  ;;  %v879_v32 = vadd.f32 %v1596_v23, %v2068_v11  ;;  %v871_v58 = vadd.f32 %v870_v30, %v2064_v59  ;;  %v1064_v33 = vpop.f32.mrb[47].mxu1 }
 0x153   :  { %v1417_v36 = vpack.c.bf16 %v1194_v10, %v1194_v10  ;;  %v1192_v49 = vmax.f32 %v1176_v25, 0.0  ;;  %v1177_v38 = vadd.f32 %v2098_v37, %v1154_v28  ;;  %v1120_v39 = vadd.f32 %v2085_v22, %v1097_v29 }
 0x154   :  { %v1195_v40 = vmax.f32 %v1179_v31, 0.0  ;;  %v1098_v35 = vmul.f32 %v2073_v15, %v879_v32  ;;  %v1096_v41 = vmul.f32 %v2073_v15, %v871_v58  ;;  %v1118_v44 = vadd.f32 %v2085_v22, %v1095_v34 }
 0x155   :  { %1275 = vst.msk [vmem:[%s2242_s8 + $0x28] sm:$0xf] %vm1264_vm2, %v1417_v36  ;;  %v1415_v59 = vpack.c.bf16 %v1192_v49, %v1192_v49  ;;  %v1193_v11 = vmax.f32 %v1177_v38, 0.0  ;;  %v1159_v45 = vadd.f32 %v1143_v63, %v1120_v39  ;;  %v1141_v46 = vmul.f32 %v2078_v16, %v1061_v24 }
 0x156   :  { %v1418_v42 = vpack.c.bf16 %v1195_v40, %v1195_v40  ;;  %v1121_v47 = vadd.f32 %v2085_v22, %v1098_v35  ;;  %v1144_v50 = vmul.f32 %v1616_v48, %v2078_v16  ;;  %v1119_v51 = vadd.f32 %v2085_v22, %v1096_v41 }
 0x157   :  { %1273 = vst.msk [vmem:[%s2242_s8 + $0x20] sm:$0xf] %vm1264_vm2, %v1415_v59  ;;  %v1416_v15 = vpack.c.bf16 %v1193_v11, %v1193_v11  ;;  %v1182_v52 = vadd.f32 %v2098_v37, %v1159_v45  ;;  %v1157_v53 = vadd.f32 %v1141_v46, %v1118_v44  ;;  %v1142_v54 = vmul.f32 %v2078_v16, %v1064_v33 }
 0x158   :  { %1276 = vst.msk [vmem:[%s2242_s8 + $0x2c] sm:$0xf] %vm1264_vm2, %v1418_v42  ;;  %v1160_v26 = vadd.f32 %v1144_v50, %v1121_v47 }
 0x159   :  { %1274 = vst.msk [vmem:[%s2242_s8 + $0x24] sm:$0xf] %vm1264_vm2, %v1416_v15  ;;  %v1198_v22 = vmax.f32 %v1182_v52, 0.0  ;;  %v1180_v55 = vadd.f32 %v2098_v37, %v1157_v53  ;;  %v1158_v56 = vadd.f32 %v1142_v54, %v1119_v51 }
 0x15a   :  { %v1183_v57 = vadd.f32 %v2098_v37, %v1160_v26 }
 0x15b   :  { %v1421_v60 = vpack.c.bf16 %v1198_v22, %v1198_v22  ;;  %v1196_v61 = vmax.f32 %v1180_v55, 0.0  ;;  %v1181_v16 = vadd.f32 %v2098_v37, %v1158_v56 }
 0x15c   :  { %v1199_v0 = vmax.f32 %v1183_v57, 0.0 }
 0x15d   :  { %1279 = vst.msk [vmem:[%s2242_s8 + $0x38] sm:$0xf] %vm1264_vm2, %v1421_v60  ;;  %v1419_v1 = vpack.c.bf16 %v1196_v61, %v1196_v61  ;;  %v1197_v43 = vmax.f32 %v1181_v16, 0.0 }
 0x15e   :  { %v1422_v2 = vpack.c.bf16 %v1199_v0, %v1199_v0 }
 0x15f   :  { %1277 = vst.msk [vmem:[%s2242_s8 + $0x30] sm:$0xf] %vm1264_vm2, %v1419_v1  ;;  %v1420_v3 = vpack.c.bf16 %v1197_v43, %v1197_v43 }
 0x160   :  { %1280 = vst.msk [vmem:[%s2242_s8 + $0x3c] sm:$0xf] %vm1264_vm2, %v1422_v2 }
 0x161   :  { %1278 = vst.msk [vmem:[%s2242_s8 + $0x34] sm:$0xf] %vm1264_vm2, %v1420_v3 }

</bundles_post_ra>
